<compile_context>
chip_gen: v6e
topology: v6e:2x2x1
jax: 0.10.0
libtpu: 0.0.40
codegen_flags: <defaults>
</compile_context>

<pallas_src>
import functools
import numpy as np
import jax
import jax.numpy as jnp
from jax.experimental import pallas as pl
from jax.experimental.pallas import tpu as pltpu

LANE = 128
TM_MAX = 1024                  # row-tile ceiling (multiple of 8 sublanes)
FUSED_Y_MAX_BYTES = 16 << 20   # keep conv intermediate y in VMEM below this


# ----------------------------------------------------------------------------
# small helpers
# ----------------------------------------------------------------------------
def _rup(x, m):
    return (x + m - 1) // m * m


def _pad2(a, rows, cols):
    r, c = a.shape
    if r == rows and c == cols:
        return a
    return jnp.pad(a, ((0, rows - r), (0, cols - c)))


def _tm_cap(kp, elem_bytes=2, budget=8 << 20):
    """Cap the row tile so one double-buffered (tm, kp) input tile stays small."""
    cap = (budget // (kp * elem_bytes)) // 8 * 8
    return int(max(64, min(TM_MAX, cap)))


def _row_tiling(m, tmax=TM_MAX, even_tiles=False):
    """Pick (mp, tm): tm multiple of 8, mp = tm * r >= m with minimal padding.
    even_tiles=True keeps the tile count even when >1 (v7x 2-TC balance)."""
    mp8 = _rup(m, 8)
    r = max(1, -(-mp8 // tmax))
    if even_tiles and r > 1 and r % 2:
        r += 1
    tm = _rup(-(-mp8 // r), 8)
    return tm * r, tm


def _vmem_limit(est_bytes):
    # >= v6e/v7x default scoped VMEM (32 MiB; v5e default is only 16 MiB),
    # capped comfortably below v7x's 64 MiB physical per-TC VMEM.
    return int(min(max(2 * est_bytes, 32 << 20), 56 << 20))


# ----------------------------------------------------------------------------
# Pallas kernels
# ----------------------------------------------------------------------------
def _mm_bias_kernel(x_ref, w_ref, b_ref, y_ref):
    """y = x @ w + b; single K block, weight fully VMEM-resident."""
    y = jnp.dot(x_ref[...], w_ref[...], preferred_element_type=jnp.float32)
    y_ref[...] = (y + b_ref[...]).astype(y_ref.dtype)


def _fused_conv_bn_lrelu_kernel(tm, true_rows, slope, eps,
                                x_ref, w_ref, b_ref, g_ref, bt_ref,
                                o_ref, y_sc, sum_sc, ssq_sc, scale_sc, shift_sc):
    """Single-kernel conv + BatchNorm(batch stats) + LeakyReLU.

    grid = (2, row_tiles), both axes 'arbitrary' (sequential):
      phase 0: per row tile, y = x @ W + b into the VMEM y scratch and exact
               masked [sum, sumsq] accumulation (padded tail rows excluded).
      phase 1: at the first tile fold scale = gamma/sqrt(var+eps) and
               shift = beta - scale*mean; then per tile apply the affine +
               LeakyReLU and write the output (full-lane 128-wide stores).
    """
    p = pl.program_id(0)
    i = pl.program_id(1)
    row0 = pl.multiple_of(i * tm, 8)
    inv_cnt = 1.0 / float(true_rows)

    @pl.when(p == 0)
    def _():
        @pl.when(i == 0)
        def _():
            sum_sc[...] = jnp.zeros_like(sum_sc)
            ssq_sc[...] = jnp.zeros_like(ssq_sc)

        y = jnp.dot(x_ref[...], w_ref[...],
                    preferred_element_type=jnp.float32) + b_ref[...]
        y_sc[pl.ds(row0, tm), :] = y
        # Exclude zero-padded tail rows from the BatchNorm batch statistics.
        rows = i * tm + jax.lax.broadcasted_iota(jnp.int32, (tm, 1), 0)
        ym = y * (rows < true_rows).astype(jnp.float32)
        sum_sc[...] += jnp.sum(ym, axis=0, keepdims=True)
        ssq_sc[...] += jnp.sum(ym * ym, axis=0, keepdims=True)

    @pl.when(p == 1)
    def _():
        @pl.when(i == 0)
        def _():
            mean = sum_sc[...] * inv_cnt
            var = jnp.maximum(ssq_sc[...] * inv_cnt - mean * mean, 0.0)
            scale = g_ref[...] * jax.lax.rsqrt(var + eps)
            scale_sc[...] = scale
            shift_sc[...] = bt_ref[...] - scale * mean

        z = y_sc[pl.ds(row0, tm), :] * scale_sc[...] + shift_sc[...]
        o_ref[...] = jnp.where(z >= 0, z, slope * z).astype(o_ref.dtype)


def _mm_bias_stats_kernel(tm, true_rows, x_ref, w_ref, b_ref, y_ref, part_ref):
    """Fallback pass 1: y = x @ w + b (bf16 out) + per-tile masked partials."""
    y = jnp.dot(x_ref[...], w_ref[...],
                preferred_element_type=jnp.float32) + b_ref[...]
    y_ref[...] = y.astype(y_ref.dtype)
    rows = pl.program_id(0) * tm + jax.lax.broadcasted_iota(jnp.int32, (tm, 1), 0)
    ym = y * (rows < true_rows).astype(jnp.float32)
    # Rows 2..7 of this partials block are never read downstream.
    part_ref[0:1, :] = jnp.sum(ym, axis=0, keepdims=True)
    part_ref[1:2, :] = jnp.sum(ym * ym, axis=0, keepdims=True)


def _bn_lrelu_kernel(slope, y_ref, scale_ref, shift_ref, o_ref):
    """Fallback pass 2: folded BN affine (y*scale + shift) + LeakyReLU."""
    z = y_ref[...].astype(jnp.float32) * scale_ref[...] + shift_ref[...]
    o_ref[...] = jnp.where(z >= 0, z, slope * z).astype(o_ref.dtype)


# ----------------------------------------------------------------------------
# pallas_call wrappers
# ----------------------------------------------------------------------------
def pallas_matmul_bias(x, w_t, b_row, out_dtype=jnp.float32):
    """y = x @ w_t + b.  Returns the row/lane padded result (caller slices)."""
    m = x.shape[0]
    kp, np_ = w_t.shape
    mp, tm = _row_tiling(m, _tm_cap(kp), even_tiles=True)
    xp = _pad2(x.astype(w_t.dtype), mp, kp)
    grid = (mp // tm,)
    eb = jnp.dtype(w_t.dtype).itemsize
    ob = jnp.dtype(out_dtype).itemsize
    est = 2 * (tm * kp * eb + tm * np_ * ob) + kp * np_ * eb + np_ * 4
    cost = pl.CostEstimate(
        flops=2 * mp * kp * np_, transcendentals=0,
        bytes_accessed=mp * kp * eb + kp * np_ * eb + mp * np_ * ob)
    return pl.pallas_call(
        _mm_bias_kernel,
        out_shape=jax.ShapeDtypeStruct((mp, np_), out_dtype),
        grid_spec=pltpu.PrefetchScalarGridSpec(
            num_scalar_prefetch=0,
            grid=grid,
            in_specs=[
                pl.BlockSpec((tm, kp), lambda i: (i, 0)),
                pl.BlockSpec((kp, np_), lambda i: (0, 0)),   # weight resident
                pl.BlockSpec((1, np_), lambda i: (0, 0)),
            ],
            out_specs=pl.BlockSpec((tm, np_), lambda i: (i, 0)),
        ),
        compiler_params=pltpu.CompilerParams(
            dimension_semantics=("parallel",),
            vmem_limit_bytes=_vmem_limit(est)),
        cost_estimate=cost,
    )(xp, w_t, b_row)


def pallas_conv_bn_lrelu_fused(mat, w_t, b_row, g_row, bt_row, out_dtype,
                               eps=1e-5, slope=0.2):
    """Single-kernel onering-conv matmul + BatchNorm(batch stats) + LeakyReLU."""
    m = mat.shape[0]
    kp, np_ = w_t.shape
    mp, tm = _row_tiling(m, _tm_cap(kp))
    matp = _pad2(mat.astype(w_t.dtype), mp, kp)
    r = mp // tm
    eb = jnp.dtype(w_t.dtype).itemsize
    ob = jnp.dtype(out_dtype).itemsize
    est = (2 * (tm * kp * eb + tm * np_ * ob) + kp * np_ * eb
           + mp * np_ * 4 + 4 * 8 * np_ * 4)
    cost = pl.CostEstimate(
        flops=2 * mp * kp * np_ + 8 * mp * np_, transcendentals=np_,
        bytes_accessed=mp * kp * eb + kp * np_ * eb + mp * np_ * ob)
    kern = functools.partial(_fused_conv_bn_lrelu_kernel, tm, m, slope, eps)
    return pl.pallas_call(
        kern,
        out_shape=jax.ShapeDtypeStruct((mp, np_), out_dtype),
        grid_spec=pltpu.PrefetchScalarGridSpec(
            num_scalar_prefetch=0,
            grid=(2, r),
            in_specs=[
                # phase 1 pins the x block index so x is streamed only once
                pl.BlockSpec((tm, kp),
                             lambda p, i, _r=r: ((1 - p) * i + p * (_r - 1), 0)),
                pl.BlockSpec((kp, np_), lambda p, i: (0, 0)),  # weight resident
                pl.BlockSpec((1, np_), lambda p, i: (0, 0)),
                pl.BlockSpec((1, np_), lambda p, i: (0, 0)),
                pl.BlockSpec((1, np_), lambda p, i: (0, 0)),
            ],
            # output block stays at 0 (never written back) during phase 0,
            # then advances through the row tiles in phase 1.
            out_specs=pl.BlockSpec((tm, np_), lambda p, i: (p * i, 0)),
            scratch_shapes=[
                pltpu.VMEM((mp, np_), jnp.float32),   # full y intermediate
                pltpu.VMEM((1, np_), jnp.float32),    # sum
                pltpu.VMEM((1, np_), jnp.float32),    # sumsq
                pltpu.VMEM((1, np_), jnp.float32),    # folded scale
                pltpu.VMEM((1, np_), jnp.float32),    # folded shift
            ],
        ),
        compiler_params=pltpu.CompilerParams(
            dimension_semantics=("arbitrary", "arbitrary"),
            vmem_limit_bytes=_vmem_limit(est)),
        cost_estimate=cost,
    )(matp, w_t, b_row, g_row, bt_row)


def pallas_matmul_bias_stats(mat, w_t, b_row):
    """Large-M fallback pass 1: bf16 y + exact per-feature sum/sumsq."""
    m = mat.shape[0]
    kp, np_ = w_t.shape
    mp, tm = _row_tiling(m, _tm_cap(kp), even_tiles=True)
    matp = _pad2(mat.astype(w_t.dtype), mp, kp)
    r = mp // tm
    eb = jnp.dtype(w_t.dtype).itemsize
    est = 2 * (tm * kp * eb + tm * np_ * 2 + 8 * np_ * 4) + kp * np_ * eb
    cost = pl.CostEstimate(
        flops=2 * mp * kp * np_ + 4 * mp * np_, transcendentals=0,
        bytes_accessed=mp * kp * eb + kp * np_ * eb + mp * np_ * 2 + r * 8 * np_ * 4)
    kern = functools.partial(_mm_bias_stats_kernel, tm, m)
    y, part = pl.pallas_call(
        kern,
        out_shape=(jax.ShapeDtypeStruct((mp, np_), jnp.bfloat16),
                   jax.ShapeDtypeStruct((r * 8, np_), jnp.float32)),
        grid_spec=pltpu.PrefetchScalarGridSpec(
            num_scalar_prefetch=0,
            grid=(r,),
            in_specs=[
                pl.BlockSpec((tm, kp), lambda i: (i, 0)),
                pl.BlockSpec((kp, np_), lambda i: (0, 0)),
                pl.BlockSpec((1, np_), lambda i: (0, 0)),
            ],
            out_specs=(pl.BlockSpec((tm, np_), lambda i: (i, 0)),
                       pl.BlockSpec((8, np_), lambda i: (i, 0))),
        ),
        compiler_params=pltpu.CompilerParams(
            dimension_semantics=("parallel",),
            vmem_limit_bytes=_vmem_limit(est)),
        cost_estimate=cost,
    )(matp, w_t, b_row)
    part = part.reshape(r, 8, np_)
    return y, jnp.sum(part[:, 0, :], axis=0), jnp.sum(part[:, 1, :], axis=0), tm


def pallas_bn_lrelu(y, scale_row, shift_row, out_dtype, tm, slope=0.2):
    """Large-M fallback pass 2: folded BN affine + LeakyReLU (bf16 y input)."""
    mp, np_ = y.shape
    grid = (mp // tm,)
    ib = jnp.dtype(y.dtype).itemsize
    ob = jnp.dtype(out_dtype).itemsize
    est = 2 * tm * np_ * (ib + ob) + 2 * np_ * 4
    cost = pl.CostEstimate(flops=4 * mp * np_, transcendentals=0,
                           bytes_accessed=mp * np_ * (ib + ob))
    return pl.pallas_call(
        functools.partial(_bn_lrelu_kernel, slope),
        out_shape=jax.ShapeDtypeStruct((mp, np_), out_dtype),
        grid_spec=pltpu.PrefetchScalarGridSpec(
            num_scalar_prefetch=0,
            grid=grid,
            in_specs=[
                pl.BlockSpec((tm, np_), lambda i: (i, 0)),
                pl.BlockSpec((1, np_), lambda i: (0, 0)),
                pl.BlockSpec((1, np_), lambda i: (0, 0)),
            ],
            out_specs=pl.BlockSpec((tm, np_), lambda i: (i, 0)),
        ),
        compiler_params=pltpu.CompilerParams(
            dimension_semantics=("parallel",),
            vmem_limit_bytes=_vmem_limit(est)),
        cost_estimate=cost,
    )(y, scale_row, shift_row)


# ----------------------------------------------------------------------------
# onering conv + BatchNorm1d (batch stats) + LeakyReLU
# ----------------------------------------------------------------------------
def onering_conv_bn_lrelu(x, neigh_orders, w_t, b_row, g_row, bt_row,
                          new_nodes, out_features, out_dtype,
                          eps=1e-5, slope=0.2):
    c = x.shape[1]
    kp, np_ = w_t.shape
    # TODO(synk): fuse this data-dependent 7-neighbor row gather into the conv
    # kernel (SMEM-prefetched indices + in-VMEM / DMA gather); kept as an XLA
    # take on the narrow bf16 activation for now.
    mat = jnp.take(x.astype(w_t.dtype), neigh_orders, axis=0)
    mat = mat.reshape(new_nodes, 7 * c)

    mp_probe, _ = _row_tiling(new_nodes, _tm_cap(kp))
    if mp_probe * np_ * 4 <= FUSED_Y_MAX_BYTES:
        # Fast path: y stays in VMEM scratch, one pallas_call total.
        out = pallas_conv_bn_lrelu_fused(mat, w_t, b_row, g_row, bt_row,
                                         out_dtype, eps, slope)
    else:
        # Large-mesh fallback: two passes with a bf16 y intermediate in HBM.
        y, s, ss, tm = pallas_matmul_bias_stats(mat, w_t, b_row)
        cnt = float(new_nodes)
        mean = s / cnt
        var = jnp.maximum(ss / cnt - mean * mean, 0.0)   # biased var (BN batch stats)
        scale = g_row * jax.lax.rsqrt(var + eps).reshape(1, -1)
        shift = bt_row - scale * mean.reshape(1, -1)
        out = pallas_bn_lrelu(y, scale, shift, out_dtype, tm, slope)
    return out[:new_nodes, :out_features]


# ----------------------------------------------------------------------------
# parameter preparation (one-time: transpose / cast / pad weights)
# ----------------------------------------------------------------------------
def prepare_params(params, in_features, out_features, compute_dtype=jnp.bfloat16):
    # TODO(synk): with only 16 real output lanes the 256-wide MXU (v6e/v7x) is
    # N-starved; packing several feature groups along N would help, but a
    # single up_block has nothing to pack with.
    f = out_features

    def prep_linear(w, b):
        n, k = w.shape                       # torch Linear weight: [out, in]
        kpad = _rup(k, LANE)
        npad = _rup(n, LANE)
        w_t = _pad2(w.T.astype(compute_dtype), kpad, npad)       # [K_pad, N_pad]
        b_row = _pad2(b.reshape(1, n).astype(jnp.float32), 1, npad)
        return w_t, b_row

    def prep_affine(g, bt, n):
        npad = _rup(n, LANE)
        return (_pad2(g.reshape(1, n).astype(jnp.float32), 1, npad),
                _pad2(bt.reshape(1, n).astype(jnp.float32), 1, npad))

    kp = {}
    kp["up_w_t"], kp["up_b"] = prep_linear(params["up_w"], params["up_b"])
    kp["c1_w_t"], kp["c1_b"] = prep_linear(params["c1_w"], params["c1_b"])
    kp["g1"], kp["bt1"] = prep_affine(params["g1"], params["bt1"], f)
    kp["c2_w_t"], kp["c2_b"] = prep_linear(params["c2_w"], params["c2_b"])
    kp["g2"], kp["bt2"] = prep_affine(params["g2"], params["bt2"], f)
    return kp


# ----------------------------------------------------------------------------
# up_block forward (glue in plain JAX, hot paths in Pallas)
# ----------------------------------------------------------------------------
def up_block_forward(x1, x2, kparams, center_idx, edge_idx, neigh_orders,
                     out_features):
    raw_nodes = x1.shape[0]
    new_nodes = 4 * raw_nodes - 6
    f = out_features

    # --- upconv_layer: Linear(in -> 7*out) ---
    y = pallas_matmul_bias(x1, kparams["up_w_t"], kparams["up_b"],
                           out_dtype=jnp.float32)
    y = y[:raw_nodes, :7 * f].reshape(raw_nodes * 7, f)          # torch .view
    # TODO(synk): center/edge index gathers are data-dependent; kept in XLA.
    cpart = jnp.take(y, center_idx, axis=0)                      # [raw, F]
    # Edge-pair mean in lane-dense [E, 2F] layout; identical numerics to
    # torch's  x[edge_idx].view(-1, F, 2).mean(dim=2).
    g2 = jnp.take(y, edge_idx, axis=0).reshape(-1, 2 * f)
    epart = 0.5 * (g2[:, 0::2] + g2[:, 1::2])
    up = jnp.concatenate([cpart, epart], axis=0)
    assert up.shape == (new_nodes, f)

    # --- skip concat ---
    x = jnp.concatenate([up, x2], axis=1)                        # [new, 2F]

    # --- block: onering conv -> BN -> LeakyReLU (x2) ---
    x = onering_conv_bn_lrelu(x, neigh_orders, kparams["c1_w_t"], kparams["c1_b"],
                              kparams["g1"], kparams["bt1"],
                              new_nodes, f, out_dtype=jnp.bfloat16)
    x = onering_conv_bn_lrelu(x, neigh_orders, kparams["c2_w_t"], kparams["c2_b"],
                              kparams["g2"], kparams["bt2"],
                              new_nodes, f, out_dtype=jnp.float32)
    return x


# ----------------------------------------------------------------------------
# Pure-JAX reference (f32, torch-faithful, for correctness sanity check)
# ----------------------------------------------------------------------------
def ref_forward(x1, x2, params, center_idx, edge_idx, neigh_orders, out_features):
    def linear(x, w, b):
        return x @ w.T + b

    def bn_lrelu(y, g, bt):
        mean = y.mean(0, keepdims=True)
        var = ((y - mean) ** 2).mean(0, keepdims=True)
        z = (y - mean) / jnp.sqrt(var + 1e-5) * g.reshape(1, -1) + bt.reshape(1, -1)
        return jnp.where(z >= 0, z, 0.2 * z)

    raw_nodes = x1.shape[0]
    new_nodes = 4 * raw_nodes - 6
    y = linear(x1, params["up_w"], params["up_b"]).reshape(raw_nodes * 7, out_features)
    c = y[center_idx]
    e = y[edge_idx].reshape(-1, out_features, 2)
    up = jnp.concatenate([c, jnp.mean(e, axis=2)], axis=0)
    x = jnp.concatenate([up, x2], axis=1)
    mat = x[neigh_orders].reshape(new_nodes, 7 * x.shape[1])
    x = bn_lrelu(linear(mat, params["c1_w"], params["c1_b"]), params["g1"], params["bt1"])
    mat = x[neigh_orders].reshape(new_nodes, 7 * x.shape[1])
    x = bn_lrelu(linear(mat, params["c2_w"], params["c2_b"]), params["g2"], params["bt2"])
    return x


# ----------------------------------------------------------------------------
if __name__ == "__main__":
    key = jax.random.PRNGKey(0)
    raw_nodes = 162                      # icosahedron level-2 vertex count
    new_nodes = 4 * raw_nodes - 6        # 642
    in_features, out_features = 32, 16

    keys = jax.random.split(key, 16)

    # inputs
    x1 = jax.random.normal(keys[0], (raw_nodes, in_features), jnp.float32)
    x2 = jax.random.normal(keys[1], (new_nodes, out_features), jnp.float32)

    # deterministic synthetic mesh connectivity
    center_idx = jnp.arange(raw_nodes, dtype=jnp.int32) * 7
    edge_idx = jax.random.randint(keys[2], (2 * (new_nodes - raw_nodes),),
                                  0, raw_nodes * 7, dtype=jnp.int32)
    neigh_orders = jax.random.randint(keys[3], (7 * new_nodes,),
                                      0, new_nodes, dtype=jnp.int32)

    def uinit(k, shape, fan_in):
        s = 1.0 / np.sqrt(fan_in)
        return jax.random.uniform(k, shape, jnp.float32, -s, s)

    params = {
        # upconv_layer: Linear(in_features -> 7*out_features)
        "up_w": uinit(keys[4], (7 * out_features, in_features), in_features),
        "up_b": uinit(keys[5], (7 * out_features,), in_features),
        # onering_conv_layer #1: Linear(7*2F -> F)
        "c1_w": uinit(keys[6], (out_features, 7 * 2 * out_features), 7 * 2 * out_features),
        "c1_b": uinit(keys[7], (out_features,), 7 * 2 * out_features),
        "g1": 1.0 + 0.1 * jax.random.normal(keys[8], (out_features,), jnp.float32),
        "bt1": 0.1 * jax.random.normal(keys[9], (out_features,), jnp.float32),
        # onering_conv_layer #2: Linear(7*F -> F)
        "c2_w": uinit(keys[10], (out_features, 7 * out_features), 7 * out_features),
        "c2_b": uinit(keys[11], (out_features,), 7 * out_features),
        "g2": 1.0 + 0.1 * jax.random.normal(keys[12], (out_features,), jnp.float32),
        "bt2": 0.1 * jax.random.normal(keys[13], (out_features,), jnp.float32),
    }

    # one-time weight transpose / cast / pad (kernel-ready layout)
    kparams = prepare_params(params, in_features, out_features)

    fwd = jax.jit(functools.partial(up_block_forward, out_features=out_features))
    out = fwd(x1, x2, kparams, center_idx, edge_idx, neigh_orders)
    out = jax.block_until_ready(out)
    assert out.shape == (new_nodes, out_features)

    ref = jax.block_until_ready(
        ref_forward(x1, x2, params, center_idx, edge_idx, neigh_orders, out_features)
    )
    # bf16 MXU inputs (f32 accumulation) bound accuracy to ~1e-2 level.
    np.testing.assert_allclose(np.asarray(out), np.asarray(ref), rtol=3e-2, atol=3e-2)

    print("KERNEL_OK")
</pallas_src>

<mosaic_0001>
module attributes {stable_mosaic.version = 11 : i64} {
  func.func @_mm_bias_kernel(%arg0: i32, %arg1: memref<168x128xbf16, #tpu.memory_space<vmem>>, %arg2: memref<128x128xbf16, #tpu.memory_space<vmem>>, %arg3: memref<1x128xf32, #tpu.memory_space<vmem>>, %arg4: memref<168x128xf32, #tpu.memory_space<vmem>>) attributes {dimension_semantics = [#tpu.dimension_semantics<parallel>], iteration_bounds = array<i64: 1>, scalar_prefetch = 0 : i64, scratch_operands = 0 : i64, tpu.core_type = #tpu.core_type<tc>, window_params = [{transform_indices = @transform_0, window_bounds = array<i64: 168, 128>}, {pipeline_mode = #tpu.pipeline_mode<synchronous>, transform_indices = @transform_1, window_bounds = array<i64: 128, 128>}, {pipeline_mode = #tpu.pipeline_mode<synchronous>, transform_indices = @transform_2, window_bounds = array<i64: 1, 128>}, {transform_indices = @transform_3, window_bounds = array<i64: 168, 128>}]} {
    %c0 = arith.constant 0 : index
    %c0_0 = arith.constant 0 : index
    %0 = vector.load %arg1[%c0, %c0_0] : memref<168x128xbf16, #tpu.memory_space<vmem>>, vector<168x128xbf16>
    %c0_1 = arith.constant 0 : index
    %c0_2 = arith.constant 0 : index
    %1 = vector.load %arg2[%c0_1, %c0_2] : memref<128x128xbf16, #tpu.memory_space<vmem>>, vector<128x128xbf16>
    %cst = arith.constant dense<0.000000e+00> : vector<168x128xf32>
    %2 = tpu.matmul %0, %1, %cst {dimension_numbers = #tpu.dot_dimension_numbers<[1], [0], [0], [1], [0, 0, 1, 1], [], []>} : vector<168x128xbf16>, vector<128x128xbf16>, vector<168x128xf32> -> vector<168x128xf32>
    %c0_3 = arith.constant 0 : index
    %c0_4 = arith.constant 0 : index
    %3 = vector.load %arg3[%c0_3, %c0_4] : memref<1x128xf32, #tpu.memory_space<vmem>>, vector<1x128xf32>
    %4 = vector.broadcast %3 : vector<1x128xf32> to vector<168x128xf32>
    %5 = arith.addf %2, %4 : vector<168x128xf32>
    %c0_5 = arith.constant 0 : index
    %c0_6 = arith.constant 0 : index
    %6 = vector.load %arg4[%c0_5, %c0_6] : memref<168x128xf32, #tpu.memory_space<vmem>>, vector<168x128xf32>
    tpu.vector_store %arg4[%c0_5, %c0_6], %5 {strides = array<i32>} : memref<168x128xf32, #tpu.memory_space<vmem>>, vector<168x128xf32>,
    return
  }
  func.func @transform_0(%arg0: i32) -> (i32, i32) {
    %c0_i32 = arith.constant 0 : i32
    %c0_i32_0 = arith.constant 0 : i32
    return %arg0, %c0_i32 : i32, i32
  }
  func.func @transform_1(%arg0: i32) -> (i32, i32) {
    %c0_i32 = arith.constant 0 : i32
    %c0_i32_0 = arith.constant 0 : i32
    %c0_i32_1 = arith.constant 0 : i32
    return %c0_i32, %c0_i32_0 : i32, i32
  }
  func.func @transform_2(%arg0: i32) -> (i32, i32) {
    %c0_i32 = arith.constant 0 : i32
    %c0_i32_0 = arith.constant 0 : i32
    %c0_i32_1 = arith.constant 0 : i32
    return %c0_i32, %c0_i32_0 : i32, i32
  }
  func.func @transform_3(%arg0: i32) -> (i32, i32) {
    %c0_i32 = arith.constant 0 : i32
    %c0_i32_0 = arith.constant 0 : i32
    return %arg0, %c0_i32 : i32, i32
  }
}

module attributes {stable_mosaic.version = 11 : i64} {
  func.func @_fused_conv_bn_lrelu_kernel(%arg0: i32, %arg1: i32, %arg2: memref<648x256xbf16, #tpu.memory_space<vmem>>, %arg3: memref<256x128xbf16, #tpu.memory_space<vmem>>, %arg4: memref<1x128xf32, #tpu.memory_space<vmem>>, %arg5: memref<1x128xf32, #tpu.memory_space<vmem>>, %arg6: memref<1x128xf32, #tpu.memory_space<vmem>>, %arg7: memref<648x128xbf16, #tpu.memory_space<vmem>>, %arg8: memref<648x128xf32, #tpu.memory_space<vmem>>, %arg9: memref<1x128xf32, #tpu.memory_space<vmem>>, %arg10: memref<1x128xf32, #tpu.memory_space<vmem>>, %arg11: memref<1x128xf32, #tpu.memory_space<vmem>>, %arg12: memref<1x128xf32, #tpu.memory_space<vmem>>) attributes {dimension_semantics = [#tpu.dimension_semantics<arbitrary>, #tpu.dimension_semantics<arbitrary>], iteration_bounds = array<i64: 2, 1>, scalar_prefetch = 0 : i64, scratch_operands = 5 : i64, tpu.core_type = #tpu.core_type<tc>, window_params = [{transform_indices = @transform_0, window_bounds = array<i64: 648, 256>}, {pipeline_mode = #tpu.pipeline_mode<synchronous>, transform_indices = @transform_1, window_bounds = array<i64: 256, 128>}, {pipeline_mode = #tpu.pipeline_mode<synchronous>, transform_indices = @transform_2, window_bounds = array<i64: 1, 128>}, {pipeline_mode = #tpu.pipeline_mode<synchronous>, transform_indices = @transform_3, window_bounds = array<i64: 1, 128>}, {pipeline_mode = #tpu.pipeline_mode<synchronous>, transform_indices = @transform_4, window_bounds = array<i64: 1, 128>}, {transform_indices = @transform_5, window_bounds = array<i64: 648, 128>}]} {
    %c648_i32 = arith.constant 648 : i32
    %0 = arith.muli %arg1, %c648_i32 : i32
    %1 = tpu.assume_multiple %0, 8 : i32
    %c0_i32 = arith.constant 0 : i32
    %2 = arith.cmpi eq, %arg0, %c0_i32 : i32
    %3 = arith.extui %2 : i1 to i32
    %c0_i32_0 = arith.constant 0 : i32
    %4 = arith.cmpi ne, %3, %c0_i32_0 : i32
    scf.if %4 {
      %c0_i32_2 = arith.constant 0 : i32
      %8 = arith.cmpi eq, %arg1, %c0_i32_2 : i32
      %9 = arith.extui %8 : i1 to i32
      %c0_i32_3 = arith.constant 0 : i32
      %10 = arith.cmpi ne, %9, %c0_i32_3 : i32
      scf.if %10 {
        %cst_21 = arith.constant 0.000000e+00 : f32
        %40 = vector.broadcast %cst_21 : f32 to vector<1x128xf32>
        %c0_22 = arith.constant 0 : index
        %c0_23 = arith.constant 0 : index
        %41 = vector.load %arg9[%c0_22, %c0_23] : memref<1x128xf32, #tpu.memory_space<vmem>>, vector<1x128xf32>
        tpu.vector_store %arg9[%c0_22, %c0_23], %40 {strides = array<i32>} : memref<1x128xf32, #tpu.memory_space<vmem>>, vector<1x128xf32>,
        %cst_24 = arith.constant 0.000000e+00 : f32
        %42 = vector.broadcast %cst_24 : f32 to vector<1x128xf32>
        %c0_25 = arith.constant 0 : index
        %c0_26 = arith.constant 0 : index
        %43 = vector.load %arg10[%c0_25, %c0_26] : memref<1x128xf32, #tpu.memory_space<vmem>>, vector<1x128xf32>
        tpu.vector_store %arg10[%c0_25, %c0_26], %42 {strides = array<i32>} : memref<1x128xf32, #tpu.memory_space<vmem>>, vector<1x128xf32>,
      } else {
      }
      %c0 = arith.constant 0 : index
      %c0_4 = arith.constant 0 : index
      %11 = vector.load %arg2[%c0, %c0_4] : memref<648x256xbf16, #tpu.memory_space<vmem>>, vector<648x256xbf16>
      %c0_5 = arith.constant 0 : index
      %c0_6 = arith.constant 0 : index
      %12 = vector.load %arg3[%c0_5, %c0_6] : memref<256x128xbf16, #tpu.memory_space<vmem>>, vector<256x128xbf16>
      %cst = arith.constant dense<0.000000e+00> : vector<648x128xf32>
      %13 = tpu.matmul %11, %12, %cst {dimension_numbers = #tpu.dot_dimension_numbers<[1], [0], [0], [1], [0, 0, 1, 1], [], []>} : vector<648x256xbf16>, vector<256x128xbf16>, vector<648x128xf32> -> vector<648x128xf32>
      %c0_7 = arith.constant 0 : index
      %c0_8 = arith.constant 0 : index
      %14 = vector.load %arg4[%c0_7, %c0_8] : memref<1x128xf32, #tpu.memory_space<vmem>>, vector<1x128xf32>
      %15 = vector.broadcast %14 : vector<1x128xf32> to vector<648x128xf32>
      %16 = arith.addf %13, %15 : vector<648x128xf32>
      %17 = arith.index_cast %1 : i32 to index
      %c0_9 = arith.constant 0 : index
      %18 = vector.load %arg8[%17, %c0_9] : memref<648x128xf32, #tpu.memory_space<vmem>>, vector<648x128xf32>
      tpu.vector_store %arg8[%17, %c0_9], %16 {strides = array<i32>} : memref<648x128xf32, #tpu.memory_space<vmem>>, vector<648x128xf32>,
      %c648_i32_10 = arith.constant 648 : i32
      %19 = arith.muli %arg1, %c648_i32_10 : i32
      %20 = tpu.iota {dimensions = array<i32: 0>} : vector<648x1xi32>
      %21 = vector.broadcast %19 : i32 to vector<648x1xi32>
      %22 = arith.addi %21, %20 : vector<648x1xi32>
      %c642_i32 = arith.constant 642 : i32
      %23 = vector.broadcast %c642_i32 : i32 to vector<648x1xi32>
      %24 = arith.cmpi slt, %22, %23 : vector<648x1xi32>
      %25 = arith.extui %24 : vector<648x1xi1> to vector<648x1xi32>
      %26 = arith.sitofp %25 : vector<648x1xi32> to vector<648x1xf32>
      %27 = vector.broadcast %26 : vector<648x1xf32> to vector<648x128xf32>
      %28 = arith.mulf %16, %27 : vector<648x128xf32>
      %c0_11 = arith.constant 0 : index
      %c0_12 = arith.constant 0 : index
      %29 = vector.load %arg9[%c0_11, %c0_12] : memref<1x128xf32, #tpu.memory_space<vmem>>, vector<1x128xf32>
      %cst_13 = arith.constant dense<0.000000e+00> : vector<128xf32>
      %30 = vector.multi_reduction <add>, %28, %cst_13 [0] : vector<648x128xf32> to vector<128xf32>
      %31 = vector.shape_cast %30 : vector<128xf32> to vector<1x128xf32>
      %32 = arith.addf %29, %31 : vector<1x128xf32>
      %c0_14 = arith.constant 0 : index
      %c0_15 = arith.constant 0 : index
      %33 = vector.load %arg9[%c0_14, %c0_15] : memref<1x128xf32, #tpu.memory_space<vmem>>, vector<1x128xf32>
      tpu.vector_store %arg9[%c0_14, %c0_15], %32 {strides = array<i32>} : memref<1x128xf32, #tpu.memory_space<vmem>>, vector<1x128xf32>,
      %c0_16 = arith.constant 0 : index
      %c0_17 = arith.constant 0 : index
      %34 = vector.load %arg10[%c0_16, %c0_17] : memref<1x128xf32, #tpu.memory_space<vmem>>, vector<1x128xf32>
      %35 = arith.mulf %28, %28 : vector<648x128xf32>
      %cst_18 = arith.constant dense<0.000000e+00> : vector<128xf32>
      %36 = vector.multi_reduction <add>, %35, %cst_18 [0] : vector<648x128xf32> to vector<128xf32>
      %37 = vector.shape_cast %36 : vector<128xf32> to vector<1x128xf32>
      %38 = arith.addf %34, %37 : vector<1x128xf32>
      %c0_19 = arith.constant 0 : index
      %c0_20 = arith.constant 0 : index
      %39 = vector.load %arg10[%c0_19, %c0_20] : memref<1x128xf32, #tpu.memory_space<vmem>>, vector<1x128xf32>
      tpu.vector_store %arg10[%c0_19, %c0_20], %38 {strides = array<i32>} : memref<1x128xf32, #tpu.memory_space<vmem>>, vector<1x128xf32>,
    } else {
    }
    %c1_i32 = arith.constant 1 : i32
    %5 = arith.cmpi eq, %arg0, %c1_i32 : i32
    %6 = arith.extui %5 : i1 to i32
    %c0_i32_1 = arith.constant 0 : i32
    %7 = arith.cmpi ne, %6, %c0_i32_1 : i32
    scf.if %7 {
      %c0_i32_2 = arith.constant 0 : i32
      %8 = arith.cmpi eq, %arg1, %c0_i32_2 : i32
      %9 = arith.extui %8 : i1 to i32
      %c0_i32_3 = arith.constant 0 : i32
      %10 = arith.cmpi ne, %9, %c0_i32_3 : i32
      scf.if %10 {
        %c0_11 = arith.constant 0 : index
        %c0_12 = arith.constant 0 : index
        %26 = vector.load %arg9[%c0_11, %c0_12] : memref<1x128xf32, #tpu.memory_space<vmem>>, vector<1x128xf32>
        %cst_13 = arith.constant 0.00155763235 : f32
        %27 = vector.broadcast %cst_13 : f32 to vector<1x128xf32>
        %28 = arith.mulf %26, %27 : vector<1x128xf32>
        %c0_14 = arith.constant 0 : index
        %c0_15 = arith.constant 0 : index
        %29 = vector.load %arg10[%c0_14, %c0_15] : memref<1x128xf32, #tpu.memory_space<vmem>>, vector<1x128xf32>
        %cst_16 = arith.constant 0.00155763235 : f32
        %30 = vector.broadcast %cst_16 : f32 to vector<1x128xf32>
        %31 = arith.mulf %29, %30 : vector<1x128xf32>
        %32 = arith.mulf %28, %28 : vector<1x128xf32>
        %33 = arith.subf %31, %32 : vector<1x128xf32>
        %cst_17 = arith.constant 0.000000e+00 : f32
        %34 = vector.broadcast %cst_17 : f32 to vector<1x128xf32>
        %35 = arith.maximumf %33, %34 : vector<1x128xf32>
        %c0_18 = arith.constant 0 : index
        %c0_19 = arith.constant 0 : index
        %36 = vector.load %arg5[%c0_18, %c0_19] : memref<1x128xf32, #tpu.memory_space<vmem>>, vector<1x128xf32>
        %cst_20 = arith.constant 9.99999974E-6 : f32
        %37 = vector.broadcast %cst_20 : f32 to vector<1x128xf32>
        %38 = arith.addf %35, %37 : vector<1x128xf32>
        %39 = math.rsqrt %38 : vector<1x128xf32>
        %40 = arith.mulf %36, %39 : vector<1x128xf32>
        %c0_21 = arith.constant 0 : index
        %c0_22 = arith.constant 0 : index
        %41 = vector.load %arg11[%c0_21, %c0_22] : memref<1x128xf32, #tpu.memory_space<vmem>>, vector<1x128xf32>
        tpu.vector_store %arg11[%c0_21, %c0_22], %40 {strides = array<i32>} : memref<1x128xf32, #tpu.memory_space<vmem>>, vector<1x128xf32>,
        %c0_23 = arith.constant 0 : index
        %c0_24 = arith.constant 0 : index
        %42 = vector.load %arg6[%c0_23, %c0_24] : memref<1x128xf32, #tpu.memory_space<vmem>>, vector<1x128xf32>
        %43 = arith.mulf %40, %28 : vector<1x128xf32>
        %44 = arith.subf %42, %43 : vector<1x128xf32>
        %c0_25 = arith.constant 0 : index
        %c0_26 = arith.constant 0 : index
        %45 = vector.load %arg12[%c0_25, %c0_26] : memref<1x128xf32, #tpu.memory_space<vmem>>, vector<1x128xf32>
        tpu.vector_store %arg12[%c0_25, %c0_26], %44 {strides = array<i32>} : memref<1x128xf32, #tpu.memory_space<vmem>>, vector<1x128xf32>,
      } else {
      }
      %11 = arith.index_cast %1 : i32 to index
      %c0 = arith.constant 0 : index
      %12 = vector.load %arg8[%11, %c0] : memref<648x128xf32, #tpu.memory_space<vmem>>, vector<648x128xf32>
      %c0_4 = arith.constant 0 : index
      %c0_5 = arith.constant 0 : index
      %13 = vector.load %arg11[%c0_4, %c0_5] : memref<1x128xf32, #tpu.memory_space<vmem>>, vector<1x128xf32>
      %14 = vector.broadcast %13 : vector<1x128xf32> to vector<648x128xf32>
      %15 = arith.mulf %12, %14 : vector<648x128xf32>
      %c0_6 = arith.constant 0 : index
      %c0_7 = arith.constant 0 : index
      %16 = vector.load %arg12[%c0_6, %c0_7] : memref<1x128xf32, #tpu.memory_space<vmem>>, vector<1x128xf32>
      %17 = vector.broadcast %16 : vector<1x128xf32> to vector<648x128xf32>
      %18 = arith.addf %15, %17 : vector<648x128xf32>
      %cst = arith.constant 0.000000e+00 : f32
      %19 = vector.broadcast %cst : f32 to vector<648x128xf32>
      %20 = arith.cmpf oge, %18, %19 : vector<648x128xf32>
      %cst_8 = arith.constant 2.000000e-01 : f32
      %21 = vector.broadcast %cst_8 : f32 to vector<648x128xf32>
      %22 = arith.mulf %21, %18 : vector<648x128xf32>
      %23 = arith.select %20, %18, %22 : vector<648x128xi1>, vector<648x128xf32>
      %24 = arith.truncf %23 : vector<648x128xf32> to vector<648x128xbf16>
      %c0_9 = arith.constant 0 : index
      %c0_10 = arith.constant 0 : index
      %25 = vector.load %arg7[%c0_9, %c0_10] : memref<648x128xbf16, #tpu.memory_space<vmem>>, vector<648x128xbf16>
      tpu.vector_store %arg7[%c0_9, %c0_10], %24 {strides = array<i32>} : memref<648x128xbf16, #tpu.memory_space<vmem>>, vector<648x128xbf16>,
    } else {
    }
    return
  }
  func.func @transform_0(%arg0: i32, %arg1: i32) -> (i32, i32) {
    %c1_i32 = arith.constant 1 : i32
    %0 = arith.subi %c1_i32, %arg0 : i32
    %1 = arith.muli %0, %arg1 : i32
    %c0_i32 = arith.constant 0 : i32
    %2 = arith.muli %arg0, %c0_i32 : i32
    %3 = arith.addi %1, %2 : i32
    %c0_i32_0 = arith.constant 0 : i32
    %c0_i32_1 = arith.constant 0 : i32
    return %3, %c0_i32_0 : i32, i32
  }
  func.func @transform_1(%arg0: i32, %arg1: i32) -> (i32, i32) {
    %c0_i32 = arith.constant 0 : i32
    %c0_i32_0 = arith.constant 0 : i32
    %c0_i32_1 = arith.constant 0 : i32
    return %c0_i32, %c0_i32_0 : i32, i32
  }
  func.func @transform_2(%arg0: i32, %arg1: i32) -> (i32, i32) {
    %c0_i32 = arith.constant 0 : i32
    %c0_i32_0 = arith.constant 0 : i32
    %c0_i32_1 = arith.constant 0 : i32
    return %c0_i32, %c0_i32_0 : i32, i32
  }
  func.func @transform_3(%arg0: i32, %arg1: i32) -> (i32, i32) {
    %c0_i32 = arith.constant 0 : i32
    %c0_i32_0 = arith.constant 0 : i32
    %c0_i32_1 = arith.constant 0 : i32
    return %c0_i32, %c0_i32_0 : i32, i32
  }
  func.func @transform_4(%arg0: i32, %arg1: i32) -> (i32, i32) {
    %c0_i32 = arith.constant 0 : i32
    %c0_i32_0 = arith.constant 0 : i32
    %c0_i32_1 = arith.constant 0 : i32
    return %c0_i32, %c0_i32_0 : i32, i32
  }
  func.func @transform_5(%arg0: i32, %arg1: i32) -> (i32, i32) {
    %0 = arith.muli %arg0, %arg1 : i32
    %c0_i32 = arith.constant 0 : i32
    %c0_i32_0 = arith.constant 0 : i32
    return %0, %c0_i32 : i32, i32
  }
}

module attributes {stable_mosaic.version = 11 : i64} {
  func.func @_fused_conv_bn_lrelu_kernel(%arg0: i32, %arg1: i32, %arg2: memref<648x128xbf16, #tpu.memory_space<vmem>>, %arg3: memref<128x128xbf16, #tpu.memory_space<vmem>>, %arg4: memref<1x128xf32, #tpu.memory_space<vmem>>, %arg5: memref<1x128xf32, #tpu.memory_space<vmem>>, %arg6: memref<1x128xf32, #tpu.memory_space<vmem>>, %arg7: memref<648x128xf32, #tpu.memory_space<vmem>>, %arg8: memref<648x128xf32, #tpu.memory_space<vmem>>, %arg9: memref<1x128xf32, #tpu.memory_space<vmem>>, %arg10: memref<1x128xf32, #tpu.memory_space<vmem>>, %arg11: memref<1x128xf32, #tpu.memory_space<vmem>>, %arg12: memref<1x128xf32, #tpu.memory_space<vmem>>) attributes {dimension_semantics = [#tpu.dimension_semantics<arbitrary>, #tpu.dimension_semantics<arbitrary>], iteration_bounds = array<i64: 2, 1>, scalar_prefetch = 0 : i64, scratch_operands = 5 : i64, tpu.core_type = #tpu.core_type<tc>, window_params = [{transform_indices = @transform_0, window_bounds = array<i64: 648, 128>}, {pipeline_mode = #tpu.pipeline_mode<synchronous>, transform_indices = @transform_1, window_bounds = array<i64: 128, 128>}, {pipeline_mode = #tpu.pipeline_mode<synchronous>, transform_indices = @transform_2, window_bounds = array<i64: 1, 128>}, {pipeline_mode = #tpu.pipeline_mode<synchronous>, transform_indices = @transform_3, window_bounds = array<i64: 1, 128>}, {pipeline_mode = #tpu.pipeline_mode<synchronous>, transform_indices = @transform_4, window_bounds = array<i64: 1, 128>}, {transform_indices = @transform_5, window_bounds = array<i64: 648, 128>}]} {
    %c648_i32 = arith.constant 648 : i32
    %0 = arith.muli %arg1, %c648_i32 : i32
    %1 = tpu.assume_multiple %0, 8 : i32
    %c0_i32 = arith.constant 0 : i32
    %2 = arith.cmpi eq, %arg0, %c0_i32 : i32
    %3 = arith.extui %2 : i1 to i32
    %c0_i32_0 = arith.constant 0 : i32
    %4 = arith.cmpi ne, %3, %c0_i32_0 : i32
    scf.if %4 {
      %c0_i32_2 = arith.constant 0 : i32
      %8 = arith.cmpi eq, %arg1, %c0_i32_2 : i32
      %9 = arith.extui %8 : i1 to i32
      %c0_i32_3 = arith.constant 0 : i32
      %10 = arith.cmpi ne, %9, %c0_i32_3 : i32
      scf.if %10 {
        %cst_21 = arith.constant 0.000000e+00 : f32
        %40 = vector.broadcast %cst_21 : f32 to vector<1x128xf32>
        %c0_22 = arith.constant 0 : index
        %c0_23 = arith.constant 0 : index
        %41 = vector.load %arg9[%c0_22, %c0_23] : memref<1x128xf32, #tpu.memory_space<vmem>>, vector<1x128xf32>
        tpu.vector_store %arg9[%c0_22, %c0_23], %40 {strides = array<i32>} : memref<1x128xf32, #tpu.memory_space<vmem>>, vector<1x128xf32>,
        %cst_24 = arith.constant 0.000000e+00 : f32
        %42 = vector.broadcast %cst_24 : f32 to vector<1x128xf32>
        %c0_25 = arith.constant 0 : index
        %c0_26 = arith.constant 0 : index
        %43 = vector.load %arg10[%c0_25, %c0_26] : memref<1x128xf32, #tpu.memory_space<vmem>>, vector<1x128xf32>
        tpu.vector_store %arg10[%c0_25, %c0_26], %42 {strides = array<i32>} : memref<1x128xf32, #tpu.memory_space<vmem>>, vector<1x128xf32>,
      } else {
      }
      %c0 = arith.constant 0 : index
      %c0_4 = arith.constant 0 : index
      %11 = vector.load %arg2[%c0, %c0_4] : memref<648x128xbf16, #tpu.memory_space<vmem>>, vector<648x128xbf16>
      %c0_5 = arith.constant 0 : index
      %c0_6 = arith.constant 0 : index
      %12 = vector.load %arg3[%c0_5, %c0_6] : memref<128x128xbf16, #tpu.memory_space<vmem>>, vector<128x128xbf16>
      %cst = arith.constant dense<0.000000e+00> : vector<648x128xf32>
      %13 = tpu.matmul %11, %12, %cst {dimension_numbers = #tpu.dot_dimension_numbers<[1], [0], [0], [1], [0, 0, 1, 1], [], []>} : vector<648x128xbf16>, vector<128x128xbf16>, vector<648x128xf32> -> vector<648x128xf32>
      %c0_7 = arith.constant 0 : index
      %c0_8 = arith.constant 0 : index
      %14 = vector.load %arg4[%c0_7, %c0_8] : memref<1x128xf32, #tpu.memory_space<vmem>>, vector<1x128xf32>
      %15 = vector.broadcast %14 : vector<1x128xf32> to vector<648x128xf32>
      %16 = arith.addf %13, %15 : vector<648x128xf32>
      %17 = arith.index_cast %1 : i32 to index
      %c0_9 = arith.constant 0 : index
      %18 = vector.load %arg8[%17, %c0_9] : memref<648x128xf32, #tpu.memory_space<vmem>>, vector<648x128xf32>
      tpu.vector_store %arg8[%17, %c0_9], %16 {strides = array<i32>} : memref<648x128xf32, #tpu.memory_space<vmem>>, vector<648x128xf32>,
      %c648_i32_10 = arith.constant 648 : i32
      %19 = arith.muli %arg1, %c648_i32_10 : i32
      %20 = tpu.iota {dimensions = array<i32: 0>} : vector<648x1xi32>
      %21 = vector.broadcast %19 : i32 to vector<648x1xi32>
      %22 = arith.addi %21, %20 : vector<648x1xi32>
      %c642_i32 = arith.constant 642 : i32
      %23 = vector.broadcast %c642_i32 : i32 to vector<648x1xi32>
      %24 = arith.cmpi slt, %22, %23 : vector<648x1xi32>
      %25 = arith.extui %24 : vector<648x1xi1> to vector<648x1xi32>
      %26 = arith.sitofp %25 : vector<648x1xi32> to vector<648x1xf32>
      %27 = vector.broadcast %26 : vector<648x1xf32> to vector<648x128xf32>
      %28 = arith.mulf %16, %27 : vector<648x128xf32>
      %c0_11 = arith.constant 0 : index
      %c0_12 = arith.constant 0 : index
      %29 = vector.load %arg9[%c0_11, %c0_12] : memref<1x128xf32, #tpu.memory_space<vmem>>, vector<1x128xf32>
      %cst_13 = arith.constant dense<0.000000e+00> : vector<128xf32>
      %30 = vector.multi_reduction <add>, %28, %cst_13 [0] : vector<648x128xf32> to vector<128xf32>
      %31 = vector.shape_cast %30 : vector<128xf32> to vector<1x128xf32>
      %32 = arith.addf %29, %31 : vector<1x128xf32>
      %c0_14 = arith.constant 0 : index
      %c0_15 = arith.constant 0 : index
      %33 = vector.load %arg9[%c0_14, %c0_15] : memref<1x128xf32, #tpu.memory_space<vmem>>, vector<1x128xf32>
      tpu.vector_store %arg9[%c0_14, %c0_15], %32 {strides = array<i32>} : memref<1x128xf32, #tpu.memory_space<vmem>>, vector<1x128xf32>,
      %c0_16 = arith.constant 0 : index
      %c0_17 = arith.constant 0 : index
      %34 = vector.load %arg10[%c0_16, %c0_17] : memref<1x128xf32, #tpu.memory_space<vmem>>, vector<1x128xf32>
      %35 = arith.mulf %28, %28 : vector<648x128xf32>
      %cst_18 = arith.constant dense<0.000000e+00> : vector<128xf32>
      %36 = vector.multi_reduction <add>, %35, %cst_18 [0] : vector<648x128xf32> to vector<128xf32>
      %37 = vector.shape_cast %36 : vector<128xf32> to vector<1x128xf32>
      %38 = arith.addf %34, %37 : vector<1x128xf32>
      %c0_19 = arith.constant 0 : index
      %c0_20 = arith.constant 0 : index
      %39 = vector.load %arg10[%c0_19, %c0_20] : memref<1x128xf32, #tpu.memory_space<vmem>>, vector<1x128xf32>
      tpu.vector_store %arg10[%c0_19, %c0_20], %38 {strides = array<i32>} : memref<1x128xf32, #tpu.memory_space<vmem>>, vector<1x128xf32>,
    } else {
    }
    %c1_i32 = arith.constant 1 : i32
    %5 = arith.cmpi eq, %arg0, %c1_i32 : i32
    %6 = arith.extui %5 : i1 to i32
    %c0_i32_1 = arith.constant 0 : i32
    %7 = arith.cmpi ne, %6, %c0_i32_1 : i32
    scf.if %7 {
      %c0_i32_2 = arith.constant 0 : i32
      %8 = arith.cmpi eq, %arg1, %c0_i32_2 : i32
      %9 = arith.extui %8 : i1 to i32
      %c0_i32_3 = arith.constant 0 : i32
      %10 = arith.cmpi ne, %9, %c0_i32_3 : i32
      scf.if %10 {
        %c0_11 = arith.constant 0 : index
        %c0_12 = arith.constant 0 : index
        %25 = vector.load %arg9[%c0_11, %c0_12] : memref<1x128xf32, #tpu.memory_space<vmem>>, vector<1x128xf32>
        %cst_13 = arith.constant 0.00155763235 : f32
        %26 = vector.broadcast %cst_13 : f32 to vector<1x128xf32>
        %27 = arith.mulf %25, %26 : vector<1x128xf32>
        %c0_14 = arith.constant 0 : index
        %c0_15 = arith.constant 0 : index
        %28 = vector.load %arg10[%c0_14, %c0_15] : memref<1x128xf32, #tpu.memory_space<vmem>>, vector<1x128xf32>
        %cst_16 = arith.constant 0.00155763235 : f32
        %29 = vector.broadcast %cst_16 : f32 to vector<1x128xf32>
        %30 = arith.mulf %28, %29 : vector<1x128xf32>
        %31 = arith.mulf %27, %27 : vector<1x128xf32>
        %32 = arith.subf %30, %31 : vector<1x128xf32>
        %cst_17 = arith.constant 0.000000e+00 : f32
        %33 = vector.broadcast %cst_17 : f32 to vector<1x128xf32>
        %34 = arith.maximumf %32, %33 : vector<1x128xf32>
        %c0_18 = arith.constant 0 : index
        %c0_19 = arith.constant 0 : index
        %35 = vector.load %arg5[%c0_18, %c0_19] : memref<1x128xf32, #tpu.memory_space<vmem>>, vector<1x128xf32>
        %cst_20 = arith.constant 9.99999974E-6 : f32
        %36 = vector.broadcast %cst_20 : f32 to vector<1x128xf32>
        %37 = arith.addf %34, %36 : vector<1x128xf32>
        %38 = math.rsqrt %37 : vector<1x128xf32>
        %39 = arith.mulf %35, %38 : vector<1x128xf32>
        %c0_21 = arith.constant 0 : index
        %c0_22 = arith.constant 0 : index
        %40 = vector.load %arg11[%c0_21, %c0_22] : memref<1x128xf32, #tpu.memory_space<vmem>>, vector<1x128xf32>
        tpu.vector_store %arg11[%c0_21, %c0_22], %39 {strides = array<i32>} : memref<1x128xf32, #tpu.memory_space<vmem>>, vector<1x128xf32>,
        %c0_23 = arith.constant 0 : index
        %c0_24 = arith.constant 0 : index
        %41 = vector.load %arg6[%c0_23, %c0_24] : memref<1x128xf32, #tpu.memory_space<vmem>>, vector<1x128xf32>
        %42 = arith.mulf %39, %27 : vector<1x128xf32>
        %43 = arith.subf %41, %42 : vector<1x128xf32>
        %c0_25 = arith.constant 0 : index
        %c0_26 = arith.constant 0 : index
        %44 = vector.load %arg12[%c0_25, %c0_26] : memref<1x128xf32, #tpu.memory_space<vmem>>, vector<1x128xf32>
        tpu.vector_store %arg12[%c0_25, %c0_26], %43 {strides = array<i32>} : memref<1x128xf32, #tpu.memory_space<vmem>>, vector<1x128xf32>,
      } else {
      }
      %11 = arith.index_cast %1 : i32 to index
      %c0 = arith.constant 0 : index
      %12 = vector.load %arg8[%11, %c0] : memref<648x128xf32, #tpu.memory_space<vmem>>, vector<648x128xf32>
      %c0_4 = arith.constant 0 : index
      %c0_5 = arith.constant 0 : index
      %13 = vector.load %arg11[%c0_4, %c0_5] : memref<1x128xf32, #tpu.memory_space<vmem>>, vector<1x128xf32>
      %14 = vector.broadcast %13 : vector<1x128xf32> to vector<648x128xf32>
      %15 = arith.mulf %12, %14 : vector<648x128xf32>
      %c0_6 = arith.constant 0 : index
      %c0_7 = arith.constant 0 : index
      %16 = vector.load %arg12[%c0_6, %c0_7] : memref<1x128xf32, #tpu.memory_space<vmem>>, vector<1x128xf32>
      %17 = vector.broadcast %16 : vector<1x128xf32> to vector<648x128xf32>
      %18 = arith.addf %15, %17 : vector<648x128xf32>
      %cst = arith.constant 0.000000e+00 : f32
      %19 = vector.broadcast %cst : f32 to vector<648x128xf32>
      %20 = arith.cmpf oge, %18, %19 : vector<648x128xf32>
      %cst_8 = arith.constant 2.000000e-01 : f32
      %21 = vector.broadcast %cst_8 : f32 to vector<648x128xf32>
      %22 = arith.mulf %21, %18 : vector<648x128xf32>
      %23 = arith.select %20, %18, %22 : vector<648x128xi1>, vector<648x128xf32>
      %c0_9 = arith.constant 0 : index
      %c0_10 = arith.constant 0 : index
      %24 = vector.load %arg7[%c0_9, %c0_10] : memref<648x128xf32, #tpu.memory_space<vmem>>, vector<648x128xf32>
      tpu.vector_store %arg7[%c0_9, %c0_10], %23 {strides = array<i32>} : memref<648x128xf32, #tpu.memory_space<vmem>>, vector<648x128xf32>,
    } else {
    }
    return
  }
  func.func @transform_0(%arg0: i32, %arg1: i32) -> (i32, i32) {
    %c1_i32 = arith.constant 1 : i32
    %0 = arith.subi %c1_i32, %arg0 : i32
    %1 = arith.muli %0, %arg1 : i32
    %c0_i32 = arith.constant 0 : i32
    %2 = arith.muli %arg0, %c0_i32 : i32
    %3 = arith.addi %1, %2 : i32
    %c0_i32_0 = arith.constant 0 : i32
    %c0_i32_1 = arith.constant 0 : i32
    return %3, %c0_i32_0 : i32, i32
  }
  func.func @transform_1(%arg0: i32, %arg1: i32) -> (i32, i32) {
    %c0_i32 = arith.constant 0 : i32
    %c0_i32_0 = arith.constant 0 : i32
    %c0_i32_1 = arith.constant 0 : i32
    return %c0_i32, %c0_i32_0 : i32, i32
  }
  func.func @transform_2(%arg0: i32, %arg1: i32) -> (i32, i32) {
    %c0_i32 = arith.constant 0 : i32
    %c0_i32_0 = arith.constant 0 : i32
    %c0_i32_1 = arith.constant 0 : i32
    return %c0_i32, %c0_i32_0 : i32, i32
  }
  func.func @transform_3(%arg0: i32, %arg1: i32) -> (i32, i32) {
    %c0_i32 = arith.constant 0 : i32
    %c0_i32_0 = arith.constant 0 : i32
    %c0_i32_1 = arith.constant 0 : i32
    return %c0_i32, %c0_i32_0 : i32, i32
  }
  func.func @transform_4(%arg0: i32, %arg1: i32) -> (i32, i32) {
    %c0_i32 = arith.constant 0 : i32
    %c0_i32_0 = arith.constant 0 : i32
    %c0_i32_1 = arith.constant 0 : i32
    return %c0_i32, %c0_i32_0 : i32, i32
  }
  func.func @transform_5(%arg0: i32, %arg1: i32) -> (i32, i32) {
    %0 = arith.muli %arg0, %arg1 : i32
    %c0_i32 = arith.constant 0 : i32
    %c0_i32_0 = arith.constant 0 : i32
    return %0, %c0_i32 : i32, i32
  }
}

</mosaic_0001>

<bundles_post_ra>
// kernel: up_block_forward.3
= control target key start
LH: loop header
LB: loop body
LE: loop exit
PB: predicated region body
PF: predicated region fallthrough
CT: control target
= control target key end

     0   :  { %8 = vsyncpa [#allocation3], 0  ;;  %s717_s0 = inlined_call_operand.vmem [shape: bf16[168,128], index: 0, kind: input, shape index: {}]   ;;  %s718_s1 = inlined_call_operand.hbm [shape: bf16[128,128], index: 1, kind: input, shape index: {}]   ;;  %s719_s2 = inlined_call_operand.hbm [shape: f32[1,128], index: 2, kind: input, shape index: {}]   ;;  %s720_s3 = inlined_call_operand.vmem [shape: f32[168,128], index: 3, kind: output, shape index: {}]  }
   0x1   :  { %9 = vsyncpa [#allocation5], 0  ;;  %s528_s12 = smov [#allocation2]  }
   0x2   :  { %s17_s13 = sshll.u32 %s528_s12, 4  ;;  %s18_s13 = int_to_ptr.vmem [resolvable:$true] %s17_s13 }
   0x3   :  { %s492_s14 = scalar_lea.vmem %s18_s13, 1024  ;;  %p497_p1 = scmp.lt.s32.totalorder %s18_s13, %s18_s13 }
   0x4   :  { %p493_p0 = scmp.ne.s32.totalorder %s18_s13, %s492_s14  ;;  %p498_p2 = scmp.lt.s32.totalorder %s492_s14, %s492_s14 }
   0x6   :  { %p499_p3 = por %p498_p2, %p497_p1 }
   0x8   :  { %p500_p4 = pnand %p499_p3, %p493_p0 }
   0xa   :  { %503 = shalt.err (!%p500_p4)
}
   0xb   :  { %s529_s15 = smov 64   ;;  %s530_s16 = smov 4  }
   0xc   :  { %23 = dma.hbm_to_vmem [thread:$0]  %s718_s1, 1024, %s18_s13, [#allocation3], %s529_s15, %s529_s15, %s530_s16  }
   0xd   :  { %s531_s19 = smov [#allocation4]  }
   0xe   :  { %s30_s20 = sshll.u32 %s531_s19, 4  ;;  %s31_s20 = int_to_ptr.vmem [resolvable:$true] %s30_s20 }
   0xf   :  { %s512_s21 = scalar_lea.vmem %s31_s20, 16  ;;  %s516_s22 = scalar_lea.vmem %s31_s20, 32 }
  0x10   :  { %p513_p5 = scmp.ne.s32.totalorder %s31_s20, %s512_s21  ;;  %p517_p6 = scmp.lt.s32.totalorder %s31_s20, %s31_s20 }
  0x11   :  { %p518_p7 = scmp.lt.s32.totalorder %s516_s22, %s512_s21 }
  0x13   :  { %p519_p8 = por %p518_p7, %p517_p6 }
  0x15   :  { %p520_p9 = pnand %p519_p8, %p513_p5 }
  0x17   :  { %523 = shalt.err (!%p520_p9)
}
  0x18   :  { %33 = dma.hbm_to_vmem [thread:$0]  %s719_s2, 16, %s31_s20, [#allocation5]  }
  0x19   :  { %524 = dma.done.wait [#allocation3], 1024  }
  0x1a   :  { %525 = vsyncadd [#allocation3], 4294966272 }
  0x1b   :  { %526 = dma.done.wait [#allocation5], 16  }
  0x1c   :  { %527 = vsyncadd [#allocation5], 4294967280  ;;  %v532_v0 = vmov 0.0   ;;  %vm533_vm0 = vmmov 0   ;;  %v465_v1 = vld [vmem:[#allocation2 + $0x38] sm:$0xff]   ;;  %v466_v2 = vld [vmem:[#allocation2 + $0x30] sm:$0xff]  }
  0x1d   :  { %383 = vmatprep.subr.bf16.mxu0 %v532_v0  ;;  %443 = vmatprep.subr.bf16.mxu1 %v532_v0  ;;  %v467_v3 = vld [vmem:[#allocation2 + $0x28] sm:$0xff]   ;;  %v468_v4 = vld [vmem:[#allocation2 + $0x20] sm:$0xff]   ;;  %v469_v5 = vld [vmem:[#allocation2 + $0x18] sm:$0xff]  }
  0x1e   :  { %399 = vmatprep.mubr.msk.bf16.mxu0 %vm533_vm0, %v532_v0  ;;  %423 = vmatprep.mubr.msk.bf16.mxu1 %vm533_vm0, %v532_v0  ;;  %v470_v6 = vld [vmem:[#allocation2 + $0x10] sm:$0xff]   ;;  %v471_v7 = vld [vmem:[#allocation2 + $0x8] sm:$0xff]   ;;  %v472_v8 = vld [vmem:[#allocation2] sm:$0xff]  }
  0x1f   :  { %384 = vmatpush3.bf16.msra.mxu0 %v465_v1  ;;  %451 = vmatpush3.bf16.msra.mxu1 %v465_v1  ;;  %v473_v9 = vld [vmem:[%s717_s0] sm:$0xff]   ;;  %v474_v10 = vld [vmem:[%s717_s0 + $0x30] sm:$0xff]   ;;  %v475_v11 = vld [vmem:[%s717_s0 + $0x8] sm:$0xff]  }
  0x20   :  { %385 = vmatprep.subr.bf16.mxu0 %v532_v0  ;;  %444 = vmatprep.subr.bf16.mxu1 %v532_v0  ;;  %v476_v12 = vld [vmem:[%s717_s0 + $0x38] sm:$0xff]   ;;  %v477_v13 = vld [vmem:[%s717_s0 + $0x10] sm:$0xff]   ;;  %v478_v14 = vld [vmem:[%s717_s0 + $0x40] sm:$0xff]  }
  0x21   :  { %v479_v15 = vld [vmem:[%s717_s0 + $0x18] sm:$0xff]   ;;  %v480_v16 = vld [vmem:[%s717_s0 + $0x48] sm:$0xff]   ;;  %v481_v17 = vld [vmem:[%s717_s0 + $0x20] sm:$0xff]  }
  0x22   :  { %v482_v18 = vld [vmem:[%s717_s0 + $0x50] ss:$0 sps:$4 sm:$0xff]   ;;  %v483_v19 = vld [vmem:[%s717_s0 + $0x28] sm:$0xff]   ;;  %v631_v20 = vld [vmem:[#allocation4] ss:$0 sm:$0xff] }
  0x23   :  { %386 = vmatpush3.bf16.msra.mxu0 %v466_v2  ;;  %452 = vmatpush3.bf16.msra.mxu1 %v466_v2 }
  0x24   :  { %387 = vmatprep.subr.bf16.mxu0 %v532_v0  ;;  %445 = vmatprep.subr.bf16.mxu1 %v532_v0 }
  0x27   :  { %388 = vmatpush3.bf16.msra.mxu0 %v467_v3  ;;  %453 = vmatpush3.bf16.msra.mxu1 %v467_v3 }
  0x28   :  { %389 = vmatprep.subr.bf16.mxu0 %v532_v0  ;;  %446 = vmatprep.subr.bf16.mxu1 %v532_v0 }
  0x2b   :  { %390 = vmatpush3.bf16.msra.mxu0 %v468_v4  ;;  %454 = vmatpush3.bf16.msra.mxu1 %v468_v4 }
  0x2c   :  { %391 = vmatprep.subr.bf16.mxu0 %v532_v0  ;;  %447 = vmatprep.subr.bf16.mxu1 %v532_v0 }
  0x2f   :  { %392 = vmatpush3.bf16.msra.mxu0 %v469_v5  ;;  %455 = vmatpush3.bf16.msra.mxu1 %v469_v5 }
  0x30   :  { %393 = vmatprep.subr.bf16.mxu0 %v532_v0  ;;  %448 = vmatprep.subr.bf16.mxu1 %v532_v0 }
  0x33   :  { %394 = vmatpush3.bf16.msra.mxu0 %v470_v6  ;;  %456 = vmatpush3.bf16.msra.mxu1 %v470_v6 }
  0x34   :  { %395 = vmatprep.subr.bf16.mxu0 %v532_v0  ;;  %449 = vmatprep.subr.bf16.mxu1 %v532_v0 }
  0x37   :  { %396 = vmatpush3.bf16.msra.mxu0 %v471_v7  ;;  %457 = vmatpush3.bf16.msra.mxu1 %v471_v7 }
  0x38   :  { %397 = vmatprep.subr.bf16.mxu0 %v532_v0  ;;  %450 = vmatprep.subr.bf16.mxu1 %v532_v0 }
  0x3b   :  { %398 = vmatpush3.bf16.msra.mxu0 %v472_v8  ;;  %458 = vmatpush3.bf16.msra.mxu1 %v472_v8 }
  0x3e   :  { %400 = vmatmul.mubr.bf16.vlgmr.msra.gmra.mxu0 %v473_v9  ;;  %424 = vmatmul.mubr.bf16.vlgmr.msra.gmra.mxu1 %v474_v10 }
  0x3f   :  { %403 = vmatprep.mubr.msk.bf16.mxu0 %vm533_vm0, %v532_v0  ;;  %427 = vmatprep.mubr.msk.bf16.mxu1 %vm533_vm0, %v532_v0 }
  0x46   :  { %404 = vmatmul.mubr.bf16.gmra.mxu0 %v475_v11  ;;  %428 = vmatmul.mubr.bf16.gmra.mxu1 %v476_v12 }
  0x47   :  { %407 = vmatprep.mubr.msk.bf16.mxu0 %vm533_vm0, %v532_v0  ;;  %431 = vmatprep.mubr.msk.bf16.mxu1 %vm533_vm0, %v532_v0 }
  0x4e   :  { %408 = vmatmul.mubr.bf16.gmra.mxu0 %v477_v13  ;;  %432 = vmatmul.mubr.bf16.gmra.mxu1 %v478_v14 }
  0x4f   :  { %411 = vmatprep.mubr.msk.bf16.mxu0 %vm533_vm0, %v532_v0  ;;  %435 = vmatprep.mubr.msk.bf16.mxu1 %vm533_vm0, %v532_v0 }
  0x56   :  { %412 = vmatmul.mubr.bf16.gmra.mxu0 %v479_v15  ;;  %436 = vmatmul.mubr.bf16.gmra.mxu1 %v480_v16 }
  0x57   :  { %415 = vmatprep.mubr.msk.bf16.mxu0 %vm533_vm0, %v532_v0  ;;  %439 = vmatprep.mubr.msk.bf16.mxu1 %vm533_vm0, %v532_v0 }
  0x5e   :  { %416 = vmatmul.mubr.bf16.gmra.mxu0 %v481_v17  ;;  %440 = vmatmul.mubr.bf16.gmra.mxu1 %v482_v18 }
  0x5f   :  { %419 = vmatprep.mubr.msk.bf16.mxu0 %vm533_vm0, %v532_v0 }
  0x66   :  { %420 = vmatmul.mubr.bf16.gmra.mxu0 %v483_v19 }
  0xfe   :  { %v231_v21 = vpop.f32.mrf.mxu0  ;;  %v279_v22 = vpop.f32.mrf.mxu1 }
  0xff   :  { %v232_v23 = vadd.f32 %v631_v20, %v231_v21  ;;  %v280_v24 = vadd.f32 %v631_v20, %v279_v22 }
 0x100   :  { %v401_v25 = vpop.f32.mrf.mxu0  ;;  %v425_v26 = vpop.f32.mrf.mxu1 }
 0x101   :  { %317 = vst [vmem:[%s720_s3] sm:$0xff] %v232_v23  ;;  %329 = vst [vmem:[%s720_s3 + $0x60] sm:$0xff] %v280_v24 }
 0x102   :  { %v234_v27 = vpop.f32.mrf.mxu0  ;;  %v282_v28 = vpop.f32.mrf.mxu1 }
 0x103   :  { %v235_v29 = vadd.f32 %v631_v20, %v234_v27  ;;  %v283_v30 = vadd.f32 %v631_v20, %v282_v28 }
 0x104   :  { %v402_v31 = vpop.f32.mrf.mxu0  ;;  %v426_v32 = vpop.f32.mrf.mxu1 }
 0x105   :  { %318 = vst [vmem:[%s720_s3 + $0x8] sm:$0xff] %v235_v29  ;;  %330 = vst [vmem:[%s720_s3 + $0x68] sm:$0xff] %v283_v30 }
 0x106   :  { %v239_v33 = vpop.f32.mrf.mxu0  ;;  %v287_v34 = vpop.f32.mrf.mxu1 }
 0x107   :  { %v240_v35 = vadd.f32 %v631_v20, %v239_v33  ;;  %v288_v36 = vadd.f32 %v631_v20, %v287_v34 }
 0x108   :  { %v405_v37 = vpop.f32.mrf.mxu0  ;;  %v429_v38 = vpop.f32.mrf.mxu1 }
 0x109   :  { %319 = vst [vmem:[%s720_s3 + $0x10] sm:$0xff] %v240_v35  ;;  %331 = vst [vmem:[%s720_s3 + $0x70] sm:$0xff] %v288_v36 }
 0x10a   :  { %v242_v39 = vpop.f32.mrf.mxu0  ;;  %v290_v40 = vpop.f32.mrf.mxu1 }
 0x10b   :  { %v243_v41 = vadd.f32 %v631_v20, %v242_v39  ;;  %v291_v42 = vadd.f32 %v631_v20, %v290_v40 }
 0x10c   :  { %v406_v43 = vpop.f32.mrf.mxu0  ;;  %v430_v44 = vpop.f32.mrf.mxu1 }
 0x10d   :  { %320 = vst [vmem:[%s720_s3 + $0x18] sm:$0xff] %v243_v41  ;;  %332 = vst [vmem:[%s720_s3 + $0x78] sm:$0xff] %v291_v42 }
 0x10e   :  { %v247_v45 = vpop.f32.mrf.mxu0  ;;  %v295_v46 = vpop.f32.mrf.mxu1 }
 0x10f   :  { %v248_v47 = vadd.f32 %v631_v20, %v247_v45  ;;  %v296_v48 = vadd.f32 %v631_v20, %v295_v46 }
 0x110   :  { %v409_v49 = vpop.f32.mrf.mxu0  ;;  %v433_v50 = vpop.f32.mrf.mxu1 }
 0x111   :  { %321 = vst [vmem:[%s720_s3 + $0x20] sm:$0xff] %v248_v47  ;;  %333 = vst [vmem:[%s720_s3 + $0x80] sm:$0xff] %v296_v48 }
 0x112   :  { %v250_v51 = vpop.f32.mrf.mxu0  ;;  %v298_v52 = vpop.f32.mrf.mxu1 }
 0x113   :  { %v251_v53 = vadd.f32 %v631_v20, %v250_v51  ;;  %v299_v54 = vadd.f32 %v631_v20, %v298_v52 }
 0x114   :  { %v410_v55 = vpop.f32.mrf.mxu0  ;;  %v434_v56 = vpop.f32.mrf.mxu1 }
 0x115   :  { %322 = vst [vmem:[%s720_s3 + $0x28] sm:$0xff] %v251_v53  ;;  %334 = vst [vmem:[%s720_s3 + $0x88] sm:$0xff] %v299_v54 }
 0x116   :  { %v255_v57 = vpop.f32.mrf.mxu0  ;;  %v303_v58 = vpop.f32.mrf.mxu1 }
 0x117   :  { %v256_v59 = vadd.f32 %v631_v20, %v255_v57  ;;  %v304_v60 = vadd.f32 %v631_v20, %v303_v58 }
 0x118   :  { %v413_v61 = vpop.f32.mrf.mxu0  ;;  %v437_v62 = vpop.f32.mrf.mxu1 }
 0x119   :  { %323 = vst [vmem:[%s720_s3 + $0x30] sm:$0xff] %v256_v59  ;;  %335 = vst [vmem:[%s720_s3 + $0x90] sm:$0xff] %v304_v60 }
 0x11a   :  { %v258_v63 = vpop.f32.mrf.mxu0  ;;  %v306_v0 = vpop.f32.mrf.mxu1 }
 0x11b   :  { %v259_v1 = vadd.f32 %v631_v20, %v258_v63  ;;  %v307_v2 = vadd.f32 %v631_v20, %v306_v0 }
 0x11c   :  { %v414_v3 = vpop.f32.mrf.mxu0  ;;  %v438_v4 = vpop.f32.mrf.mxu1 }
 0x11d   :  { %324 = vst [vmem:[%s720_s3 + $0x38] sm:$0xff] %v259_v1  ;;  %336 = vst [vmem:[%s720_s3 + $0x98] sm:$0xff] %v307_v2 }
 0x11e   :  { %v263_v5 = vpop.f32.mrf.mxu0  ;;  %v311_v6 = vpop.f32.mrf.mxu1 }
 0x11f   :  { %v264_v7 = vadd.f32 %v631_v20, %v263_v5  ;;  %v312_v8 = vadd.f32 %v631_v20, %v311_v6 }
 0x120   :  { %v417_v9 = vpop.f32.mrf.mxu0  ;;  %v441_v10 = vpop.f32.mrf.mxu1 }
 0x121   :  { %325 = vst [vmem:[%s720_s3 + $0x40] sm:$0xff] %v264_v7  ;;  %337 = vst [vmem:[%s720_s3 + $0xa0] sm:$0xff] %v312_v8 }
 0x122   :  { %v266_v11 = vpop.f32.mrf.mxu0  ;;  %v314_v12 = vpop.f32.mrf.mxu1 }
 0x123   :  { %v267_v13 = vadd.f32 %v631_v20, %v266_v11 }
 0x124   :  { %v418_v14 = vpop.f32.mrf.mxu0  ;;  %v442_v15 = vpop.f32.mrf.mxu1 }
 0x125   :  { %326 = vst [vmem:[%s720_s3 + $0x48] sm:$0xff] %v267_v13 }
 0x126   :  { %v271_v16 = vpop.f32.mrf.mxu0 }
 0x127   :  { %v272_v17 = vadd.f32 %v631_v20, %v271_v16 }
 0x128   :  { %v421_v18 = vpop.f32.mrf.mxu0 }
 0x129   :  { %327 = vst [vmem:[%s720_s3 + $0x50] sm:$0xff] %v272_v17 }
 0x12a   :  { %v274_v19 = vpop.f32.mrf.mxu0 }
 0x12b   :  { %v275_v21 = vadd.f32 %v631_v20, %v274_v19 }
 0x12c   :  { %v422_v22 = vpop.f32.mrf.mxu0 }
 0x12d   :  { %328 = vst [vmem:[%s720_s3 + $0x58] sm:$0xff] %v275_v21 }
 0x12e   :  { %342 = vsyncpa [#allocation3], 1 }
 0x12f   :  { %343 = vsyncpa [#allocation5], 1 }

// kernel: up_block_forward.4
= control target key start
LH: loop header
LB: loop body
LE: loop exit
PB: predicated region body
PF: predicated region fallthrough
CT: control target
= control target key end

     0   :  { %s3860_s18 = smov 0   ;;  %s3862_s19 = smov 0   ;;  %s4977_s0 = inlined_call_operand.vmem [shape: bf16[648,256], index: 0, kind: input, shape index: {}]   ;;  %s4978_s1 = inlined_call_operand.vmem [shape: bf16[256,128], index: 1, kind: input, shape index: {}]   ;;  %s4979_s2 = inlined_call_operand.vmem [shape: f32[1,128], index: 2, kind: input, shape index: {}]   ;;  %s4980_s3 = inlined_call_operand.vmem [shape: f32[1,128], index: 3, kind: input, shape index: {}]   ;;  %s4981_s4 = inlined_call_operand.vmem [shape: f32[1,128], index: 4, kind: input, shape index: {}]   ;;  %s4982_s5 = inlined_call_operand.vmem [shape: bf16[648,128], index: 5, kind: output, shape index: {}]  }
   0x1   :  { %s3864_s20 = smov 0  }
   0x2 LB: > { %s27_s21 = sadd.s32 1, %s3822_s19  ;;  %p3094_p0 = scmp.ge.s32.totalorder %s3826_s20, 1  ;;  %s3826_s20 = sphi %s3864_s20, %s15_s20   ;;  %s3822_s19 = sphi %s3862_s19, %s4988_s19   ;;  %s3818_s18 = sphi %s3860_s18, %s4987_s18  }
   0x3   : > { %p29_p1 = scmp.ge.s32.totalorder %s27_s21, 2  ;;  %p211_p2 = scmp.lt.s32.totalorder %s3826_s20, 3 }
   0x5   : > { %s4990_s21 = smov (%p29_p1, %s27_s21), 0  ;;  %p212_p3 = pnand %p3094_p0, %p211_p2 }
   0x6   : > { %p3095_p4 = scmp.ne.s32.totalorder (!%p212_p3), %s3818_s18, 0 }
   0x7   : > { %215 = sbr.rel (%p212_p3) target bundleno = 697 (0x2b9), region = 40 }
   0xc   : > { %267 = sbr.rel (%p3095_p4) target bundleno = 538 (0x21a), region = 44 }
  0x11   : > { %v3662_v0 = vld [vmem:[%s4978_s1 + $0x38] sm:$0xff]   ;;  %v3828_v1 = vmov 0   ;;  %v3663_v2 = vld [vmem:[%s4978_s1 + $0x30] sm:$0xff]   ;;  %v3664_v3 = vld [vmem:[%s4978_s1 + $0x28] sm:$0xff]  }
  0x12   : > { %897 = vmatprep.subr.bf16.mxu0 %v3828_v1  ;;  %3604 = vmatprep.subr.bf16.mxu1 %v3828_v1  ;;  %v3665_v4 = vld [vmem:[%s4978_s1 + $0x20] sm:$0xff]   ;;  %v3666_v5 = vld [vmem:[%s4978_s1 + $0x18] sm:$0xff]   ;;  %v3667_v7 = vld [vmem:[%s4978_s1 + $0x10] sm:$0xff]  }
  0x13   : > { %898 = vmatpush1.bf16.msra.mxu0 %v3662_v0  ;;  %3620 = vmatpush1.bf16.msra.mxu1 %v3662_v0  ;;  %v3680_v6 = vld [vmem:[%s4977_s0 + $0x4] ss:$8 sps:$4 sm:$0xff]   ;;  %v3670_v10 = vld [vmem:[%s4978_s1 + $0x78] sm:$0xff]   ;;  %v3671_v12 = vld [vmem:[%s4978_s1 + $0x70] sm:$0xff]  }
  0x14   : > { %899 = vmatprep.subr.bf16.mxu0 %v3828_v1  ;;  %3605 = vmatprep.subr.bf16.mxu1 %v3828_v1  ;;  %v3668_v8 = vld [vmem:[%s4978_s1 + $0x8] sm:$0xff]   ;;  %v3669_v9 = vld [vmem:[%s4978_s1] sm:$0xff]   ;;  %v3713_v11 = vld [vmem:[%s4977_s0 + $0x154] ss:$8 sps:$4 sm:$0xff]  }
  0x15   : > { %929 = vmatprep.mubr.bf16.mxu0 %v3680_v6  ;;  %1097 = vmatprep.mubr.bf16.mxu1 %v3713_v11  ;;  %v3672_v13 = vld [vmem:[%s4978_s1 + $0x68] sm:$0xff]   ;;  %v3673_v14 = vld [vmem:[%s4978_s1 + $0x60] sm:$0xff]   ;;  %v3674_v15 = vld [vmem:[%s4978_s1 + $0x58] sm:$0xff]  }
  0x16   : > { %v3675_v16 = vld [vmem:[%s4978_s1 + $0x50] sm:$0xff]   ;;  %v3676_v17 = vld [vmem:[%s4978_s1 + $0x48] sm:$0xff]   ;;  %v3677_v18 = vld [vmem:[%s4978_s1 + $0x40] sm:$0xff]  }
  0x17   : > { %900 = vmatpush1.bf16.msra.mxu0 %v3663_v2  ;;  %3621 = vmatpush1.bf16.msra.mxu1 %v3663_v2  ;;  %v3678_v19 = vld [vmem:[%s4977_s0] ss:$8 sps:$4 sm:$0xff]   ;;  %v3711_v20 = vld [vmem:[%s4977_s0 + $0x150] ss:$8 sps:$4 sm:$0xff]   ;;  %v3681_v21 = vld [vmem:[%s4977_s0 + $0x14] ss:$8 sps:$4 sm:$0xff]  }
  0x18   : > { %901 = vmatprep.subr.bf16.mxu0 %v3828_v1  ;;  %3606 = vmatprep.subr.bf16.mxu1 %v3828_v1  ;;  %v3717_v22 = vld [vmem:[%s4977_s0 + $0x164] ss:$8 sps:$4 sm:$0xff]   ;;  %v3683_v23 = vld [vmem:[%s4977_s0 + $0x10] ss:$8 sps:$4 sm:$0xff]   ;;  %v3719_v24 = vld [vmem:[%s4977_s0 + $0x160] ss:$8 sps:$4 sm:$0xff]  }
  0x19   : > { %v3684_v25 = vld [vmem:[%s4977_s0 + $0x24] ss:$8 sps:$4 sm:$0xff]   ;;  %v3723_v26 = vld [vmem:[%s4977_s0 + $0x174] ss:$8 sps:$4 sm:$0xff]   ;;  %v3686_v27 = vld [vmem:[%s4977_s0 + $0x20] ss:$8 sps:$4 sm:$0xff]  }
  0x1a   : > { %v3725_v28 = vld [vmem:[%s4977_s0 + $0x170] ss:$8 sps:$4 sm:$0xff]   ;;  %v3687_v29 = vld [vmem:[%s4977_s0 + $0x34] ss:$8 sps:$4 sm:$0xff]   ;;  %v3729_v30 = vld [vmem:[%s4977_s0 + $0x184] ss:$8 sps:$4 sm:$0xff]  }
  0x1b   : > { %902 = vmatpush1.bf16.msra.mxu0 %v3664_v3  ;;  %3622 = vmatpush1.bf16.msra.mxu1 %v3664_v3  ;;  %v3689_v31 = vld [vmem:[%s4977_s0 + $0x30] ss:$8 sps:$4 sm:$0xff]   ;;  %v3731_v32 = vld [vmem:[%s4977_s0 + $0x180] ss:$8 sps:$4 sm:$0xff]   ;;  %v3690_v33 = vld [vmem:[%s4977_s0 + $0x44] ss:$8 sps:$4 sm:$0xff]  }
  0x1c   : > { %903 = vmatprep.subr.bf16.mxu0 %v3828_v1  ;;  %3607 = vmatprep.subr.bf16.mxu1 %v3828_v1  ;;  %v3735_v34 = vld [vmem:[%s4977_s0 + $0x194] ss:$8 sps:$4 sm:$0xff]   ;;  %v3692_v35 = vld [vmem:[%s4977_s0 + $0x40] ss:$8 sps:$4 sm:$0xff]   ;;  %v3737_v36 = vld [vmem:[%s4977_s0 + $0x190] ss:$8 sps:$4 sm:$0xff]  }
  0x1d   : > { %v3693_v37 = vld [vmem:[%s4977_s0 + $0x54] ss:$8 sps:$4 sm:$0xff]   ;;  %v3741_v38 = vld [vmem:[%s4977_s0 + $0x1a4] ss:$8 sps:$4 sm:$0xff]   ;;  %v3695_v39 = vld [vmem:[%s4977_s0 + $0x50] ss:$8 sps:$4 sm:$0xff]  }
  0x1e   : > { %v3743_v40 = vld [vmem:[%s4977_s0 + $0x1a0] ss:$8 sps:$4 sm:$0xff]   ;;  %v3696_v41 = vld [vmem:[%s4977_s0 + $0x64] ss:$8 sps:$4 sm:$0xff]   ;;  %v3747_v42 = vld [vmem:[%s4977_s0 + $0x1b4] ss:$8 sps:$4 sm:$0xff]  }
  0x1f   : > { %904 = vmatpush1.bf16.msra.mxu0 %v3665_v4  ;;  %3623 = vmatpush1.bf16.msra.mxu1 %v3665_v4  ;;  %v3698_v43 = vld [vmem:[%s4977_s0 + $0x60] ss:$8 sps:$4 sm:$0xff]   ;;  %v3749_v44 = vld [vmem:[%s4977_s0 + $0x1b0] ss:$8 sps:$4 sm:$0xff]   ;;  %v3699_v45 = vld [vmem:[%s4977_s0 + $0x74] ss:$8 sps:$4 sm:$0xff]  }
  0x20   : > { %905 = vmatprep.subr.bf16.mxu0 %v3828_v1  ;;  %3608 = vmatprep.subr.bf16.mxu1 %v3828_v1  ;;  %v3753_v46 = vld [vmem:[%s4977_s0 + $0x1c4] ss:$8 sps:$4 sm:$0xff]   ;;  %v3701_v47 = vld [vmem:[%s4977_s0 + $0x70] ss:$8 sps:$4 sm:$0xff]   ;;  %v3755_v48 = vld [vmem:[%s4977_s0 + $0x1c0] ss:$8 sps:$4 sm:$0xff]  }
  0x21   : > { %v3702_v49 = vld [vmem:[%s4977_s0 + $0x84] ss:$8 sps:$4 sm:$0xff]   ;;  %v3759_v50 = vld [vmem:[%s4977_s0 + $0x1d4] ss:$8 sps:$4 sm:$0xff]   ;;  %v3704_v51 = vld [vmem:[%s4977_s0 + $0x80] ss:$8 sps:$4 sm:$0xff]  }
  0x22   : > { %v3761_v52 = vld [vmem:[%s4977_s0 + $0x1d0] ss:$8 sps:$4 sm:$0xff]   ;;  %v3705_v53 = vld [vmem:[%s4977_s0 + $0x94] ss:$8 sps:$4 sm:$0xff]   ;;  %v3765_v54 = vld [vmem:[%s4977_s0 + $0x1e4] ss:$8 sps:$4 sm:$0xff]  }
  0x23   : > { %906 = vmatpush1.bf16.msra.mxu0 %v3666_v5  ;;  %3624 = vmatpush1.bf16.msra.mxu1 %v3666_v5  ;;  %v3707_v55 = vld [vmem:[%s4977_s0 + $0x90] ss:$8 sps:$4 sm:$0xff]   ;;  %v3767_v56 = vld [vmem:[%s4977_s0 + $0x1e0] ss:$8 sps:$4 sm:$0xff]   ;;  %v3708_v57 = vld [vmem:[%s4977_s0 + $0xa4] ss:$8 sps:$4 sm:$0xff]  }
  0x24   : > { %907 = vmatprep.subr.bf16.mxu0 %v3828_v1  ;;  %3609 = vmatprep.subr.bf16.mxu1 %v3828_v1  ;;  %v3771_v58 = vld [vmem:[%s4977_s0 + $0x1f4] ss:$8 sps:$4 sm:$0xff]   ;;  %v3710_v59 = vld [vmem:[%s4977_s0 + $0xa0] ss:$8 sps:$4 sm:$0xff]   ;;  %v3773_v60 = vld [vmem:[%s4977_s0 + $0x1f0] ss:$8 sps:$4 sm:$0xff]  }
  0x25   : > { %v3714_v61 = vld [vmem:[%s4977_s0 + $0xb4] ss:$8 sps:$4 sm:$0xff]   ;;  %v3774_v62 = vld [vmem:[%s4977_s0 + $0x204] ss:$8 sps:$4 sm:$0xff]   ;;  %v3716_v63 = vld [vmem:[%s4977_s0 + $0xb0] ss:$8 sps:$4 sm:$0xff]  }
  0x26   : > { %v3776_v0 = vld [vmem:[%s4977_s0 + $0x200] ss:$8 sps:$4 sm:$0xff]   ;;  %v3777_v2 = vld [vmem:[%s4977_s0 + $0x214] ss:$8 sps:$4 sm:$0xff]   ;;  %v3779_v4 = vld [vmem:[%s4977_s0 + $0x210] ss:$8 sps:$4 sm:$0xff]  }
  0x27   : > { %908 = vmatpush1.bf16.msra.mxu0 %v3667_v7  ;;  %3625 = vmatpush1.bf16.msra.mxu1 %v3667_v7  ;;  %v3722_v3 = vld [vmem:[%s4977_s0 + $0xc0] ss:$8 sps:$4 sm:$0xff]   ;;  %v3726_v5 = vld [vmem:[%s4977_s0 + $0xd4] ss:$8 sps:$4 sm:$0xff]   ;;  %v3780_v6 = vld [vmem:[%s4977_s0 + $0x224] ss:$8 sps:$4 sm:$0xff]  }
  0x28   : > { %909 = vmatprep.subr.bf16.mxu0 %v3828_v1  ;;  %3610 = vmatprep.subr.bf16.mxu1 %v3828_v1  ;;  %v3728_v7 = vld [vmem:[%s4977_s0 + $0xd0] ss:$8 sps:$4 sm:$0xff]   ;;  %v3734_v11 = vld [vmem:[%s4977_s0 + $0xe0] ss:$8 sps:$4 sm:$0xff]  }
  0x2b   : > { %910 = vmatpush1.bf16.msra.mxu0 %v3668_v8  ;;  %3626 = vmatpush1.bf16.msra.mxu1 %v3668_v8  ;;  %v3782_v8 = vld [vmem:[%s4977_s0 + $0x220] ss:$8 sps:$4 sm:$0xff]  }
  0x2c   : > { %911 = vmatprep.subr.bf16.mxu0 %v3828_v1  ;;  %3611 = vmatprep.subr.bf16.mxu1 %v3828_v1 }
  0x2f   : > { %912 = vmatpush1.bf16.msra.mxu0 %v3669_v9  ;;  %3627 = vmatpush1.bf16.msra.mxu1 %v3669_v9  ;;  %v3732_v9 = vld [vmem:[%s4977_s0 + $0xe4] ss:$8 sps:$4 sm:$0xff]  }
  0x30   : > { %913 = vmatprep.subr.bf16.mxu0 %v3828_v1  ;;  %3612 = vmatprep.subr.bf16.mxu1 %v3828_v1 }
  0x33   : > { %914 = vmatpush2.bf16.msra.mxu0 %v3670_v10  ;;  %3628 = vmatpush2.bf16.msra.mxu1 %v3670_v10  ;;  %v3783_v10 = vld [vmem:[%s4977_s0 + $0x234] ss:$8 sps:$4 sm:$0xff]  }
  0x34   : > { %915 = vmatprep.subr.bf16.mxu0 %v3828_v1  ;;  %3613 = vmatprep.subr.bf16.mxu1 %v3828_v1 }
  0x37   : > { %916 = vmatpush2.bf16.msra.mxu0 %v3671_v12  ;;  %3629 = vmatpush2.bf16.msra.mxu1 %v3671_v12  ;;  %v3785_v12 = vld [vmem:[%s4977_s0 + $0x230] ss:$8 sps:$4 sm:$0xff]  }
  0x38   : > { %917 = vmatprep.subr.bf16.mxu0 %v3828_v1  ;;  %3614 = vmatprep.subr.bf16.mxu1 %v3828_v1 }
  0x3b   : > { %918 = vmatpush2.bf16.msra.mxu0 %v3672_v13  ;;  %3630 = vmatpush2.bf16.msra.mxu1 %v3672_v13  ;;  %v3738_v13 = vld [vmem:[%s4977_s0 + $0xf4] ss:$8 sps:$4 sm:$0xff]  }
  0x3c   : > { %919 = vmatprep.subr.bf16.mxu0 %v3828_v1  ;;  %3615 = vmatprep.subr.bf16.mxu1 %v3828_v1 }
  0x3f   : > { %920 = vmatpush2.bf16.msra.mxu0 %v3673_v14  ;;  %3631 = vmatpush2.bf16.msra.mxu1 %v3673_v14  ;;  %v3786_v14 = vld [vmem:[%s4977_s0 + $0x244] ss:$8 sps:$4 sm:$0xff]  }
  0x40   : > { %921 = vmatprep.subr.bf16.mxu0 %v3828_v1  ;;  %3616 = vmatprep.subr.bf16.mxu1 %v3828_v1 }
  0x43   : > { %922 = vmatpush2.bf16.msra.mxu0 %v3674_v15  ;;  %3632 = vmatpush2.bf16.msra.mxu1 %v3674_v15  ;;  %v3740_v15 = vld [vmem:[%s4977_s0 + $0xf0] ss:$8 sps:$4 sm:$0xff]  }
  0x44   : > { %923 = vmatprep.subr.bf16.mxu0 %v3828_v1  ;;  %3617 = vmatprep.subr.bf16.mxu1 %v3828_v1 }
  0x47   : > { %924 = vmatpush2.bf16.msra.mxu0 %v3675_v16  ;;  %3633 = vmatpush2.bf16.msra.mxu1 %v3675_v16  ;;  %v3788_v16 = vld [vmem:[%s4977_s0 + $0x240] ss:$8 sps:$4 sm:$0xff]  }
  0x48   : > { %925 = vmatprep.subr.bf16.mxu0 %v3828_v1  ;;  %3618 = vmatprep.subr.bf16.mxu1 %v3828_v1 }
  0x4b   : > { %926 = vmatpush2.bf16.msra.mxu0 %v3676_v17  ;;  %3634 = vmatpush2.bf16.msra.mxu1 %v3676_v17  ;;  %v3744_v17 = vld [vmem:[%s4977_s0 + $0x104] ss:$8 sps:$4 sm:$0xff]  }
  0x4c   : > { %927 = vmatprep.subr.bf16.mxu0 %v3828_v1  ;;  %3619 = vmatprep.subr.bf16.mxu1 %v3828_v1  ;;  %v3720_v1 = vld [vmem:[%s4977_s0 + $0xc4] ss:$8 sps:$4 sm:$0xff]  }
  0x4f   : > { %928 = vmatpush2.bf16.msra.mxu0 %v3677_v18  ;;  %3635 = vmatpush2.bf16.msra.mxu1 %v3677_v18  ;;  %v3789_v18 = vld [vmem:[%s4977_s0 + $0x254] ss:$8 sps:$4 sm:$0xff]  }
  0x52   : > { %930 = vmatmul.mubr.bf16.vlgmr.msra.gmra.mxu0 %v3678_v19  ;;  %1098 = vmatmul.mubr.bf16.vlgmr.msra.gmra.mxu1 %v3711_v20  ;;  %v3746_v19 = vld [vmem:[%s4977_s0 + $0x100] ss:$8 sps:$4 sm:$0xff]   ;;  %v3791_v20 = vld [vmem:[%s4977_s0 + $0x250] ss:$8 sps:$4 sm:$0xff]  }
  0x53   : > { %937 = vmatprep.mubr.bf16.mxu0 %v3681_v21  ;;  %1105 = vmatprep.mubr.bf16.mxu1 %v3717_v22  ;;  %v3750_v21 = vld [vmem:[%s4977_s0 + $0x114] ss:$8 sps:$4 sm:$0xff]   ;;  %v3792_v22 = vld [vmem:[%s4977_s0 + $0x264] ss:$8 sps:$4 sm:$0xff]  }
  0x5a   : > { %938 = vmatmul.mubr.bf16.gmra.mxu0 %v3683_v23  ;;  %1106 = vmatmul.mubr.bf16.gmra.mxu1 %v3719_v24  ;;  %v3752_v23 = vld [vmem:[%s4977_s0 + $0x110] ss:$8 sps:$4 sm:$0xff]   ;;  %v3794_v24 = vld [vmem:[%s4977_s0 + $0x260] ss:$8 sps:$4 sm:$0xff]  }
  0x5b   : > { %945 = vmatprep.mubr.bf16.mxu0 %v3684_v25  ;;  %1113 = vmatprep.mubr.bf16.mxu1 %v3723_v26  ;;  %v3756_v25 = vld [vmem:[%s4977_s0 + $0x124] ss:$8 sps:$4 sm:$0xff]   ;;  %v3795_v26 = vld [vmem:[%s4977_s0 + $0x274] ss:$8 sps:$4 sm:$0xff]  }
  0x62   : > { %946 = vmatmul.mubr.bf16.gmra.mxu0 %v3686_v27  ;;  %1114 = vmatmul.mubr.bf16.gmra.mxu1 %v3725_v28  ;;  %v354_v27 = vld [vmem:[%s4977_s0 + $0x280] sm:$0xff] }
  0x63   : > { %953 = vmatprep.mubr.bf16.mxu0 %v3687_v29  ;;  %1121 = vmatprep.mubr.bf16.mxu1 %v3729_v30  ;;  %v3758_v28 = vld [vmem:[%s4977_s0 + $0x120] ss:$8 sps:$4 sm:$0xff]   ;;  %v3797_v29 = vld [vmem:[%s4977_s0 + $0x270] ss:$8 sps:$4 sm:$0xff]   ;;  %v3762_v30 = vld [vmem:[%s4977_s0 + $0x134] ss:$8 sps:$4 sm:$0xff]  }
  0x6a   : > { %954 = vmatmul.mubr.bf16.gmra.mxu0 %v3689_v31  ;;  %1122 = vmatmul.mubr.bf16.gmra.mxu1 %v3731_v32  ;;  %v3178_v31 = vcombine.high %v354_v27, %v354_v27  ;;  %v3764_v32 = vld [vmem:[%s4977_s0 + $0x130] ss:$8 sps:$4 sm:$0xff]  }
  0x6b   : > { %961 = vmatprep.mubr.bf16.mxu0 %v3690_v33  ;;  %1129 = vmatprep.mubr.bf16.mxu1 %v3735_v34  ;;  %v3177_v33 = vcombine.low %v354_v27, %v354_v27  ;;  %v3768_v34 = vld [vmem:[%s4977_s0 + $0x144] ss:$8 sps:$4 sm:$0xff]  }
  0x72   : > { %962 = vmatmul.mubr.bf16.gmra.mxu0 %v3692_v35  ;;  %1130 = vmatmul.mubr.bf16.gmra.mxu1 %v3737_v36  ;;  %v3770_v35 = vld [vmem:[%s4977_s0 + $0x140] ss:$8 sps:$4 sm:$0xff]  }
  0x73   : > { %969 = vmatprep.mubr.bf16.mxu0 %v3693_v37  ;;  %1137 = vmatprep.mubr.bf16.mxu1 %v3741_v38  ;;  %v4207_v36 = vld [vmem:[%s4979_s2] ss:$0 sm:$0xff] }
  0x7a   : > { %970 = vmatmul.mubr.bf16.gmra.mxu0 %v3695_v39  ;;  %1138 = vmatmul.mubr.bf16.gmra.mxu1 %v3743_v40 }
  0x7b   : > { %977 = vmatprep.mubr.bf16.mxu0 %v3696_v41  ;;  %1145 = vmatprep.mubr.bf16.mxu1 %v3747_v42 }
  0x82   : > { %978 = vmatmul.mubr.bf16.gmra.mxu0 %v3698_v43  ;;  %1146 = vmatmul.mubr.bf16.gmra.mxu1 %v3749_v44 }
  0x83   : > { %985 = vmatprep.mubr.bf16.mxu0 %v3699_v45  ;;  %1153 = vmatprep.mubr.bf16.mxu1 %v3753_v46 }
  0x8a   : > { %986 = vmatmul.mubr.bf16.gmra.mxu0 %v3701_v47  ;;  %1154 = vmatmul.mubr.bf16.gmra.mxu1 %v3755_v48 }
  0x8b   : > { %993 = vmatprep.mubr.bf16.mxu0 %v3702_v49  ;;  %1161 = vmatprep.mubr.bf16.mxu1 %v3759_v50 }
  0x92   : > { %994 = vmatmul.mubr.bf16.gmra.mxu0 %v3704_v51  ;;  %1162 = vmatmul.mubr.bf16.gmra.mxu1 %v3761_v52 }
  0x93   : > { %1001 = vmatprep.mubr.bf16.mxu0 %v3705_v53  ;;  %1169 = vmatprep.mubr.bf16.mxu1 %v3765_v54 }
  0x9a   : > { %1002 = vmatmul.mubr.bf16.gmra.mxu0 %v3707_v55  ;;  %1170 = vmatmul.mubr.bf16.gmra.mxu1 %v3767_v56 }
  0x9b   : > { %1009 = vmatprep.mubr.bf16.mxu0 %v3708_v57  ;;  %1177 = vmatprep.mubr.bf16.mxu1 %v3771_v58 }
  0xa2   : > { %1010 = vmatmul.mubr.bf16.gmra.mxu0 %v3710_v59  ;;  %1178 = vmatmul.mubr.bf16.gmra.mxu1 %v3773_v60 }
  0xa3   : > { %1017 = vmatprep.mubr.bf16.mxu0 %v3714_v61  ;;  %1185 = vmatprep.mubr.bf16.mxu1 %v3774_v62 }
  0xaa   : > { %1018 = vmatmul.mubr.bf16.gmra.mxu0 %v3716_v63  ;;  %1186 = vmatmul.mubr.bf16.gmra.mxu1 %v3776_v0 }
  0xab   : > { %1025 = vmatprep.mubr.bf16.mxu0 %v3720_v1  ;;  %1193 = vmatprep.mubr.bf16.mxu1 %v3777_v2 }
  0xb2   : > { %1026 = vmatmul.mubr.bf16.gmra.mxu0 %v3722_v3  ;;  %1194 = vmatmul.mubr.bf16.gmra.mxu1 %v3779_v4 }
  0xb3   : > { %1033 = vmatprep.mubr.bf16.mxu0 %v3726_v5  ;;  %1201 = vmatprep.mubr.bf16.mxu1 %v3780_v6 }
  0xba   : > { %1034 = vmatmul.mubr.bf16.gmra.mxu0 %v3728_v7  ;;  %1202 = vmatmul.mubr.bf16.gmra.mxu1 %v3782_v8 }
  0xbb   : > { %1041 = vmatprep.mubr.bf16.mxu0 %v3732_v9  ;;  %1209 = vmatprep.mubr.bf16.mxu1 %v3783_v10 }
  0xc2   : > { %1042 = vmatmul.mubr.bf16.gmra.mxu0 %v3734_v11  ;;  %1210 = vmatmul.mubr.bf16.gmra.mxu1 %v3785_v12 }
  0xc3   : > { %1049 = vmatprep.mubr.bf16.mxu0 %v3738_v13  ;;  %1217 = vmatprep.mubr.bf16.mxu1 %v3786_v14 }
  0xca   : > { %1050 = vmatmul.mubr.bf16.gmra.mxu0 %v3740_v15  ;;  %1218 = vmatmul.mubr.bf16.gmra.mxu1 %v3788_v16 }
  0xcb   : > { %1057 = vmatprep.mubr.bf16.mxu0 %v3744_v17  ;;  %1225 = vmatprep.mubr.bf16.mxu1 %v3789_v18 }
  0xd2   : > { %1058 = vmatmul.mubr.bf16.gmra.mxu0 %v3746_v19  ;;  %1226 = vmatmul.mubr.bf16.gmra.mxu1 %v3791_v20 }
  0xd3   : > { %1065 = vmatprep.mubr.bf16.mxu0 %v3750_v21  ;;  %1233 = vmatprep.mubr.bf16.mxu1 %v3792_v22 }
  0xda   : > { %1066 = vmatmul.mubr.bf16.gmra.mxu0 %v3752_v23  ;;  %1234 = vmatmul.mubr.bf16.gmra.mxu1 %v3794_v24 }
  0xdb   : > { %1073 = vmatprep.mubr.bf16.mxu0 %v3756_v25  ;;  %1241 = vmatprep.mubr.bf16.mxu1 %v3795_v26 }
  0xe2   : > { %1074 = vmatmul.mubr.bf16.gmra.mxu0 %v3758_v28  ;;  %1242 = vmatmul.mubr.bf16.gmra.mxu1 %v3797_v29 }
  0xe3   : > { %1081 = vmatprep.mubr.bf16.mxu0 %v3762_v30  ;;  %1249 = vmatprep.mubr.bf16.mxu1 %v3178_v31 }
  0xea   : > { %1082 = vmatmul.mubr.bf16.gmra.mxu0 %v3764_v32  ;;  %1250 = vmatmul.mubr.bf16.gmra.mxu1 %v3177_v33 }
  0xeb   : > { %1089 = vmatprep.mubr.bf16.mxu0 %v3768_v34 }
  0xf2   : > { %1090 = vmatmul.mubr.bf16.gmra.mxu0 %v3770_v35 }
 0x112   : > { %v931_v37 = vpop.f32.mrf.mxu0  ;;  %v1099_v38 = vpop.f32.mrf.mxu1 }
 0x113   : > { %v932_v39 = vadd.f32 %v4207_v36, %v931_v37  ;;  %v4211_v40 = vadd.f32 %v4207_v36, %v1099_v38 }
 0x114   : > { %v933_v41 = vpop.f32.mrf.mxu0  ;;  %v1101_v42 = vpop.f32.mrf.mxu1 }
 0x115   : > { %1258 = vst [vmem:[#allocation2 + $0xc8] sm:$0xff] %v932_v39  ;;  %1300 = vst [vmem:[#allocation2 + $0x90] sm:$0xff] %v4211_v40  ;;  %v1917_v49 = vmul.f32 %v932_v39, %v932_v39 }
 0x116   : > { %v934_v43 = vpop.f32.mrf.mxu0  ;;  %v1102_v44 = vpop.f32.mrf.mxu1 }
 0x117   : > { %v935_v45 = vadd.f32 %v4207_v36, %v934_v43  ;;  %v4216_v46 = vadd.f32 %v4207_v36, %v1102_v44 }
 0x118   : > { %v936_v47 = vpop.f32.mrf.mxu0  ;;  %v1104_v48 = vpop.f32.mrf.mxu1 }
 0x119   : > { %1259 = vst [vmem:[#allocation2 + $0x8] sm:$0xff] %v935_v45  ;;  %v1828_v50 = vadd.f32 %v935_v45, %v932_v39  ;;  %v1918_v51 = vmul.f32 %v935_v45, %v935_v45  ;;  %1301 = vst [vmem:[#allocation2 + $0x270] sm:$0xff] %v4216_v46 }
 0x11a   : > { %v939_v52 = vpop.f32.mrf.mxu0  ;;  %v1107_v53 = vpop.f32.mrf.mxu1 }
 0x11b   : > { %v1998_v54 = vadd.f32 %v1918_v51, %v1917_v49  ;;  %v940_v55 = vadd.f32 %v4207_v36, %v939_v52  ;;  %v4221_v56 = vadd.f32 %v4207_v36, %v1107_v53 }
 0x11c   : > { %v941_v57 = vpop.f32.mrf.mxu0  ;;  %v1109_v58 = vpop.f32.mrf.mxu1 }
 0x11d   : > { %1260 = vst [vmem:[#allocation2 + $0x40] sm:$0xff] %v940_v55  ;;  %v1829_v59 = vadd.f32 %v1828_v50, %v940_v55  ;;  %v1919_v60 = vmul.f32 %v940_v55, %v940_v55  ;;  %1302 = vst [vmem:[#allocation2 + $0x1e8] sm:$0xff] %v4221_v56 }
 0x11e   : > { %v942_v61 = vpop.f32.mrf.mxu0  ;;  %v1110_v62 = vpop.f32.mrf.mxu1 }
 0x11f   : > { %v1999_v63 = vadd.f32 %v1998_v54, %v1919_v60  ;;  %v943_v0 = vadd.f32 %v4207_v36, %v942_v61  ;;  %v4226_v1 = vadd.f32 %v4207_v36, %v1110_v62 }
 0x120   : > { %v944_v2 = vpop.f32.mrf.mxu0  ;;  %v1112_v3 = vpop.f32.mrf.mxu1 }
 0x121   : > { %1261 = vst [vmem:[#allocation2 + $0x28] sm:$0xff] %v943_v0  ;;  %v1830_v4 = vadd.f32 %v1829_v59, %v943_v0  ;;  %v1920_v5 = vmul.f32 %v943_v0, %v943_v0  ;;  %1303 = vst [vmem:[#allocation2 + $0x38] sm:$0xff] %v4226_v1 }
 0x122   : > { %v947_v6 = vpop.f32.mrf.mxu0  ;;  %v1115_v7 = vpop.f32.mrf.mxu1 }
 0x123   : > { %v2000_v8 = vadd.f32 %v1999_v63, %v1920_v5  ;;  %v948_v9 = vadd.f32 %v4207_v36, %v947_v6  ;;  %v4231_v10 = vadd.f32 %v4207_v36, %v1115_v7 }
 0x124   : > { %v949_v11 = vpop.f32.mrf.mxu0  ;;  %v1117_v12 = vpop.f32.mrf.mxu1 }
 0x125   : > { %1262 = vst [vmem:[#allocation2 + $0xe8] sm:$0xff] %v948_v9  ;;  %v1831_v13 = vadd.f32 %v1830_v4, %v948_v9  ;;  %v1921_v14 = vmul.f32 %v948_v9, %v948_v9  ;;  %1304 = vst [vmem:[#allocation2 + $0x1c8] sm:$0xff] %v4231_v10 }
 0x126   : > { %v950_v15 = vpop.f32.mrf.mxu0  ;;  %v1118_v16 = vpop.f32.mrf.mxu1 }
 0x127   : > { %v2001_v17 = vadd.f32 %v2000_v8, %v1921_v14  ;;  %v951_v18 = vadd.f32 %v4207_v36, %v950_v15  ;;  %v4236_v19 = vadd.f32 %v4207_v36, %v1118_v16 }
 0x128   : > { %v952_v20 = vpop.f32.mrf.mxu0  ;;  %v1120_v21 = vpop.f32.mrf.mxu1 }
 0x129   : > { %1263 = vst [vmem:[#allocation2 + $0xf0] sm:$0xff] %v951_v18  ;;  %v1832_v22 = vadd.f32 %v1831_v13, %v951_v18  ;;  %v1922_v23 = vmul.f32 %v951_v18, %v951_v18  ;;  %1305 = vst [vmem:[#allocation2 + $0x18] sm:$0xff] %v4236_v19 }
 0x12a   : > { %v955_v24 = vpop.f32.mrf.mxu0  ;;  %v1123_v25 = vpop.f32.mrf.mxu1 }
 0x12b   : > { %v2002_v26 = vadd.f32 %v2001_v17, %v1922_v23  ;;  %v956_v27 = vadd.f32 %v4207_v36, %v955_v24  ;;  %v4241_v28 = vadd.f32 %v4207_v36, %v1123_v25 }
 0x12c   : > { %v957_v29 = vpop.f32.mrf.mxu0  ;;  %v1125_v30 = vpop.f32.mrf.mxu1 }
 0x12d   : > { %1264 = vst [vmem:[#allocation2 + $0x70] sm:$0xff] %v956_v27  ;;  %v1833_v31 = vadd.f32 %v1832_v22, %v956_v27  ;;  %v1923_v32 = vmul.f32 %v956_v27, %v956_v27  ;;  %1306 = vst [vmem:[#allocation2 + $0x58] sm:$0xff] %v4241_v28 }
 0x12e   : > { %v958_v33 = vpop.f32.mrf.mxu0  ;;  %v1126_v34 = vpop.f32.mrf.mxu1 }
 0x12f   : > { %v2003_v35 = vadd.f32 %v2002_v26, %v1923_v32  ;;  %v959_v37 = vadd.f32 %v4207_v36, %v958_v33  ;;  %v4246_v38 = vadd.f32 %v4207_v36, %v1126_v34 }
 0x130   : > { %v960_v39 = vpop.f32.mrf.mxu0  ;;  %v1128_v41 = vpop.f32.mrf.mxu1 }
 0x131   : > { %1265 = vst [vmem:[#allocation2 + $0x120] sm:$0xff] %v959_v37  ;;  %v1834_v42 = vadd.f32 %v1833_v31, %v959_v37  ;;  %v1924_v43 = vmul.f32 %v959_v37, %v959_v37  ;;  %1307 = vst [vmem:[#allocation2 + $0x168] sm:$0xff] %v4246_v38 }
 0x132   : > { %v963_v44 = vpop.f32.mrf.mxu0  ;;  %v1131_v45 = vpop.f32.mrf.mxu1 }
 0x133   : > { %v2004_v47 = vadd.f32 %v2003_v35, %v1924_v43  ;;  %v964_v48 = vadd.f32 %v4207_v36, %v963_v44  ;;  %v4251_v49 = vadd.f32 %v4207_v36, %v1131_v45 }
 0x134   : > { %v965_v50 = vpop.f32.mrf.mxu0  ;;  %v1133_v51 = vpop.f32.mrf.mxu1 }
 0x135   : > { %1266 = vst [vmem:[#allocation2 + $0xd8] sm:$0xff] %v964_v48  ;;  %v1835_v52 = vadd.f32 %v1834_v42, %v964_v48  ;;  %v1925_v53 = vmul.f32 %v964_v48, %v964_v48  ;;  %1308 = vst [vmem:[#allocation2 + $0x280] sm:$0xff] %v4251_v49 }
 0x136   : > { %v966_v54 = vpop.f32.mrf.mxu0  ;;  %v1134_v55 = vpop.f32.mrf.mxu1 }
 0x137   : > { %v2005_v57 = vadd.f32 %v2004_v47, %v1925_v53  ;;  %v967_v58 = vadd.f32 %v4207_v36, %v966_v54  ;;  %v4256_v59 = vadd.f32 %v4207_v36, %v1134_v55 }
 0x138   : > { %v968_v60 = vpop.f32.mrf.mxu0  ;;  %v1136_v61 = vpop.f32.mrf.mxu1 }
 0x139   : > { %1267 = vst [vmem:[#allocation2 + $0x148] sm:$0xff] %v967_v58  ;;  %v4258_v62 = vadd.f32 %v1835_v52, %v967_v58  ;;  %v1926_v63 = vmul.f32 %v967_v58, %v967_v58  ;;  %1309 = vst [vmem:[#allocation2 + $0x1f8] sm:$0xff] %v4256_v59 }
 0x13a   : > { %v971_v0 = vpop.f32.mrf.mxu0  ;;  %v1139_v2 = vpop.f32.mrf.mxu1 }
 0x13b   : > { %v4261_v3 = vadd.f32 %v2005_v57, %v1926_v63  ;;  %v4264_v4 = vadd.f32 %v4207_v36, %v971_v0  ;;  %v4267_v5 = vadd.f32 %v4207_v36, %v1139_v2 }
 0x13c   : > { %v973_v6 = vpop.f32.mrf.mxu0  ;;  %v1141_v7 = vpop.f32.mrf.mxu1 }
 0x13d   : > { %1268 = vst [vmem:[#allocation2 + $0x158] sm:$0xff] %v4264_v4  ;;  %1310 = vst [vmem:[#allocation2 + $0x180] sm:$0xff] %v4267_v5 }
 0x13e   : > { %v974_v8 = vpop.f32.mrf.mxu0  ;;  %v1142_v9 = vpop.f32.mrf.mxu1 }
 0x13f   : > { %v4272_v11 = vadd.f32 %v4207_v36, %v974_v8  ;;  %v4275_v12 = vadd.f32 %v4207_v36, %v1142_v9 }
 0x140   : > { %v976_v13 = vpop.f32.mrf.mxu0  ;;  %v1144_v14 = vpop.f32.mrf.mxu1 }
 0x141   : > { %1269 = vst [vmem:[#allocation2 + $0x108] sm:$0xff] %v4272_v11  ;;  %1311 = vst [vmem:[#allocation2 + $0x258] sm:$0xff] %v4275_v12 }
 0x142   : > { %v979_v15 = vpop.f32.mrf.mxu0  ;;  %v1147_v16 = vpop.f32.mrf.mxu1 }
 0x143   : > { %v4280_v17 = vadd.f32 %v4207_v36, %v979_v15  ;;  %v4283_v18 = vadd.f32 %v4207_v36, %v1147_v16 }
 0x144   : > { %v981_v20 = vpop.f32.mrf.mxu0  ;;  %v1149_v21 = vpop.f32.mrf.mxu1 }
 0x145   : > { %1270 = vst [vmem:[#allocation2 + $0x220] sm:$0xff] %v4280_v17  ;;  %1312 = vst [vmem:[#allocation2 + $0x260] sm:$0xff] %v4283_v18 }
 0x146   : > { %v982_v22 = vpop.f32.mrf.mxu0  ;;  %v1150_v23 = vpop.f32.mrf.mxu1 }
 0x147   : > { %v4288_v24 = vadd.f32 %v4207_v36, %v982_v22  ;;  %v4291_v25 = vadd.f32 %v4207_v36, %v1150_v23 }
 0x148   : > { %v984_v26 = vpop.f32.mrf.mxu0  ;;  %v1152_v27 = vpop.f32.mrf.mxu1 }
 0x149   : > { %1271 = vst [vmem:[#allocation2 + $0xc0] sm:$0xff] %v4288_v24  ;;  %1313 = vst [vmem:[#allocation2 + $0x100] sm:$0xff] %v4291_v25 }
 0x14a   : > { %v987_v29 = vpop.f32.mrf.mxu0  ;;  %v1155_v30 = vpop.f32.mrf.mxu1 }
 0x14b   : > { %v4296_v31 = vadd.f32 %v4207_v36, %v987_v29  ;;  %v4299_v32 = vadd.f32 %v4207_v36, %v1155_v30 }
 0x14c   : > { %v989_v33 = vpop.f32.mrf.mxu0  ;;  %v1157_v34 = vpop.f32.mrf.mxu1 }
 0x14d   : > { %1272 = vst [vmem:[#allocation2 + $0x140] sm:$0xff] %v4296_v31  ;;  %1314 = vst [vmem:[#allocation2 + $0x1b8] sm:$0xff] %v4299_v32 }
 0x14e   : > { %v990_v35 = vpop.f32.mrf.mxu0  ;;  %v1158_v37 = vpop.f32.mrf.mxu1 }
 0x14f   : > { %v4304_v39 = vadd.f32 %v4207_v36, %v990_v35  ;;  %v4307_v41 = vadd.f32 %v4207_v36, %v1158_v37 }
 0x150   : > { %v992_v42 = vpop.f32.mrf.mxu0  ;;  %v1160_v43 = vpop.f32.mrf.mxu1 }
 0x151   : > { %1273 = vst [vmem:[#allocation2 + $0x200] sm:$0xff] %v4304_v39  ;;  %1315 = vst [vmem:[#allocation2 + $0x110] sm:$0xff] %v4307_v41 }
 0x152   : > { %v995_v44 = vpop.f32.mrf.mxu0  ;;  %v1163_v45 = vpop.f32.mrf.mxu1 }
 0x153   : > { %v4312_v47 = vadd.f32 %v4207_v36, %v995_v44  ;;  %v4315_v48 = vadd.f32 %v4207_v36, %v1163_v45 }
 0x154   : > { %v997_v50 = vpop.f32.mrf.mxu0  ;;  %v1165_v51 = vpop.f32.mrf.mxu1 }
 0x155   : > { %1274 = vst [vmem:[#allocation2 + $0x80] sm:$0xff] %v4312_v47  ;;  %1316 = vst [vmem:[#allocation2 + $0xa0] sm:$0xff] %v4315_v48 }
 0x156   : > { %v998_v52 = vpop.f32.mrf.mxu0  ;;  %v1166_v53 = vpop.f32.mrf.mxu1 }
 0x157   : > { %v4320_v54 = vadd.f32 %v4207_v36, %v998_v52  ;;  %v4323_v55 = vadd.f32 %v4207_v36, %v1166_v53 }
 0x158   : > { %v1000_v57 = vpop.f32.mrf.mxu0  ;;  %v1168_v58 = vpop.f32.mrf.mxu1 }
 0x159   : > { %1275 = vst [vmem:[#allocation2 + $0x30] sm:$0xff] %v4320_v54  ;;  %1317 = vst [vmem:[#allocation2 + $0x278] sm:$0xff] %v4323_v55 }
 0x15a   : > { %v1003_v60 = vpop.f32.mrf.mxu0  ;;  %v1171_v61 = vpop.f32.mrf.mxu1 }
 0x15b   : > { %v4328_v63 = vadd.f32 %v4207_v36, %v1003_v60  ;;  %v4331_v0 = vadd.f32 %v4207_v36, %v1171_v61 }
 0x15c   : > { %v1005_v2 = vpop.f32.mrf.mxu0  ;;  %v1173_v6 = vpop.f32.mrf.mxu1 }
 0x15d   : > { %1276 = vst [vmem:[#allocation2 + $0x10] sm:$0xff] %v4328_v63  ;;  %1318 = vst [vmem:[#allocation2 + $0x210] sm:$0xff] %v4331_v0 }
 0x15e   : > { %v1006_v7 = vpop.f32.mrf.mxu0  ;;  %v1174_v8 = vpop.f32.mrf.mxu1 }
 0x15f   : > { %v4336_v9 = vadd.f32 %v4207_v36, %v1006_v7  ;;  %v4339_v13 = vadd.f32 %v4207_v36, %v1174_v8 }
 0x160   : > { %v1008_v14 = vpop.f32.mrf.mxu0  ;;  %v1176_v15 = vpop.f32.mrf.mxu1 }
 0x161   : > { %1277 = vst [vmem:[#allocation2 + $0x160] sm:$0xff] %v4336_v9  ;;  %1319 = vst [vmem:[#allocation2 + $0x78] sm:$0xff] %v4339_v13 }
 0x162   : > { %v1011_v16 = vpop.f32.mrf.mxu0  ;;  %v1179_v20 = vpop.f32.mrf.mxu1 }
 0x163   : > { %v4344_v21 = vadd.f32 %v4207_v36, %v1011_v16  ;;  %v4347_v22 = vadd.f32 %v4207_v36, %v1179_v20 }
 0x164   : > { %v1013_v23 = vpop.f32.mrf.mxu0  ;;  %v1181_v26 = vpop.f32.mrf.mxu1 }
 0x165   : > { %1278 = vst [vmem:[#allocation2 + $0x1d8] sm:$0xff] %v4344_v21  ;;  %1320 = vst [vmem:[#allocation2 + $0x130] sm:$0xff] %v4347_v22  ;;  %v1927_v26 = vmul.f32 %v4264_v4, %v4264_v4 }
 0x166   : > { %v1014_v27 = vpop.f32.mrf.mxu0  ;;  %v1182_v29 = vpop.f32.mrf.mxu1 }
 0x167   : > { %v4352_v30 = vadd.f32 %v4207_v36, %v1014_v27  ;;  %v4355_v33 = vadd.f32 %v4207_v36, %v1182_v29 }
 0x168   : > { %v1016_v34 = vpop.f32.mrf.mxu0  ;;  %v1184_v35 = vpop.f32.mrf.mxu1 }
 0x169   : > { %1279 = vst [vmem:[#allocation2 + $0x1a0] sm:$0xff] %v4352_v30  ;;  %1321 = vst [vmem:[#allocation2 + $0x1f0] sm:$0xff] %v4355_v33  ;;  %v1928_v34 = vmul.f32 %v4272_v11, %v4272_v11 }
 0x16a   : > { %v1019_v37 = vpop.f32.mrf.mxu0  ;;  %v1187_v42 = vpop.f32.mrf.mxu1 }
 0x16b   : > { %v4360_v43 = vadd.f32 %v4207_v36, %v1019_v37  ;;  %v4363_v44 = vadd.f32 %v4207_v36, %v1187_v42  ;;  %v1837_v42 = vadd.f32 %v4258_v62, %v4264_v4  ;;  %v1930_v4 = vmul.f32 %v4288_v24, %v4288_v24 }
 0x16c   : > { %v1021_v45 = vpop.f32.mrf.mxu0  ;;  %v1189_v50 = vpop.f32.mrf.mxu1 }
 0x16d   : > { %1280 = vst [vmem:[#allocation2 + $0x248] sm:$0xff] %v4360_v43  ;;  %1322 = vst [vmem:[#allocation2 + $0xa8] sm:$0xff] %v4363_v44 }
 0x16e   : > { %v1022_v51 = vpop.f32.mrf.mxu0  ;;  %v1190_v52 = vpop.f32.mrf.mxu1 }
 0x16f   : > { %v4368_v53 = vadd.f32 %v4207_v36, %v1022_v51  ;;  %v4371_v57 = vadd.f32 %v4207_v36, %v1190_v52  ;;  %v2007_v51 = vadd.f32 %v4261_v3, %v1927_v26  ;;  %v1929_v52 = vmul.f32 %v4280_v17, %v4280_v17 }
 0x170   : > { %v1024_v58 = vpop.f32.mrf.mxu0  ;;  %v1192_v60 = vpop.f32.mrf.mxu1 }
 0x171   : > { %1281 = vst [vmem:[#allocation2 + $0x218] sm:$0xff] %v4368_v53  ;;  %1323 = vst [vmem:[#allocation2 + $0x60] sm:$0xff] %v4371_v57  ;;  %v2008_v62 = vadd.f32 %v2007_v51, %v1928_v34 }
 0x172   : > { %v1027_v61 = vpop.f32.mrf.mxu0  ;;  %v1195_v2 = vpop.f32.mrf.mxu1 }
 0x173   : > { %v4376_v6 = vadd.f32 %v4207_v36, %v1027_v61  ;;  %v4379_v7 = vadd.f32 %v4207_v36, %v1195_v2  ;;  %v1838_v61 = vadd.f32 %v1837_v42, %v4272_v11  ;;  %v1931_v11 = vmul.f32 %v4296_v31, %v4296_v31 }
 0x174   : > { %v1029_v8 = vpop.f32.mrf.mxu0  ;;  %v1197_v14 = vpop.f32.mrf.mxu1 }
 0x175   : > { %1282 = vst [vmem:[#allocation2 + $0x190] sm:$0xff] %v4376_v6  ;;  %1324 = vst [vmem:[#allocation2 + $0x138] sm:$0xff] %v4379_v7  ;;  %v1839_v14 = vadd.f32 %v1838_v61, %v4280_v17  ;;  %v1932_v17 = vmul.f32 %v4304_v39, %v4304_v39 }
 0x176   : > { %v1030_v15 = vpop.f32.mrf.mxu0  ;;  %v1198_v16 = vpop.f32.mrf.mxu1 }
 0x177   : > { %v4384_v20 = vadd.f32 %v4207_v36, %v1030_v15  ;;  %v4387_v23 = vadd.f32 %v4207_v36, %v1198_v16  ;;  %v2009_v16 = vadd.f32 %v2008_v62, %v1929_v52  ;;  %v3829_v62 = vmov 0.0  }
 0x178   : > { %v1032_v27 = vpop.f32.mrf.mxu0  ;;  %v1200_v29 = vpop.f32.mrf.mxu1  ;;  %272 = vst [vmem:[#allocation3] sm:$0x1] %v3829_v62  ;;  %273 = vst [vmem:[#allocation4] sm:$0x1] %v3829_v62 }
 0x179   : > { %1283 = vst [vmem:[#allocation2 + $0x48] sm:$0xff] %v4384_v20  ;;  %1325 = vst [vmem:[#allocation2 + $0xd0] sm:$0xff] %v4387_v23  ;;  %v1840_v29 = vadd.f32 %v1839_v14, %v4288_v24  ;;  %v2010_v34 = vadd.f32 %v2009_v16, %v1930_v4  ;;  %v1933_v24 = vmul.f32 %v4312_v47, %v4312_v47 }
 0x17a   : > { %v1035_v35 = vpop.f32.mrf.mxu0  ;;  %v1203_v37 = vpop.f32.mrf.mxu1 }
 0x17b   : > { %v4398_v45 = vadd.f32 %v4207_v36, %v1035_v35  ;;  %v4401_v50 = vadd.f32 %v4207_v36, %v1203_v37  ;;  %v1841_v42 = vadd.f32 %v1840_v29, %v4296_v31 }
 0x17c   : > { %v1037_v58 = vpop.f32.mrf.mxu0  ;;  %v1205_v60 = vpop.f32.mrf.mxu1 }
 0x17d   : > { %1284 = vst [vmem:[#allocation2 + $0x68] sm:$0xff] %v4398_v45  ;;  %1326 = vst [vmem:[#allocation2 + $0x128] sm:$0xff] %v4401_v50  ;;  %v2011_v58 = vadd.f32 %v2010_v34, %v1931_v11  ;;  %v1842_v4 = vadd.f32 %v1841_v42, %v4304_v39  ;;  %v1935_v39 = vmul.f32 %v4328_v63, %v4328_v63 }
 0x17e   : > { %v1038_v2 = vpop.f32.mrf.mxu0  ;;  %v1206_v8 = vpop.f32.mrf.mxu1 }
 0x17f   : > { %v4413_v3 = vadd.f32 %v4207_v36, %v1038_v2  ;;  %v4416_v15 = vadd.f32 %v4207_v36, %v1206_v8  ;;  %v2012_v31 = vadd.f32 %v2011_v58, %v1932_v17  ;;  %v1934_v2 = vmul.f32 %v4320_v54, %v4320_v54 }
 0x180   : > { %v1040_v26 = vpop.f32.mrf.mxu0  ;;  %v1208_v27 = vpop.f32.mrf.mxu1  ;;  %v1843_v16 = vadd.f32 %v1842_v4, %v4312_v47  ;;  %v1936_v47 = vmul.f32 %v4336_v9, %v4336_v9 }
 0x181   : > { %1285 = vst [vmem:[#allocation2 + $0x238] sm:$0xff] %v4413_v3  ;;  %1327 = vst [vmem:[#allocation2 + $0xb0] sm:$0xff] %v4416_v15  ;;  %v2013_v27 = vadd.f32 %v2012_v31, %v1933_v24 }
 0x182   : > { %v1043_v35 = vpop.f32.mrf.mxu0  ;;  %v1211_v37 = vpop.f32.mrf.mxu1  ;;  %v1844_v17 = vadd.f32 %v1843_v16, %v4320_v54  ;;  %v1937_v54 = vmul.f32 %v4344_v21, %v4344_v21 }
 0x183   : > { %v4427_v51 = vadd.f32 %v4207_v36, %v1043_v35  ;;  %v4430_v52 = vadd.f32 %v4207_v36, %v1211_v37  ;;  %v2014_v35 = vadd.f32 %v2013_v27, %v1934_v2 }
 0x184   : > { %v1045_v60 = vpop.f32.mrf.mxu0  ;;  %v1213_v61 = vpop.f32.mrf.mxu1  ;;  %v1845_v58 = vadd.f32 %v1844_v17, %v4328_v63  ;;  %v1938_v63 = vmul.f32 %v4352_v30, %v4352_v30 }
 0x185   : > { %1286 = vst [vmem:[#allocation2 + $0x188] sm:$0xff] %v4427_v51  ;;  %1328 = vst [vmem:[#allocation2 + $0x1c0] sm:$0xff] %v4430_v52  ;;  %v2015_v61 = vadd.f32 %v2014_v35, %v1935_v39 }
 0x186   : > { %v1046_v8 = vpop.f32.mrf.mxu0  ;;  %v1214_v14 = vpop.f32.mrf.mxu1  ;;  %v1846_v2 = vadd.f32 %v1845_v58, %v4336_v9  ;;  %v1939_v9 = vmul.f32 %v4360_v43, %v4360_v43 }
 0x187   : > { %v4443_v11 = vadd.f32 %v4207_v36, %v1046_v8  ;;  %v4446_v26 = vadd.f32 %v4207_v36, %v1214_v14  ;;  %v2016_v8 = vadd.f32 %v2015_v61, %v1936_v47 }
 0x188   : > { %v1048_v29 = vpop.f32.mrf.mxu0  ;;  %v1216_v34 = vpop.f32.mrf.mxu1  ;;  %v1847_v27 = vadd.f32 %v1846_v2, %v4344_v21  ;;  %v1940_v21 = vmul.f32 %v4368_v53, %v4368_v53 }
 0x189   : > { %1287 = vst [vmem:[#allocation2 + $0x250] sm:$0xff] %v4443_v11  ;;  %1329 = vst [vmem:[#allocation2 + $0x88] sm:$0xff] %v4446_v26  ;;  %v2017_v34 = vadd.f32 %v2016_v8, %v1937_v54 }
 0x18a   : > { %v1051_v37 = vpop.f32.mrf.mxu0  ;;  %v1219_v42 = vpop.f32.mrf.mxu1  ;;  %v1848_v47 = vadd.f32 %v1847_v27, %v4352_v30  ;;  %v1941_v30 = vmul.f32 %v4376_v6, %v4376_v6 }
 0x18b   : > { %v4457_v24 = vadd.f32 %v4207_v36, %v1051_v37  ;;  %v4460_v60 = vadd.f32 %v4207_v36, %v1219_v42  ;;  %v2018_v37 = vadd.f32 %v2017_v34, %v1938_v63 }
 0x18c   : > { %v1053_v4 = vpop.f32.mrf.mxu0  ;;  %v1221_v31 = vpop.f32.mrf.mxu1  ;;  %v1849_v61 = vadd.f32 %v1848_v47, %v4360_v43  ;;  %v1942_v43 = vmul.f32 %v4384_v20, %v4384_v20 }
 0x18d   : > { %1288 = vst [vmem:[#allocation2 + $0xb8] sm:$0xff] %v4457_v24  ;;  %1330 = vst [vmem:[#allocation2 + $0x230] sm:$0xff] %v4460_v60  ;;  %v2019_v31 = vadd.f32 %v2018_v37, %v1939_v9 }
 0x18e   : > { %v1054_v14 = vpop.f32.mrf.mxu0  ;;  %v1222_v16 = vpop.f32.mrf.mxu1  ;;  %v1850_v63 = vadd.f32 %v1849_v61, %v4368_v53  ;;  %v1943_v53 = vmul.f32 %v4398_v45, %v4398_v45 }
 0x18f   : > { %v4471_v39 = vadd.f32 %v4207_v36, %v1054_v14  ;;  %v4474_v29 = vadd.f32 %v4207_v36, %v1222_v16  ;;  %v2020_v14 = vadd.f32 %v2019_v31, %v1940_v21 }
 0x190   : > { %v1056_v17 = vpop.f32.mrf.mxu0  ;;  %v1224_v35 = vpop.f32.mrf.mxu1  ;;  %v1851_v34 = vadd.f32 %v1850_v63, %v4376_v6  ;;  %v1944_v6 = vmul.f32 %v4413_v3, %v4413_v3 }
 0x191   : > { %1289 = vst [vmem:[#allocation2 + $0x268] sm:$0xff] %v4471_v39  ;;  %1331 = vst [vmem:[#allocation2 + $0x50] sm:$0xff] %v4474_v29  ;;  %v2021_v35 = vadd.f32 %v2020_v14, %v1941_v30 }
 0x192   : > { %v1059_v42 = vpop.f32.mrf.mxu0  ;;  %v1227_v58 = vpop.f32.mrf.mxu1  ;;  %v1852_v21 = vadd.f32 %v1851_v34, %v4384_v20  ;;  %v1945_v20 = vmul.f32 %v4427_v51, %v4427_v51 }
 0x193   : > { %v4485_v54 = vadd.f32 %v4207_v36, %v1059_v42  ;;  %v4488_v4 = vadd.f32 %v4207_v36, %v1227_v58  ;;  %v2022_v42 = vadd.f32 %v2021_v35, %v1942_v43 }
 0x194   : > { %v1061_v2 = vpop.f32.mrf.mxu0  ;;  %v1229_v8 = vpop.f32.mrf.mxu1  ;;  %v1853_v31 = vadd.f32 %v1852_v21, %v4398_v45  ;;  %v1946_v45 = vmul.f32 %v4443_v11, %v4443_v11 }
 0x195   : > { %1290 = vst [vmem:[#allocation2 + $0xf8] sm:$0xff] %v4485_v54  ;;  %1332 = vst [vmem:[#allocation2 + $0x150] sm:$0xff] %v4488_v4  ;;  %v1339_v8 = vlaneseq  ;;  %v2023_v63 = vadd.f32 %v2022_v42, %v1943_v53 }
 0x196   : > { %v1062_v16 = vpop.f32.mrf.mxu0  ;;  %v1230_v27 = vpop.f32.mrf.mxu1  ;;  %v1854_v43 = vadd.f32 %v1853_v31, %v4413_v3  ;;  %v1947_v3 = vmul.f32 %v4457_v24, %v4457_v24 }
 0x197   : > { %v4499_v9 = vadd.f32 %v4207_v36, %v1062_v16  ;;  %v4502_v17 = vadd.f32 %v4207_v36, %v1230_v27  ;;  %v2024_v27 = vadd.f32 %v2023_v63, %v1944_v6  ;;  %v1340_v21 = vshrl.u32 %v1339_v8, 7 }
 0x198   : > { %v1064_v47 = vpop.f32.mrf.mxu0  ;;  %v1232_v37 = vpop.f32.mrf.mxu1 }
 0x199   : > { %1291 = vst [vmem:[#allocation2 + $0x98] sm:$0xff] %v4499_v9  ;;  %1333 = vst [vmem:[#allocation2 + $0x178] sm:$0xff] %v4502_v17  ;;  %v1855_v47 = vadd.f32 %v1854_v43, %v4427_v51  ;;  %v2025_v42 = vadd.f32 %v2024_v27, %v1945_v20  ;;  %v1948_v51 = vmul.f32 %v4471_v39, %v4471_v39  ;;  %v1420_v43 = vadd.s32 640, %v1340_v21 }
 0x19a   : > { %v1067_v58 = vpop.f32.mrf.mxu0  ;;  %v1235_v61 = vpop.f32.mrf.mxu1 }
 0x19b   : > { %v1068_v30 = vadd.f32 %v4207_v36, %v1067_v58  ;;  %v4514_v2 = vadd.f32 %v4207_v36, %v1235_v61  ;;  %v1856_v6 = vadd.f32 %v1855_v47, %v4443_v11  ;;  %v2026_v31 = vadd.f32 %v2025_v42, %v1946_v45 }
 0x19c   : > { %v1069_v14 = vpop.f32.mrf.mxu0  ;;  %v1237_v16 = vpop.f32.mrf.mxu1  ;;  %v1949_v11 = vmul.f32 %v4485_v54, %v4485_v54  ;;  %vm1583_vm0 = vcmp.lt.s32.totalorder %v1420_v43, 642 }
 0x19d   : > { %1292 = vst [vmem:[#allocation2 + $0xe0] sm:$0xff] %v1068_v30  ;;  %1334 = vst [vmem:[#allocation2 + $0x240] sm:$0xff] %v4514_v2  ;;  %v1857_v16 = vadd.f32 %v1856_v6, %v4457_v24  ;;  %v2027_v27 = vadd.f32 %v2026_v31, %v1947_v3  ;;  %v1950_v24 = vmul.f32 %v4499_v9, %v4499_v9 }
 0x19e   : > { %v1070_v34 = vpop.f32.mrf.mxu0  ;;  %v1238_v35 = vpop.f32.mrf.mxu1 }
 0x19f   : > { %v1071_v53 = vadd.f32 %v4207_v36, %v1070_v34  ;;  %v4525_v37 = vadd.f32 %v4207_v36, %v1238_v35  ;;  %v1858_v45 = vadd.f32 %v1857_v16, %v4471_v39  ;;  %v2028_v47 = vadd.f32 %v2027_v27, %v1948_v51 }
 0x1a0   : > { %v1072_v58 = vpop.f32.mrf.mxu0  ;;  %v1240_v61 = vpop.f32.mrf.mxu1 }
 0x1a1   : > { %1293 = vst [vmem:[#allocation2 + $0x198] sm:$0xff] %v1071_v53  ;;  %1335 = vst [vmem:[#allocation2 + $0x118] sm:$0xff] %v4525_v37  ;;  %v1859_v61 = vadd.f32 %v1858_v45, %v4485_v54  ;;  %v2029_v6 = vadd.f32 %v2028_v47, %v1949_v11  ;;  %v3195_v54 = vsel %vm1583_vm0, 1.0, %v3829_v62 }
 0x1a2   : > { %v1075_v63 = vpop.f32.mrf.mxu0  ;;  %v1243_v14 = vpop.f32.mrf.mxu1 }
 0x1a3   : > { %v1076_v8 = vadd.f32 %v4207_v36, %v1075_v63  ;;  %v4536_v20 = vadd.f32 %v4207_v36, %v1243_v14  ;;  %v1860_v63 = vadd.f32 %v1859_v61, %v4499_v9  ;;  %v1951_v14 = vmul.f32 %v1068_v30, %v1068_v30 }
 0x1a4   : > { %v1077_v34 = vpop.f32.mrf.mxu0  ;;  %v1245_v35 = vpop.f32.mrf.mxu1  ;;  %v2030_v51 = vadd.f32 %v2029_v6, %v1950_v24 }
 0x1a5   : > { %1294 = vst [vmem:[#allocation2 + $0x1d0] sm:$0xff] %v1076_v8  ;;  %1336 = vst [vmem:[#allocation2 + $0x208] sm:$0xff] %v4536_v20  ;;  %v1861_v34 = vadd.f32 %v1860_v63, %v1068_v30  ;;  %v1952_v35 = vmul.f32 %v1071_v53, %v1071_v53  ;;  %v1953_v9 = vmul.f32 %v1076_v8, %v1076_v8 }
 0x1a6   : > { %v1078_v42 = vpop.f32.mrf.mxu0  ;;  %v1246_v58 = vpop.f32.mrf.mxu1 }
 0x1a7   : > { %v1079_v21 = vadd.f32 %v4207_v36, %v1078_v42  ;;  %v4547_v3 = vadd.f32 %v4207_v36, %v1246_v58  ;;  %v2031_v42 = vadd.f32 %v2030_v51, %v1951_v14  ;;  %v1862_v58 = vadd.f32 %v1861_v34, %v1071_v53 }
 0x1a8   : > { %v1080_v31 = vpop.f32.mrf.mxu0  ;;  %v1248_v39 = vpop.f32.mrf.mxu1 }
 0x1a9   : > { %4985 = vst [vmem:[#allocation7_spill] sm:$0xff] %v4547_v3  ;;  %1295 = vst [vmem:[#allocation2 + $0x1e0] sm:$0xff] %v1079_v21  ;;  %v2032_v31 = vadd.f32 %v2031_v42, %v1952_v35  ;;  %v1863_v39 = vadd.f32 %v1862_v58, %v1076_v8  ;;  %v1954_v62 = vmul.f32 %v1079_v21, %v1079_v21 }
 0x1aa   : > { %1337 = vst [vmem:[#allocation2 + $0x170] sm:$0xff] %v4547_v3  ;;  %v1083_v16 = vpop.f32.mrf.mxu0  ;;  %v1251_v27 = vpop.f32.mrf.mxu1 }
 0x1ab   : > { %v1084_v45 = vadd.f32 %v4207_v36, %v1083_v16  ;;  %v1252_v43 = vadd.f32 %v4207_v36, %v1251_v27  ;;  %v2033_v3 = vadd.f32 %v2032_v31, %v1953_v9  ;;  %v1864_v27 = vadd.f32 %v1863_v39, %v1079_v21 }
 0x1ac   : > { %v1085_v11 = vpop.f32.mrf.mxu0  ;;  %v1253_v47 = vpop.f32.mrf.mxu1 }
 0x1ad   : > { %1296 = vst [vmem:[#allocation2 + $0x1a8] sm:$0xff] %v1084_v45  ;;  %1338 = vst [vmem:[#allocation2 + $0x20] sm:$0xff] %v1252_v43  ;;  %v4554_v61 = vmul.f32 %v3195_v54, %v1252_v43  ;;  %v1955_v11 = vmul.f32 %v1084_v45, %v1084_v45  ;;  %v2034_v53 = vadd.f32 %v2033_v3, %v1954_v62 }
 0x1ae   : > { %v1086_v24 = vpop.f32.mrf.mxu0  ;;  %v1254_v6 = vpop.f32.mrf.mxu1  ;;  %v1865_v51 = vadd.f32 %v1864_v27, %v1084_v45  ;;  %v1959_v3 = vmul.f32 %v4211_v40, %v4211_v40 }
 0x1af   : > { %v1087_v30 = vadd.f32 %v4207_v36, %v1086_v24  ;;  %v2035_v47 = vadd.f32 %v2034_v53, %v1955_v11 }
 0x1b0   : > { %v1088_v63 = vpop.f32.mrf.mxu0  ;;  %v1255_v16 = vpop.f32.mrf.mxu1 }
 0x1b1   : > { %1297 = vst [vmem:[#allocation2 + $0x228] sm:$0xff] %v1087_v30  ;;  %v1956_v34 = vmul.f32 %v1087_v30, %v1087_v30  ;;  %v1866_v6 = vadd.f32 %v1865_v51, %v1087_v30  ;;  %v1960_v30 = vmul.f32 %v4216_v46, %v4216_v46 }
 0x1b2   : > { %v1091_v14 = vpop.f32.mrf.mxu0 }
 0x1b3   : > { %v1092_v54 = vadd.f32 %v4207_v36, %v1091_v14  ;;  %v2036_v42 = vadd.f32 %v2035_v47, %v1956_v34  ;;  %v1962_v14 = vmul.f32 %v4226_v1, %v4226_v1 }
 0x1b4   : > { %v1093_v43 = vpop.f32.mrf.mxu0 }
 0x1b5   : > { %1298 = vst [vmem:[#allocation2] sm:$0xff] %v1092_v54  ;;  %v1957_v8 = vmul.f32 %v1092_v54, %v1092_v54  ;;  %v1867_v58 = vadd.f32 %v1866_v6, %v1092_v54 }
 0x1b6   : > { %v1094_v35 = vpop.f32.mrf.mxu0 }
 0x1b7   : > { %v1095_v24 = vadd.f32 %v4207_v36, %v1094_v35  ;;  %v2037_v21 = vadd.f32 %v2036_v42, %v1957_v8  ;;  %v1961_v36 = vmul.f32 %v4221_v56, %v4221_v56 }
 0x1b8   : > { %v1096_v9 = vpop.f32.mrf.mxu0 }
 0x1b9   : > { %1299 = vst [vmem:[#allocation2 + $0x1b0] sm:$0xff] %v1095_v24  ;;  %v1868_v31 = vadd.f32 %v1867_v58, %v1095_v24  ;;  %v1958_v39 = vmul.f32 %v1095_v24, %v1095_v24 }
 0x1bb   : > { %v1869_v45 = vadd.f32 %v1868_v31, %v4211_v40  ;;  %v2038_v62 = vadd.f32 %v2037_v21, %v1958_v39  ;;  %v1963_v40 = vmul.f32 %v4231_v10, %v4231_v10 }
 0x1bd   : > { %v1870_v63 = vadd.f32 %v1869_v45, %v4216_v46  ;;  %v2039_v16 = vadd.f32 %v2038_v62, %v1959_v3  ;;  %v1964_v46 = vmul.f32 %v4236_v19, %v4236_v19 }
 0x1bf   : > { %v1871_v27 = vadd.f32 %v1870_v63, %v4221_v56  ;;  %v2040_v11 = vadd.f32 %v2039_v16, %v1960_v30  ;;  %v1965_v56 = vmul.f32 %v4241_v28, %v4241_v28 }
 0x1c1   : > { %v1872_v53 = vadd.f32 %v1871_v27, %v4226_v1  ;;  %v2041_v51 = vadd.f32 %v2040_v11, %v1961_v36  ;;  %v1966_v1 = vmul.f32 %v4246_v38, %v4246_v38 }
 0x1c3   : > { %v1873_v34 = vadd.f32 %v1872_v53, %v4231_v10  ;;  %v2042_v54 = vadd.f32 %v2041_v51, %v1962_v14  ;;  %v1967_v10 = vmul.f32 %v4251_v49, %v4251_v49 }
 0x1c5   : > { %v1874_v43 = vadd.f32 %v1873_v34, %v4236_v19  ;;  %v2043_v47 = vadd.f32 %v2042_v54, %v1963_v40  ;;  %v1968_v19 = vmul.f32 %v4256_v59, %v4256_v59 }
 0x1c7   : > { %v1875_v6 = vadd.f32 %v1874_v43, %v4241_v28  ;;  %v2044_v8 = vadd.f32 %v2043_v47, %v1964_v46  ;;  %v1969_v28 = vmul.f32 %v4267_v5, %v4267_v5 }
 0x1c9   : > { %v1876_v35 = vadd.f32 %v1875_v6, %v4246_v38  ;;  %v2045_v42 = vadd.f32 %v2044_v8, %v1965_v56  ;;  %v1970_v38 = vmul.f32 %v4275_v12, %v4275_v12  ;;  %v1980_v8 = vmul.f32 %v4355_v33, %v4355_v33 }
 0x1cb   : > { %v1877_v58 = vadd.f32 %v1876_v35, %v4251_v49  ;;  %v2046_v24 = vadd.f32 %v2045_v42, %v1966_v1  ;;  %v1971_v49 = vmul.f32 %v4283_v18, %v4283_v18  ;;  %v1981_v42 = vmul.f32 %v4363_v44, %v4363_v44 }
 0x1cd   : > { %v1878_v9 = vadd.f32 %v1877_v58, %v4256_v59  ;;  %v2047_v21 = vadd.f32 %v2046_v24, %v1967_v10  ;;  %v1972_v59 = vmul.f32 %v4291_v25, %v4291_v25  ;;  %v1982_v58 = vmul.f32 %v4371_v57, %v4371_v57 }
 0x1cf   : > { %v2048_v31 = vadd.f32 %v2047_v21, %v1968_v19  ;;  %v1879_v39 = vadd.f32 %v1878_v9, %v4267_v5  ;;  %v1973_v5 = vmul.f32 %v4299_v32, %v4299_v32  ;;  %v1983_v19 = vmul.f32 %v4379_v7, %v4379_v7 }
 0x1d0   : > { %v1984_v21 = vmul.f32 %v4387_v23, %v4387_v23 }
 0x1d1   : > { %v1880_v3 = vadd.f32 %v1879_v39, %v4275_v12  ;;  %v2049_v45 = vadd.f32 %v2048_v31, %v1969_v28  ;;  %v1974_v12 = vmul.f32 %v4307_v41, %v4307_v41  ;;  %v1985_v31 = vmul.f32 %v4401_v50, %v4401_v50 }
 0x1d3   : > { %v1881_v62 = vadd.f32 %v1880_v3, %v4283_v18  ;;  %v2050_v30 = vadd.f32 %v2049_v45, %v1970_v38  ;;  %v1975_v18 = vmul.f32 %v4315_v48, %v4315_v48  ;;  %v1986_v38 = vmul.f32 %v4416_v15, %v4416_v15 }
 0x1d4   : > { %v1987_v45 = vmul.f32 %v4430_v52, %v4430_v52 }
 0x1d5   : > { %v1882_v63 = vadd.f32 %v1881_v62, %v4291_v25  ;;  %v2051_v16 = vadd.f32 %v2050_v30, %v1971_v49  ;;  %v1976_v25 = vmul.f32 %v4323_v55, %v4323_v55  ;;  %v1988_v62 = vmul.f32 %v4446_v26, %v4446_v26 }
 0x1d7   : > { %v1883_v36 = vadd.f32 %v1882_v63, %v4299_v32  ;;  %v2052_v27 = vadd.f32 %v2051_v16, %v1972_v59  ;;  %v1977_v32 = vmul.f32 %v4331_v0, %v4331_v0  ;;  %v1989_v59 = vmul.f32 %v4460_v60, %v4460_v60 }
 0x1d8   : > { %v1990_v16 = vmul.f32 %v4474_v29, %v4474_v29 }
 0x1d9   : > { %v1884_v11 = vadd.f32 %v1883_v36, %v4307_v41  ;;  %v2053_v14 = vadd.f32 %v2052_v27, %v1973_v5  ;;  %v1978_v41 = vmul.f32 %v4339_v13, %v4339_v13  ;;  %v1991_v36 = vmul.f32 %v4488_v4, %v4488_v4 }
 0x1db   : > { %v1885_v53 = vadd.f32 %v1884_v11, %v4315_v48  ;;  %v2054_v51 = vadd.f32 %v2053_v14, %v1974_v12  ;;  %v1979_v48 = vmul.f32 %v4347_v22, %v4347_v22  ;;  %v1992_v12 = vmul.f32 %v4502_v17, %v4502_v17 }
 0x1dc   : > { %v1993_v14 = vmul.f32 %v4514_v2, %v4514_v2 }
 0x1dd   : > { %v1886_v40 = vadd.f32 %v1885_v53, %v4323_v55  ;;  %v2055_v34 = vadd.f32 %v2054_v51, %v1975_v18  ;;  %v1994_v53 = vmul.f32 %v4525_v37, %v4525_v37 }
 0x1df   : > { %v1887_v54 = vadd.f32 %v1886_v40, %v4331_v0  ;;  %v2056_v46 = vadd.f32 %v2055_v34, %v1976_v25  ;;  %v1995_v25 = vmul.f32 %v4536_v20, %v4536_v20 }
 0x1e1   : > { %v1888_v43 = vadd.f32 %v1887_v54, %v4339_v13  ;;  %v2057_v47 = vadd.f32 %v2056_v46, %v1977_v32 }
 0x1e3   : > { %v1889_v56 = vadd.f32 %v1888_v43, %v4347_v22  ;;  %v2058_v6 = vadd.f32 %v2057_v47, %v1978_v41 }
 0x1e5   : > { %v1890_v55 = vadd.f32 %v1889_v56, %v4355_v33  ;;  %v2059_v1 = vadd.f32 %v2058_v6, %v1979_v48 }
 0x1e7   : > { %v2060_v0 = vadd.f32 %v2059_v1, %v1980_v8  ;;  %v1891_v35 = vadd.f32 %v1890_v55, %v4363_v44  ;;  %v1827_v1 = vld [vmem:[#allocation3] sm:$0x1] }
 0x1e9   : > { %v2061_v13 = vadd.f32 %v2060_v0, %v1981_v42  ;;  %v1892_v10 = vadd.f32 %v1891_v35, %v4371_v57  ;;  %v1916_v42 = vld [vmem:[#allocation4] sm:$0x1] }
 0x1eb   : > { %v2062_v22 = vadd.f32 %v2061_v13, %v1982_v58  ;;  %v1893_v24 = vadd.f32 %v1892_v10, %v4379_v7 }
 0x1ed   : > { %v2063_v33 = vadd.f32 %v2062_v22, %v1983_v19  ;;  %v1894_v9 = vadd.f32 %v1893_v24, %v4387_v23 }
 0x1ef   : > { %v2064_v28 = vadd.f32 %v2063_v33, %v1984_v21  ;;  %v1895_v44 = vadd.f32 %v1894_v9, %v4401_v50 }
 0x1f1   : > { %v2065_v39 = vadd.f32 %v2064_v28, %v1985_v31  ;;  %v1896_v57 = vadd.f32 %v1895_v44, %v4416_v15 }
 0x1f3   : > { %v2066_v3 = vadd.f32 %v2065_v39, %v1986_v38  ;;  %v1897_v7 = vadd.f32 %v1896_v57, %v4430_v52 }
 0x1f5   : > { %v2067_v49 = vadd.f32 %v2066_v3, %v1987_v45  ;;  %v1898_v23 = vadd.f32 %v1897_v7, %v4446_v26 }
 0x1f7   : > { %v2068_v30 = vadd.f32 %v2067_v49, %v1988_v62  ;;  %v1899_v50 = vadd.f32 %v1898_v23, %v4460_v60 }
 0x1f9   : > { %v2069_v63 = vadd.f32 %v2068_v30, %v1989_v59  ;;  %v1900_v15 = vadd.f32 %v1899_v50, %v4474_v29 }
 0x1fb   : > { %v2070_v5 = vadd.f32 %v2069_v63, %v1990_v16  ;;  %v1901_v52 = vadd.f32 %v1900_v15, %v4488_v4 }
 0x1fd   : > { %v2071_v27 = vadd.f32 %v2070_v5, %v1991_v36  ;;  %v1902_v26 = vadd.f32 %v1901_v52, %v4502_v17  ;;  %v4986_v17 = vld [vmem:[#allocation7_spill] sm:$0xff] }
 0x1fe   : > { %v1996_v32 = vmul.f32 %v4986_v17, %v4986_v17 }
 0x1ff   : > { %v2072_v11 = vadd.f32 %v2071_v27, %v1992_v12  ;;  %v1903_v60 = vadd.f32 %v1902_v26, %v4514_v2  ;;  %v1997_v2 = vmul.f32 %v4554_v61, %v4554_v61 }
 0x201   : > { %v2073_v18 = vadd.f32 %v2072_v11, %v1993_v14  ;;  %v1904_v29 = vadd.f32 %v1903_v60, %v4525_v37 }
 0x203   : > { %v2074_v51 = vadd.f32 %v2073_v18, %v1994_v53  ;;  %v1905_v4 = vadd.f32 %v1904_v29, %v4536_v20 }
 0x205   : > { %v2075_v40 = vadd.f32 %v2074_v51, %v1995_v25  ;;  %v1906_v34 = vadd.f32 %v1905_v4, %v4986_v17 }
 0x207   : > { %v2076_v54 = vadd.f32 %v2075_v40, %v1996_v32  ;;  %v1907_v46 = vadd.f32 %v1906_v34, %v4554_v61 }
 0x209   : > { %v1908_v41 = vrot.slane %v1907_v46, 4  ;;  %v2077_v37 = vadd.f32 %v2076_v54, %v1997_v2 }
 0x20b   : > { %v1909_v43 = vadd.f32 %v1908_v41, %v1907_v46  ;;  %v2078_v47 = vrot.slane %v2077_v37, 4 }
 0x20d   : > { %v1910_v48 = vrot.slane %v1909_v43, 2  ;;  %v2079_v56 = vadd.f32 %v2078_v47, %v2077_v37 }
 0x20f   : > { %v1911_v6 = vadd.f32 %v1910_v48, %v1909_v43  ;;  %v2080_v20 = vrot.slane %v2079_v56, 2 }
 0x211   : > { %v1912_v55 = vrot.slane %v1911_v6, 1  ;;  %v2081_v8 = vadd.f32 %v2080_v20, %v2079_v56 }
 0x213   : > { %v1913_v0 = vadd.f32 %v1912_v55, %v1911_v6  ;;  %v2082_v35 = vrot.slane %v2081_v8, 1 }
 0x215   : > { %v1914_v13 = vadd.f32 %v1913_v0, %v1827_v1  ;;  %v2083_v10 = vadd.f32 %v2082_v35, %v2081_v8 }
 0x217   : > { %1915 = vst [vmem:[#allocation3] sm:$0x1] %v1914_v13  ;;  %v2084_v58 = vadd.f32 %v2083_v10, %v1916_v42 }
 0x219   : > { %2085 = vst [vmem:[#allocation4] sm:$0x1] %v2084_v58 }
 0x21a PF: > { %p3196_p5 = scmp.ne.s32.totalorder %s3818_s18, 1 }
 0x21c   : > { %2089 = sbr.rel (%p3196_p5) target bundleno = 697 (0x2b9), region = 52 }
 0x221   : > { %v2094_v61 = vld [vmem:[#allocation3] sm:$0x1]  ;;  %v2096_v22 = vld [vmem:[#allocation4] sm:$0x1]  ;;  %v2101_v44 = vld [vmem:[%s4980_s3] sm:$0x1] }
 0x222   : > { %v2095_v24 = vmul.f32 0.0015576323, %v2094_v61  ;;  %v2097_v19 = vmul.f32 0.0015576323, %v2096_v22  ;;  %v2106_v57 = vld [vmem:[%s4981_s4] sm:$0x1] }
 0x223   : > { %v2111_v7 = vld [vmem:[#allocation2 + $0xc8] sm:$0xff]  ;;  %v2113_v49 = vld [vmem:[#allocation2 + $0x40] sm:$0xff]  ;;  %v2116_v30 = vld [vmem:[#allocation2 + $0xf0] sm:$0xff] }
 0x224   : > { %v2098_v33 = vmul.f32 %v2095_v24, %v2095_v24  ;;  %v2112_v45 = vld [vmem:[#allocation2 + $0x8] sm:$0xff]  ;;  %v2117_v50 = vld [vmem:[#allocation2 + $0x70] sm:$0xff]  ;;  %v2118_v59 = vld [vmem:[#allocation2 + $0x120] sm:$0xff] }
 0x225   : > { %v2114_v23 = vld [vmem:[#allocation2 + $0x28] sm:$0xff]  ;;  %v2119_v63 = vld [vmem:[#allocation2 + $0xd8] sm:$0xff]  ;;  %v2123_v36 = vld [vmem:[#allocation2 + $0x220] sm:$0xff] }
 0x226   : > { %v2099_v9 = vsub.f32 %v2097_v19, %v2098_v33  ;;  %v2115_v62 = vld [vmem:[#allocation2 + $0xe8] sm:$0xff]  ;;  %v2121_v16 = vld [vmem:[#allocation2 + $0x158] sm:$0xff]  ;;  %v2124_v60 = vld [vmem:[#allocation2 + $0xc0] sm:$0xff] }
 0x227   : > { %v2120_v15 = vld [vmem:[#allocation2 + $0x148] sm:$0xff]  ;;  %v2125_v14 = vld [vmem:[#allocation2 + $0x140] sm:$0xff] }
 0x228   : > { %v2100_v21 = vmax.f32 %v2099_v9, 0.0  ;;  %v2122_v52 = vld [vmem:[#allocation2 + $0x108] sm:$0xff]  ;;  %v2126_v18 = vld [vmem:[#allocation2 + $0x200] sm:$0xff] }
 0x22a   : > { %v2102_v28 = vadd.f32 1e-05, %v2100_v21 }
 0x22c   : > { %3800 = vrsqrt.f32 %v2102_v28 }
 0x239   : > { %v3801_v31 = vpop.eup %3800 }
 0x23a   : > { %v2104_v39 = vmul.f32 %v3801_v31, %v2101_v44 }
 0x23c   : > { %2105 = vst [vmem:[#allocation5] sm:$0x1] %v2104_v39  ;;  %v2107_v38 = vmul.f32 %v2104_v39, %v2095_v24 }
 0x23e   : > { %v2108_v3 = vsub.f32 %v2106_v57, %v2107_v38 }
 0x240   : > { %2109 = vst [vmem:[#allocation6] sm:$0x1] %v2108_v3 }
 0x243   : > { %v4683_v5 = vld [vmem:[#allocation5] ss:$0 sm:$0xff] }
 0x244   : > { %v2199_v27 = vmul.f32 %v4683_v5, %v2111_v7  ;;  %v2200_v26 = vmul.f32 %v4683_v5, %v2112_v45  ;;  %v2201_v12 = vmul.f32 %v4683_v5, %v2113_v49  ;;  %v2202_v11 = vmul.f32 %v4683_v5, %v2114_v23 }
 0x245   : > { %v2203_v29 = vmul.f32 %v4683_v5, %v2115_v62  ;;  %v2204_v53 = vmul.f32 %v4683_v5, %v2116_v30  ;;  %v2205_v51 = vmul.f32 %v4683_v5, %v2117_v50  ;;  %v2206_v4 = vmul.f32 %v4683_v5, %v2118_v59 }
 0x246   : > { %v2207_v25 = vmul.f32 %v4683_v5, %v2119_v63  ;;  %v2208_v40 = vmul.f32 %v4683_v5, %v2120_v15  ;;  %v2209_v17 = vmul.f32 %v4683_v5, %v2121_v16  ;;  %v2210_v34 = vmul.f32 %v4683_v5, %v2122_v52 }
 0x247   : > { %v4697_v32 = vld [vmem:[#allocation6] ss:$0 sm:$0xff]  ;;  %v2211_v2 = vmul.f32 %v4683_v5, %v2123_v36  ;;  %v2212_v54 = vmul.f32 %v4683_v5, %v2124_v60  ;;  %v2213_v46 = vmul.f32 %v4683_v5, %v2125_v14  ;;  %v4703_v41 = vmul.f32 %v4683_v5, %v2126_v18 }
 0x248   : > { %v2287_v37 = vadd.f32 %v4697_v32, %v2199_v27  ;;  %v2288_v43 = vadd.f32 %v4697_v32, %v2200_v26  ;;  %v2289_v47 = vadd.f32 %v4697_v32, %v2201_v12  ;;  %v2290_v48 = vadd.f32 %v4697_v32, %v2202_v11  ;;  %v2127_v26 = vld [vmem:[#allocation2 + $0x80] sm:$0xff]  ;;  %v2128_v12 = vld [vmem:[#allocation2 + $0x30] sm:$0xff] }
 0x249   : > { %v2291_v56 = vadd.f32 %v4697_v32, %v2203_v29  ;;  %v2292_v6 = vadd.f32 %v4697_v32, %v2204_v53  ;;  %v2293_v20 = vadd.f32 %v4697_v32, %v2205_v51  ;;  %v2294_v55 = vadd.f32 %v4697_v32, %v2206_v4  ;;  %v2129_v11 = vld [vmem:[#allocation2 + $0x10] sm:$0xff]  ;;  %v2130_v51 = vld [vmem:[#allocation2 + $0x160] sm:$0xff] }
 0x24a   : > { %vm2368_vm1 = vcmp.ge.f32.partialorder %v2287_v37, 0.0  ;;  %vm2369_vm2 = vcmp.ge.f32.partialorder %v2288_v43, 0.0  ;;  %v2449_v8 = vmul.f32 0.2, %v2287_v37  ;;  %v2450_v1 = vmul.f32 0.2, %v2288_v43 }
 0x24b   : > { %vm2370_vm3 = vcmp.ge.f32.partialorder %v2289_v47, 0.0  ;;  %vm2371_vm4 = vcmp.ge.f32.partialorder %v2290_v48, 0.0  ;;  %v2451_v0 = vmul.f32 0.2, %v2289_v47  ;;  %v2452_v35 = vmul.f32 0.2, %v2290_v48 }
 0x24c   : > { %v2530_v42 = vsel %vm2368_vm1, %v2287_v37, %v2449_v8  ;;  %v2531_v13 = vsel %vm2369_vm2, %v2288_v43, %v2450_v1  ;;  %vm2372_vm5 = vcmp.ge.f32.partialorder %v2291_v56, 0.0  ;;  %vm2373_vm6 = vcmp.ge.f32.partialorder %v2292_v6, 0.0  ;;  %v2133_v8 = vld [vmem:[#allocation2 + $0x248] sm:$0xff] }
 0x24d   : > { %v3368_v10 = vpack.c.bf16 %v2531_v13, %v2530_v42  ;;  %v2532_v58 = vsel %vm2370_vm3, %v2289_v47, %v2451_v0  ;;  %v2533_v61 = vsel %vm2371_vm4, %v2290_v48, %v2452_v35  ;;  %v2453_v22 = vmul.f32 0.2, %v2291_v56 }
 0x24e   : > { %v3373_v24 = vpack.c.bf16 %v2533_v61, %v2532_v58  ;;  %v2454_v19 = vmul.f32 0.2, %v2292_v6  ;;  %vm2374_vm7 = vcmp.ge.f32.partialorder %v2293_v20, 0.0  ;;  %vm2375_vm8 = vcmp.ge.f32.partialorder %v2294_v55, 0.0 }
 0x24f   : > { %3369 = vst [vmem:[%s4982_s5] sm:$0xff] %v3368_v10   ;;  %v2534_v33 = vsel %vm2372_vm5, %v2291_v56, %v2453_v22  ;;  %v2455_v9 = vmul.f32 0.2, %v2293_v20  ;;  %v2456_v21 = vmul.f32 0.2, %v2294_v55  ;;  %v2295_v28 = vadd.f32 %v4697_v32, %v2207_v25  ;;  %v2134_v22 = vld [vmem:[#allocation2 + $0x218] sm:$0xff] }
 0x250   : > { %3565 = vst [vmem:[%s4982_s5 + $0x8] sm:$0xff] %v3373_v24   ;;  %v2535_v44 = vsel %vm2373_vm6, %v2292_v6, %v2454_v19  ;;  %v2296_v31 = vadd.f32 %v4697_v32, %v2208_v40  ;;  %v2297_v39 = vadd.f32 %v4697_v32, %v2209_v17  ;;  %v2298_v57 = vadd.f32 %v4697_v32, %v2210_v34  ;;  %v2131_v34 = vld [vmem:[#allocation2 + $0x1d8] sm:$0xff] }
 0x251   : > { %v3378_v38 = vpack.c.bf16 %v2535_v44, %v2534_v33  ;;  %v2536_v3 = vsel %vm2374_vm7, %v2293_v20, %v2455_v9  ;;  %v2537_v7 = vsel %vm2375_vm8, %v2294_v55, %v2456_v21  ;;  %vm2376_vm9 = vcmp.ge.f32.partialorder %v2295_v28, 0.0  ;;  %v2135_v21 = vld [vmem:[#allocation2 + $0x190] sm:$0xff] }
 0x252   : > { %v3383_v45 = vpack.c.bf16 %v2537_v7, %v2536_v3  ;;  %vm2377_vm10 = vcmp.ge.f32.partialorder %v2296_v31, 0.0  ;;  %v2457_v49 = vmul.f32 0.2, %v2295_v28  ;;  %v2458_v23 = vmul.f32 0.2, %v2296_v31  ;;  %v2137_v7 = vld [vmem:[#allocation2 + $0x68] sm:$0xff] }
 0x253   : > { %3566 = vst [vmem:[%s4982_s5 + $0x10] sm:$0xff] %v3378_v38   ;;  %vm2378_vm11 = vcmp.ge.f32.partialorder %v2297_v39, 0.0  ;;  %vm2379_vm12 = vcmp.ge.f32.partialorder %v2298_v57, 0.0  ;;  %v2459_v62 = vmul.f32 0.2, %v2297_v39  ;;  %v2299_v63 = vadd.f32 %v4697_v32, %v2211_v2  ;;  %v2132_v2 = vld [vmem:[#allocation2 + $0x1a0] sm:$0xff] }
 0x254   : > { %v2460_v30 = vmul.f32 0.2, %v2298_v57  ;;  %3567 = vst [vmem:[%s4982_s5 + $0x18] sm:$0xff] %v3383_v45   ;;  %v2538_v50 = vsel %vm2376_vm9, %v2295_v28, %v2457_v49  ;;  %v2539_v59 = vsel %vm2377_vm10, %v2296_v31, %v2458_v23  ;;  %v2300_v15 = vadd.f32 %v4697_v32, %v2212_v54  ;;  %v2136_v28 = vld [vmem:[#allocation2 + $0x48] sm:$0xff] }
 0x255   : > { %v3388_v16 = vpack.c.bf16 %v2539_v59, %v2538_v50  ;;  %v2540_v52 = vsel %vm2378_vm11, %v2297_v39, %v2459_v62  ;;  %v2301_v27 = vadd.f32 %v4697_v32, %v2213_v46  ;;  %vm2380_vm13 = vcmp.ge.f32.partialorder %v2299_v63, 0.0 }
 0x256   : > { %v2541_v36 = vsel %vm2379_vm12, %v2298_v57, %v2460_v30  ;;  %vm2381_vm14 = vcmp.ge.f32.partialorder %v2300_v15, 0.0  ;;  %v2461_v14 = vmul.f32 0.2, %v2299_v63  ;;  %v2462_v18 = vmul.f32 0.2, %v2300_v15  ;;  %v2138_v30 = vld [vmem:[#allocation2 + $0x238] sm:$0xff] }
 0x257   : > { %v3393_v60 = vpack.c.bf16 %v2541_v36, %v2540_v52  ;;  %3568 = vst [vmem:[%s4982_s5 + $0x20] sm:$0xff] %v3388_v16   ;;  %v2302_v29 = vadd.f32 %v4697_v32, %v4703_v41  ;;  %vm2382_vm15 = vcmp.ge.f32.partialorder %v2301_v27, 0.0  ;;  %v2463_v53 = vmul.f32 0.2, %v2301_v27 }
 0x258   : > { %v2542_v4 = vsel %vm2380_vm13, %v2299_v63, %v2461_v14  ;;  %v2215_v25 = vmul.f32 %v4683_v5, %v2127_v26  ;;  %v2216_v40 = vmul.f32 %v4683_v5, %v2128_v12  ;;  %v2217_v17 = vmul.f32 %v4683_v5, %v2129_v11 }
 0x259   : > { %3569 = vst [vmem:[%s4982_s5 + $0x28] sm:$0xff] %v3393_v60   ;;  %v2543_v54 = vsel %vm2381_vm14, %v2300_v15, %v2462_v18  ;;  %vm2383_vm0 = vcmp.ge.f32.partialorder %v2302_v29, 0.0  ;;  %v2464_v46 = vmul.f32 0.2, %v2302_v29  ;;  %v2544_v41 = vsel %vm2382_vm15, %v2301_v27, %v2463_v53  ;;  %v2139_v27 = vld [vmem:[#allocation2 + $0x188] sm:$0xff]  ;;  %v2140_v60 = vld [vmem:[#allocation2 + $0x250] sm:$0xff] }
 0x25a   : > { %v3398_v37 = vpack.c.bf16 %v2543_v54, %v2542_v4  ;;  %v2303_v43 = vadd.f32 %v4697_v32, %v2215_v25  ;;  %v2304_v47 = vadd.f32 %v4697_v32, %v2216_v40  ;;  %v2218_v48 = vmul.f32 %v4683_v5, %v2130_v51  ;;  %v2141_v25 = vld [vmem:[#allocation2 + $0xb8] sm:$0xff]  ;;  %v2142_v54 = vld [vmem:[#allocation2 + $0x268] sm:$0xff] }
 0x25b   : > { %v2545_v56 = vsel %vm2383_vm0, %v2302_v29, %v2464_v46  ;;  %v2305_v6 = vadd.f32 %v4697_v32, %v2217_v17  ;;  %v2219_v20 = vmul.f32 %v4683_v5, %v2131_v34  ;;  %v2220_v55 = vmul.f32 %v4683_v5, %v2132_v2  ;;  %v2143_v46 = vld [vmem:[#allocation2 + $0xf8] sm:$0xff] }
 0x25c   : > { %3570 = vst [vmem:[%s4982_s5 + $0x30] sm:$0xff] %v3398_v37   ;;  %v3403_v1 = vpack.c.bf16 %v2545_v56, %v2544_v41  ;;  %vm2384_vm1 = vcmp.ge.f32.partialorder %v2303_v43, 0.0  ;;  %vm2385_vm2 = vcmp.ge.f32.partialorder %v2304_v47, 0.0  ;;  %v2465_v0 = vmul.f32 0.2, %v2303_v43  ;;  %v2144_v41 = vld [vmem:[#allocation2 + $0x98] sm:$0xff] }
 0x25d   : > { %v2466_v35 = vmul.f32 0.2, %v2304_v47  ;;  %v2306_v42 = vadd.f32 %v4697_v32, %v2218_v48  ;;  %vm2386_vm3 = vcmp.ge.f32.partialorder %v2305_v6, 0.0  ;;  %v2467_v13 = vmul.f32 0.2, %v2305_v6 }
 0x25e   : > { %3571 = vst [vmem:[%s4982_s5 + $0x38] sm:$0xff] %v3403_v1   ;;  %v2546_v10 = vsel %vm2384_vm1, %v2303_v43, %v2465_v0  ;;  %v2307_v58 = vadd.f32 %v4697_v32, %v2219_v20  ;;  %v2308_v61 = vadd.f32 %v4697_v32, %v2220_v55  ;;  %v2221_v24 = vmul.f32 %v4683_v5, %v2133_v8  ;;  %v2145_v0 = vld [vmem:[#allocation2 + $0xe0] sm:$0xff] }
 0x25f   : > { %v2547_v19 = vsel %vm2385_vm2, %v2304_v47, %v2466_v35  ;;  %vm2387_vm4 = vcmp.ge.f32.partialorder %v2306_v42, 0.0  ;;  %v2468_v33 = vmul.f32 0.2, %v2306_v42  ;;  %v2548_v9 = vsel %vm2386_vm3, %v2305_v6, %v2467_v13 }
 0x260   : > { %v3408_v44 = vpack.c.bf16 %v2547_v19, %v2546_v10  ;;  %vm2388_vm5 = vcmp.ge.f32.partialorder %v2307_v58, 0.0  ;;  %vm2389_vm6 = vcmp.ge.f32.partialorder %v2308_v61, 0.0  ;;  %v2469_v31 = vmul.f32 0.2, %v2307_v58 }
 0x261   : > { %v2549_v39 = vsel %vm2387_vm4, %v2306_v42, %v2468_v33  ;;  %v2470_v57 = vmul.f32 0.2, %v2308_v61  ;;  %v2222_v38 = vmul.f32 %v4683_v5, %v2134_v22  ;;  %v2309_v3 = vadd.f32 %v4697_v32, %v2221_v24  ;;  %v2146_v33 = vld [vmem:[#allocation2 + $0x198] sm:$0xff] }
 0x262   : > { %3572 = vst [vmem:[%s4982_s5 + $0x40] sm:$0xff] %v3408_v44   ;;  %v3413_v45 = vpack.c.bf16 %v2549_v39, %v2548_v9  ;;  %v2550_v49 = vsel %vm2388_vm5, %v2307_v58, %v2469_v31  ;;  %v2223_v23 = vmul.f32 %v4683_v5, %v2135_v21  ;;  %v2224_v62 = vmul.f32 %v4683_v5, %v2136_v28  ;;  %v2147_v44 = vld [vmem:[#allocation2 + $0x1d0] sm:$0xff]  ;;  %v2148_v31 = vld [vmem:[#allocation2 + $0x1e0] sm:$0xff] }
 0x263   : > { %v2551_v50 = vsel %vm2389_vm6, %v2308_v61, %v2470_v57  ;;  %v2310_v59 = vadd.f32 %v4697_v32, %v2222_v38  ;;  %vm2390_vm7 = vcmp.ge.f32.partialorder %v2309_v3, 0.0  ;;  %v2471_v63 = vmul.f32 0.2, %v2309_v3 }
 0x264   : > { %3573 = vst [vmem:[%s4982_s5 + $0x48] sm:$0xff] %v3413_v45   ;;  %v3418_v15 = vpack.c.bf16 %v2551_v50, %v2550_v49  ;;  %v2311_v16 = vadd.f32 %v4697_v32, %v2223_v23  ;;  %v2312_v52 = vadd.f32 %v4697_v32, %v2224_v62  ;;  %v2225_v36 = vmul.f32 %v4683_v5, %v2137_v7  ;;  %v2149_v50 = vld [vmem:[#allocation2 + $0x1a8] sm:$0xff] }
 0x265   : > { %vm2391_vm8 = vcmp.ge.f32.partialorder %v2310_v59, 0.0  ;;  %v2472_v26 = vmul.f32 0.2, %v2310_v59  ;;  %v2552_v12 = vsel %vm2390_vm7, %v2309_v3, %v2471_v63  ;;  %v2226_v11 = vmul.f32 %v4683_v5, %v2138_v30 }
 0x266   : > { %3574 = vst [vmem:[%s4982_s5 + $0x50] sm:$0xff] %v3418_v15   ;;  %vm2392_vm9 = vcmp.ge.f32.partialorder %v2311_v16, 0.0  ;;  %vm2393_vm10 = vcmp.ge.f32.partialorder %v2312_v52, 0.0  ;;  %v2473_v14 = vmul.f32 0.2, %v2311_v16  ;;  %v2313_v53 = vadd.f32 %v4697_v32, %v2225_v36 }
 0x267   : > { %v2474_v18 = vmul.f32 0.2, %v2312_v52  ;;  %v2553_v29 = vsel %vm2391_vm8, %v2310_v59, %v2472_v26  ;;  %v2314_v51 = vadd.f32 %v4697_v32, %v2226_v11  ;;  %v2227_v4 = vmul.f32 %v4683_v5, %v2139_v27 }
 0x268   : > { %v3423_v40 = vpack.c.bf16 %v2553_v29, %v2552_v12  ;;  %v2554_v17 = vsel %vm2392_vm9, %v2311_v16, %v2473_v14  ;;  %v2228_v2 = vmul.f32 %v4683_v5, %v2140_v60  ;;  %vm2394_vm11 = vcmp.ge.f32.partialorder %v2313_v53, 0.0  ;;  %v2151_v14 = vld [vmem:[#allocation2] sm:$0xff] }
 0x269   : > { %v2555_v34 = vsel %vm2393_vm10, %v2312_v52, %v2474_v18  ;;  %vm2395_vm12 = vcmp.ge.f32.partialorder %v2314_v51, 0.0  ;;  %v2475_v43 = vmul.f32 0.2, %v2313_v53  ;;  %v2476_v47 = vmul.f32 0.2, %v2314_v51  ;;  %v2150_v52 = vld [vmem:[#allocation2 + $0x228] sm:$0xff] }
 0x26a   : > { %v3428_v37 = vpack.c.bf16 %v2555_v34, %v2554_v17  ;;  %3575 = vst [vmem:[%s4982_s5 + $0x58] sm:$0xff] %v3423_v40   ;;  %v2315_v48 = vadd.f32 %v4697_v32, %v2227_v4  ;;  %v2316_v56 = vadd.f32 %v4697_v32, %v2228_v2  ;;  %v2229_v6 = vmul.f32 %v4683_v5, %v2141_v25 }
 0x26b   : > { %v2556_v20 = vsel %vm2394_vm11, %v2313_v53, %v2475_v43  ;;  %v2230_v55 = vmul.f32 %v4683_v5, %v2142_v54  ;;  %v2231_v8 = vmul.f32 %v4683_v5, %v2143_v46  ;;  %v2232_v1 = vmul.f32 %v4683_v5, %v2144_v41  ;;  %v2153_v46 = vld [vmem:[#allocation2 + $0x90] sm:$0xff] }
 0x26c   : > { %3576 = vst [vmem:[%s4982_s5 + $0x60] sm:$0xff] %v3428_v37   ;;  %v2557_v35 = vsel %vm2395_vm12, %v2314_v51, %v2476_v47  ;;  %vm2396_vm13 = vcmp.ge.f32.partialorder %v2315_v48, 0.0  ;;  %vm2397_vm14 = vcmp.ge.f32.partialorder %v2316_v56, 0.0  ;;  %v2477_v42 = vmul.f32 0.2, %v2315_v48  ;;  %v2152_v51 = vld [vmem:[#allocation2 + $0x1b0] sm:$0xff] }
 0x26d   : > { %v3433_v13 = vpack.c.bf16 %v2557_v35, %v2556_v20  ;;  %v2478_v10 = vmul.f32 0.2, %v2316_v56  ;;  %v2317_v58 = vadd.f32 %v4697_v32, %v2229_v6  ;;  %v2318_v61 = vadd.f32 %v4697_v32, %v2230_v55  ;;  %v2154_v41 = vld [vmem:[#allocation2 + $0x270] sm:$0xff]  ;;  %v2156_v35 = vld [vmem:[#allocation2 + $0x38] sm:$0xff] }
 0x26e   : > { %v2558_v22 = vsel %vm2396_vm13, %v2315_v48, %v2477_v42  ;;  %v2319_v24 = vadd.f32 %v4697_v32, %v2231_v8  ;;  %v2320_v19 = vadd.f32 %v4697_v32, %v2232_v1  ;;  %v2233_v9 = vmul.f32 %v4683_v5, %v2145_v0  ;;  %v2155_v48 = vld [vmem:[#allocation2 + $0x1e8] sm:$0xff] }
 0x26f   : > { %3577 = vst [vmem:[%s4982_s5 + $0x68] sm:$0xff] %v3433_v13   ;;  %v2559_v21 = vsel %vm2397_vm14, %v2316_v56, %v2478_v10  ;;  %vm2398_vm15 = vcmp.ge.f32.partialorder %v2317_v58, 0.0  ;;  %vm2399_vm0 = vcmp.ge.f32.partialorder %v2318_v61, 0.0  ;;  %v2479_v28 = vmul.f32 0.2, %v2317_v58 }
 0x270   : > { %v3438_v39 = vpack.c.bf16 %v2559_v21, %v2558_v22  ;;  %v2480_v57 = vmul.f32 0.2, %v2318_v61  ;;  %vm2400_vm1 = vcmp.ge.f32.partialorder %v2319_v24, 0.0  ;;  %vm2401_vm2 = vcmp.ge.f32.partialorder %v2320_v19, 0.0 }
 0x271   : > { %v2560_v38 = vsel %vm2398_vm15, %v2317_v58, %v2479_v28  ;;  %v2481_v3 = vmul.f32 0.2, %v2319_v24  ;;  %v2482_v7 = vmul.f32 0.2, %v2320_v19  ;;  %v2234_v45 = vmul.f32 %v4683_v5, %v2146_v33  ;;  %v2157_v58 = vld [vmem:[#allocation2 + $0x1c8] sm:$0xff]  ;;  %v2158_v28 = vld [vmem:[#allocation2 + $0x18] sm:$0xff] }
 0x272   : > { %3578 = vst [vmem:[%s4982_s5 + $0x70] sm:$0xff] %v3438_v39   ;;  %v2561_v49 = vsel %vm2399_vm0, %v2318_v61, %v2480_v57  ;;  %v2321_v23 = vadd.f32 %v4697_v32, %v2233_v9  ;;  %v2235_v62 = vmul.f32 %v4683_v5, %v2147_v44  ;;  %v2236_v30 = vmul.f32 %v4683_v5, %v2148_v31 }
 0x273   : > { %v3443_v59 = vpack.c.bf16 %v2561_v49, %v2560_v38  ;;  %v2562_v63 = vsel %vm2400_vm1, %v2319_v24, %v2481_v3  ;;  %v2563_v15 = vsel %vm2401_vm2, %v2320_v19, %v2482_v7  ;;  %v2322_v16 = vadd.f32 %v4697_v32, %v2234_v45  ;;  %v2159_v7 = vld [vmem:[#allocation2 + $0x58] sm:$0xff] }
 0x274   : > { %v3448_v36 = vpack.c.bf16 %v2563_v15, %v2562_v63  ;;  %vm2402_vm3 = vcmp.ge.f32.partialorder %v2321_v23, 0.0  ;;  %v2483_v27 = vmul.f32 0.2, %v2321_v23  ;;  %v2323_v26 = vadd.f32 %v4697_v32, %v2235_v62  ;;  %v2160_v62 = vld [vmem:[#allocation2 + $0x168] sm:$0xff] }
 0x275   : > { %3579 = vst [vmem:[%s4982_s5 + $0x78] sm:$0xff] %v3443_v59   ;;  %vm2403_vm4 = vcmp.ge.f32.partialorder %v2322_v16, 0.0  ;;  %v2484_v12 = vmul.f32 0.2, %v2322_v16  ;;  %v2324_v11 = vadd.f32 %v4697_v32, %v2236_v30  ;;  %v2237_v60 = vmul.f32 %v4683_v5, %v2149_v50 }
 0x276   : > { %3580 = vst [vmem:[%s4982_s5 + $0x80] sm:$0xff] %v3448_v36   ;;  %v2564_v18 = vsel %vm2402_vm3, %v2321_v23, %v2483_v27  ;;  %vm2404_vm5 = vcmp.ge.f32.partialorder %v2323_v26, 0.0  ;;  %v2485_v29 = vmul.f32 0.2, %v2323_v26  ;;  %v2238_v53 = vmul.f32 %v4683_v5, %v2150_v52  ;;  %v2161_v36 = vld [vmem:[#allocation2 + $0x280] sm:$0xff]  ;;  %v2162_v27 = vld [vmem:[#allocation2 + $0x1f8] sm:$0xff] }
 0x277   : > { %v2565_v4 = vsel %vm2403_vm4, %v2322_v16, %v2484_v12  ;;  %vm2405_vm6 = vcmp.ge.f32.partialorder %v2324_v11, 0.0  ;;  %v2486_v25 = vmul.f32 0.2, %v2324_v11  ;;  %v2325_v40 = vadd.f32 %v4697_v32, %v2237_v60  ;;  %v2163_v60 = vld [vmem:[#allocation2 + $0x180] sm:$0xff] }
 0x278   : > { %v3453_v17 = vpack.c.bf16 %v2565_v4, %v2564_v18  ;;  %v2566_v34 = vsel %vm2404_vm5, %v2323_v26, %v2485_v29  ;;  %v2326_v2 = vadd.f32 %v4697_v32, %v2238_v53  ;;  %v2239_v54 = vmul.f32 %v4683_v5, %v2151_v14 }
 0x279   : > { %v2567_v37 = vsel %vm2405_vm6, %v2324_v11, %v2486_v25  ;;  %vm2406_vm7 = vcmp.ge.f32.partialorder %v2325_v40, 0.0  ;;  %v2487_v43 = vmul.f32 0.2, %v2325_v40  ;;  %v2240_v47 = vmul.f32 %v4683_v5, %v2152_v51 }
 0x27a   : > { %3581 = vst [vmem:[%s4982_s5 + $0x88] sm:$0xff] %v3453_v17   ;;  %v3458_v56 = vpack.c.bf16 %v2567_v37, %v2566_v34  ;;  %vm2407_vm8 = vcmp.ge.f32.partialorder %v2326_v2, 0.0  ;;  %v2488_v6 = vmul.f32 0.2, %v2326_v2  ;;  %v2327_v20 = vadd.f32 %v4697_v32, %v2239_v54  ;;  %v2165_v54 = vld [vmem:[#allocation2 + $0x260] sm:$0xff] }
 0x27b   : > { %v2568_v55 = vsel %vm2406_vm7, %v2325_v40, %v2487_v43  ;;  %v2328_v8 = vadd.f32 %v4697_v32, %v2240_v47  ;;  %v2241_v1 = vmul.f32 %v4683_v5, %v2153_v46  ;;  %v2242_v0 = vmul.f32 %v4683_v5, %v2154_v41  ;;  %v2164_v40 = vld [vmem:[#allocation2 + $0x258] sm:$0xff] }
 0x27c   : > { %3582 = vst [vmem:[%s4982_s5 + $0x90] sm:$0xff] %v3458_v56   ;;  %v2569_v42 = vsel %vm2407_vm8, %v2326_v2, %v2488_v6  ;;  %vm2408_vm9 = vcmp.ge.f32.partialorder %v2327_v20, 0.0  ;;  %v2489_v13 = vmul.f32 0.2, %v2327_v20  ;;  %v2243_v10 = vmul.f32 %v4683_v5, %v2155_v48  ;;  %v2166_v6 = vld [vmem:[#allocation2 + $0x100] sm:$0xff] }
 0x27d   : > { %v3463_v61 = vpack.c.bf16 %v2569_v42, %v2568_v55  ;;  %vm2409_vm10 = vcmp.ge.f32.partialorder %v2328_v8, 0.0  ;;  %v2490_v22 = vmul.f32 0.2, %v2328_v8  ;;  %v2329_v24 = vadd.f32 %v4697_v32, %v2241_v1  ;;  %v2167_v42 = vld [vmem:[#allocation2 + $0x1b8] sm:$0xff] }
 0x27e   : > { %v2570_v19 = vsel %vm2408_vm9, %v2327_v20, %v2489_v13  ;;  %v2330_v33 = vadd.f32 %v4697_v32, %v2242_v0  ;;  %v2244_v9 = vmul.f32 %v4683_v5, %v2156_v35  ;;  %v2331_v21 = vadd.f32 %v4697_v32, %v2243_v10 }
 0x27f   : > { %3583 = vst [vmem:[%s4982_s5 + $0x98] sm:$0xff] %v3463_v61   ;;  %v2571_v44 = vsel %vm2409_vm10, %v2328_v8, %v2490_v22  ;;  %vm2410_vm11 = vcmp.ge.f32.partialorder %v2329_v24, 0.0  ;;  %v2491_v31 = vmul.f32 0.2, %v2329_v24  ;;  %v2245_v39 = vmul.f32 %v4683_v5, %v2157_v58  ;;  %v2168_v61 = vld [vmem:[#allocation2 + $0x110] sm:$0xff] }
 0x280   : > { %v3468_v57 = vpack.c.bf16 %v2571_v44, %v2570_v19  ;;  %vm2411_vm12 = vcmp.ge.f32.partialorder %v2330_v33, 0.0  ;;  %v2492_v38 = vmul.f32 0.2, %v2330_v33  ;;  %v2332_v3 = vadd.f32 %v4697_v32, %v2244_v9  ;;  %v2169_v44 = vld [vmem:[#allocation2 + $0xa0] sm:$0xff] }
 0x281   : > { %v2572_v45 = vsel %vm2410_vm11, %v2329_v24, %v2491_v31  ;;  %vm2412_vm13 = vcmp.ge.f32.partialorder %v2331_v21, 0.0  ;;  %v2493_v49 = vmul.f32 0.2, %v2331_v21  ;;  %v2246_v23 = vmul.f32 %v4683_v5, %v2158_v28  ;;  %v2170_v31 = vld [vmem:[#allocation2 + $0x278] sm:$0xff] }
 0x282   : > { %3584 = vst [vmem:[%s4982_s5 + $0xa0] sm:$0xff] %v3468_v57   ;;  %v2573_v30 = vsel %vm2411_vm12, %v2330_v33, %v2492_v38  ;;  %vm2413_vm14 = vcmp.ge.f32.partialorder %v2332_v3, 0.0  ;;  %v2494_v50 = vmul.f32 0.2, %v2332_v3  ;;  %v2333_v59 = vadd.f32 %v4697_v32, %v2245_v39 }
 0x283   : > { %v3473_v63 = vpack.c.bf16 %v2573_v30, %v2572_v45  ;;  %v2574_v15 = vsel %vm2412_vm13, %v2331_v21, %v2493_v49  ;;  %v2334_v16 = vadd.f32 %v4697_v32, %v2246_v23  ;;  %v2247_v52 = vmul.f32 %v4683_v5, %v2159_v7 }
 0x284   : > { %v2575_v26 = vsel %vm2413_vm14, %v2332_v3, %v2494_v50  ;;  %vm2414_vm15 = vcmp.ge.f32.partialorder %v2333_v59, 0.0  ;;  %v2495_v12 = vmul.f32 0.2, %v2333_v59  ;;  %v2248_v11 = vmul.f32 %v4683_v5, %v2160_v62  ;;  %v2171_v3 = vld [vmem:[#allocation2 + $0x210] sm:$0xff] }
 0x285   : > { %3585 = vst [vmem:[%s4982_s5 + $0xa8] sm:$0xff] %v3473_v63   ;;  %v3478_v14 = vpack.c.bf16 %v2575_v26, %v2574_v15  ;;  %vm2415_vm0 = vcmp.ge.f32.partialorder %v2334_v16, 0.0  ;;  %v2496_v18 = vmul.f32 0.2, %v2334_v16  ;;  %v2335_v29 = vadd.f32 %v4697_v32, %v2247_v52  ;;  %v2173_v52 = vld [vmem:[#allocation2 + $0x130] sm:$0xff] }
 0x286   : > { %v2576_v53 = vsel %vm2414_vm15, %v2333_v59, %v2495_v12  ;;  %v2336_v51 = vadd.f32 %v4697_v32, %v2248_v11  ;;  %v2249_v4 = vmul.f32 %v4683_v5, %v2161_v36  ;;  %v2250_v25 = vmul.f32 %v4683_v5, %v2162_v27  ;;  %v2172_v59 = vld [vmem:[#allocation2 + $0x78] sm:$0xff] }
 0x287   : > { %3586 = vst [vmem:[%s4982_s5 + $0xb0] sm:$0xff] %v3478_v14   ;;  %v2577_v17 = vsel %vm2415_vm0, %v2334_v16, %v2496_v18  ;;  %vm2416_vm1 = vcmp.ge.f32.partialorder %v2335_v29, 0.0  ;;  %v2497_v34 = vmul.f32 0.2, %v2335_v29  ;;  %v2251_v2 = vmul.f32 %v4683_v5, %v2163_v60  ;;  %v2174_v18 = vld [vmem:[#allocation2 + $0x1f0] sm:$0xff] }
 0x288   : > { %v3483_v46 = vpack.c.bf16 %v2577_v17, %v2576_v53  ;;  %vm2417_vm2 = vcmp.ge.f32.partialorder %v2336_v51, 0.0  ;;  %v2498_v41 = vmul.f32 0.2, %v2336_v51  ;;  %v2337_v37 = vadd.f32 %v4697_v32, %v2249_v4  ;;  %v2175_v17 = vld [vmem:[#allocation2 + $0xa8] sm:$0xff] }
 0x289   : > { %v2578_v43 = vsel %vm2416_vm1, %v2335_v29, %v2497_v34  ;;  %v2338_v47 = vadd.f32 %v4697_v32, %v2250_v25  ;;  %v2252_v48 = vmul.f32 %v4683_v5, %v2164_v40  ;;  %v2339_v56 = vadd.f32 %v4697_v32, %v2251_v2 }
 0x28a   : > { %3587 = vst [vmem:[%s4982_s5 + $0xb8] sm:$0xff] %v3483_v46   ;;  %v2579_v20 = vsel %vm2417_vm2, %v2336_v51, %v2498_v41  ;;  %vm2418_vm3 = vcmp.ge.f32.partialorder %v2337_v37, 0.0  ;;  %v2499_v55 = vmul.f32 0.2, %v2337_v37  ;;  %v2253_v8 = vmul.f32 %v4683_v5, %v2165_v54  ;;  %v2176_v46 = vld [vmem:[#allocation2 + $0x60] sm:$0xff] }
 0x28b   : > { %v3488_v1 = vpack.c.bf16 %v2579_v20, %v2578_v43  ;;  %vm2419_vm4 = vcmp.ge.f32.partialorder %v2338_v47, 0.0  ;;  %v2500_v0 = vmul.f32 0.2, %v2338_v47  ;;  %v2340_v35 = vadd.f32 %v4697_v32, %v2252_v48  ;;  %v2177_v20 = vld [vmem:[#allocation2 + $0x138] sm:$0xff] }
 0x28c   : > { %v2580_v13 = vsel %vm2418_vm3, %v2337_v37, %v2499_v55  ;;  %vm2420_vm5 = vcmp.ge.f32.partialorder %v2339_v56, 0.0  ;;  %v2501_v10 = vmul.f32 0.2, %v2339_v56  ;;  %v2254_v58 = vmul.f32 %v4683_v5, %v2166_v6  ;;  %v2178_v55 = vld [vmem:[#allocation2 + $0xd0] sm:$0xff] }
 0x28d   : > { %3588 = vst [vmem:[%s4982_s5 + $0xc0] sm:$0xff] %v3488_v1   ;;  %v2581_v22 = vsel %vm2419_vm4, %v2338_v47, %v2500_v0  ;;  %vm2421_vm6 = vcmp.ge.f32.partialorder %v2340_v35, 0.0  ;;  %v2502_v24 = vmul.f32 0.2, %v2340_v35  ;;  %v2341_v19 = vadd.f32 %v4697_v32, %v2253_v8 }
 0x28e   : > { %v3493_v33 = vpack.c.bf16 %v2581_v22, %v2580_v13  ;;  %v2582_v9 = vsel %vm2420_vm5, %v2339_v56, %v2501_v10  ;;  %v2342_v21 = vadd.f32 %v4697_v32, %v2254_v58  ;;  %v2255_v28 = vmul.f32 %v4683_v5, %v2167_v42 }
 0x28f   : > { %v2583_v39 = vsel %vm2421_vm6, %v2340_v35, %v2502_v24  ;;  %vm2422_vm7 = vcmp.ge.f32.partialorder %v2341_v19, 0.0  ;;  %v2503_v57 = vmul.f32 0.2, %v2341_v19  ;;  %v2256_v38 = vmul.f32 %v4683_v5, %v2168_v61  ;;  %v2179_v35 = vld [vmem:[#allocation2 + $0x128] sm:$0xff] }
 0x290   : > { %3589 = vst [vmem:[%s4982_s5 + $0xc8] sm:$0xff] %v3493_v33   ;;  %v3498_v7 = vpack.c.bf16 %v2583_v39, %v2582_v9  ;;  %vm2423_vm8 = vcmp.ge.f32.partialorder %v2342_v21, 0.0  ;;  %v2504_v45 = vmul.f32 0.2, %v2342_v21  ;;  %v2343_v49 = vadd.f32 %v4697_v32, %v2255_v28  ;;  %v2181_v28 = vld [vmem:[#allocation2 + $0x1c0] sm:$0xff] }
 0x291   : > { %v2584_v23 = vsel %vm2422_vm7, %v2341_v19, %v2503_v57  ;;  %v2344_v62 = vadd.f32 %v4697_v32, %v2256_v38  ;;  %v2257_v30 = vmul.f32 %v4683_v5, %v2169_v44  ;;  %v2258_v50 = vmul.f32 %v4683_v5, %v2170_v31  ;;  %v2180_v19 = vld [vmem:[#allocation2 + $0xb0] sm:$0xff] }
 0x292   : > { %3590 = vst [vmem:[%s4982_s5 + $0xd0] sm:$0xff] %v3498_v7   ;;  %v2585_v63 = vsel %vm2423_vm8, %v2342_v21, %v2504_v45  ;;  %vm2424_vm9 = vcmp.ge.f32.partialorder %v2343_v49, 0.0  ;;  %v2505_v15 = vmul.f32 0.2, %v2343_v49  ;;  %v2259_v16 = vmul.f32 %v4683_v5, %v2171_v3  ;;  %v2182_v45 = vld [vmem:[#allocation2 + $0x88] sm:$0xff] }
 0x293   : > { %v3503_v36 = vpack.c.bf16 %v2585_v63, %v2584_v23  ;;  %vm2425_vm10 = vcmp.ge.f32.partialorder %v2344_v62, 0.0  ;;  %v2506_v27 = vmul.f32 0.2, %v2344_v62  ;;  %v2345_v26 = vadd.f32 %v4697_v32, %v2257_v30  ;;  %v2183_v63 = vld [vmem:[#allocation2 + $0x230] sm:$0xff] }
 0x294   : > { %v2586_v12 = vsel %vm2424_vm9, %v2343_v49, %v2505_v15  ;;  %v2346_v11 = vadd.f32 %v4697_v32, %v2258_v50  ;;  %v2260_v60 = vmul.f32 %v4683_v5, %v2172_v59  ;;  %v2347_v14 = vadd.f32 %v4697_v32, %v2259_v16 }
 0x295   : > { %3591 = vst [vmem:[%s4982_s5 + $0xd8] sm:$0xff] %v3503_v36   ;;  %v2587_v29 = vsel %vm2425_vm10, %v2344_v62, %v2506_v27  ;;  %vm2426_vm11 = vcmp.ge.f32.partialorder %v2345_v26, 0.0  ;;  %v2507_v53 = vmul.f32 0.2, %v2345_v26  ;;  %v2261_v51 = vmul.f32 %v4683_v5, %v2173_v52  ;;  %v2184_v36 = vld [vmem:[#allocation2 + $0x50] sm:$0xff] }
 0x296   : > { %v3508_v4 = vpack.c.bf16 %v2587_v29, %v2586_v12  ;;  %vm2427_vm12 = vcmp.ge.f32.partialorder %v2346_v11, 0.0  ;;  %v2508_v25 = vmul.f32 0.2, %v2346_v11  ;;  %v2348_v40 = vadd.f32 %v4697_v32, %v2260_v60  ;;  %v2185_v29 = vld [vmem:[#allocation2 + $0x150] sm:$0xff] }
 0x297   : > { %v2588_v34 = vsel %vm2426_vm11, %v2345_v26, %v2507_v53  ;;  %vm2428_vm13 = vcmp.ge.f32.partialorder %v2347_v14, 0.0  ;;  %v2509_v2 = vmul.f32 0.2, %v2347_v14  ;;  %v2262_v54 = vmul.f32 %v4683_v5, %v2174_v18  ;;  %v2186_v53 = vld [vmem:[#allocation2 + $0x178] sm:$0xff] }
 0x298   : > { %3592 = vst [vmem:[%s4982_s5 + $0xe0] sm:$0xff] %v3508_v4   ;;  %v2589_v41 = vsel %vm2427_vm12, %v2346_v11, %v2508_v25  ;;  %vm2429_vm14 = vcmp.ge.f32.partialorder %v2348_v40, 0.0  ;;  %v2510_v37 = vmul.f32 0.2, %v2348_v40  ;;  %v2349_v43 = vadd.f32 %v4697_v32, %v2261_v51 }
 0x299   : > { %v3513_v47 = vpack.c.bf16 %v2589_v41, %v2588_v34  ;;  %v2590_v48 = vsel %vm2428_vm13, %v2347_v14, %v2509_v2  ;;  %v2350_v56 = vadd.f32 %v4697_v32, %v2262_v54  ;;  %v2263_v6 = vmul.f32 %v4683_v5, %v2175_v17 }
 0x29a   : > { %v2591_v8 = vsel %vm2429_vm14, %v2348_v40, %v2510_v37  ;;  %vm2430_vm15 = vcmp.ge.f32.partialorder %v2349_v43, 0.0  ;;  %v2511_v1 = vmul.f32 0.2, %v2349_v43  ;;  %v2264_v0 = vmul.f32 %v4683_v5, %v2176_v46  ;;  %v2187_v40 = vld [vmem:[#allocation2 + $0x240] sm:$0xff] }
 0x29b   : > { %3593 = vst [vmem:[%s4982_s5 + $0xe8] sm:$0xff] %v3513_v47   ;;  %v3518_v42 = vpack.c.bf16 %v2591_v8, %v2590_v48  ;;  %vm2431_vm0 = vcmp.ge.f32.partialorder %v2350_v56, 0.0  ;;  %v2512_v13 = vmul.f32 0.2, %v2350_v56  ;;  %v2351_v10 = vadd.f32 %v4697_v32, %v2263_v6  ;;  %v2189_v6 = vld [vmem:[#allocation2 + $0x208] sm:$0xff] }
 0x29c   : > { %v2592_v58 = vsel %vm2430_vm15, %v2349_v43, %v2511_v1  ;;  %v2352_v61 = vadd.f32 %v4697_v32, %v2264_v0  ;;  %v2265_v22 = vmul.f32 %v4683_v5, %v2177_v20  ;;  %v2266_v24 = vmul.f32 %v4683_v5, %v2178_v55  ;;  %v2188_v43 = vld [vmem:[#allocation2 + $0x118] sm:$0xff] }
 0x29d   : > { %3594 = vst [vmem:[%s4982_s5 + $0xf0] sm:$0xff] %v3518_v42   ;;  %v2593_v33 = vsel %vm2431_vm0, %v2350_v56, %v2512_v13  ;;  %vm2432_vm1 = vcmp.ge.f32.partialorder %v2351_v10, 0.0  ;;  %v2513_v9 = vmul.f32 0.2, %v2351_v10  ;;  %v2267_v21 = vmul.f32 %v4683_v5, %v2179_v35  ;;  %v3802_v35 = vld [vmem:[#allocation5] ss:$0 sm:$0xff] }
 0x29e   : > { %v3523_v44 = vpack.c.bf16 %v2593_v33, %v2592_v58  ;;  %vm2433_vm2 = vcmp.ge.f32.partialorder %v2352_v61, 0.0  ;;  %v2514_v31 = vmul.f32 0.2, %v2352_v61  ;;  %v2353_v39 = vadd.f32 %v4697_v32, %v2265_v22  ;;  %v2191_v33 = vld [vmem:[#allocation2 + $0x20] sm:$0xff] }
 0x29f   : > { %v2594_v57 = vsel %vm2432_vm1, %v2351_v10, %v2513_v9  ;;  %v2354_v38 = vadd.f32 %v4697_v32, %v2266_v24  ;;  %v2268_v3 = vmul.f32 %v4683_v5, %v2180_v19  ;;  %v2355_v7 = vadd.f32 %v4697_v32, %v2267_v21  ;;  %v2190_v10 = vld [vmem:[#allocation2 + $0x170] sm:$0xff] }
 0x2a0   : > { %3595 = vst [vmem:[%s4982_s5 + $0xf8] sm:$0xff] %v3523_v44   ;;  %v2595_v49 = vsel %vm2433_vm2, %v2352_v61, %v2514_v31  ;;  %vm2434_vm3 = vcmp.ge.f32.partialorder %v2353_v39, 0.0  ;;  %v2515_v23 = vmul.f32 0.2, %v2353_v39  ;;  %v2269_v62 = vmul.f32 %v4683_v5, %v2181_v28 }
 0x2a1   : > { %v3528_v30 = vpack.c.bf16 %v2595_v49, %v2594_v57  ;;  %vm2435_vm4 = vcmp.ge.f32.partialorder %v2354_v38, 0.0  ;;  %v2516_v50 = vmul.f32 0.2, %v2354_v38  ;;  %v2356_v59 = vadd.f32 %v4697_v32, %v2268_v3 }
 0x2a2   : > { %v2596_v15 = vsel %vm2434_vm3, %v2353_v39, %v2515_v23  ;;  %vm2436_vm5 = vcmp.ge.f32.partialorder %v2355_v7, 0.0  ;;  %v2517_v16 = vmul.f32 0.2, %v2355_v7  ;;  %v2270_v52 = vmul.f32 %v4683_v5, %v2182_v45  ;;  %v3803_v39 = vld [vmem:[#allocation6] ss:$0 sm:$0xff] }
 0x2a3   : > { %3596 = vst [vmem:[%s4982_s5 + $0x100] sm:$0xff] %v3528_v30   ;;  %v2597_v27 = vsel %vm2435_vm4, %v2354_v38, %v2516_v50  ;;  %vm2437_vm6 = vcmp.ge.f32.partialorder %v2356_v59, 0.0  ;;  %v2518_v26 = vmul.f32 0.2, %v2356_v59  ;;  %v2357_v12 = vadd.f32 %v4697_v32, %v2269_v62 }
 0x2a4   : > { %v3533_v11 = vpack.c.bf16 %v2597_v27, %v2596_v15  ;;  %v2598_v60 = vsel %vm2436_vm5, %v2355_v7, %v2517_v16  ;;  %v2358_v14 = vadd.f32 %v4697_v32, %v2270_v52  ;;  %v2271_v18 = vmul.f32 %v4683_v5, %v2183_v63 }
 0x2a5   : > { %v2599_v51 = vsel %vm2437_vm6, %v2356_v59, %v2518_v26  ;;  %vm2438_vm7 = vcmp.ge.f32.partialorder %v2357_v12, 0.0  ;;  %v2519_v4 = vmul.f32 0.2, %v2357_v12  ;;  %v2272_v25 = vmul.f32 %v4683_v5, %v2184_v36 }
 0x2a6   : > { %3597 = vst [vmem:[%s4982_s5 + $0x108] sm:$0xff] %v3533_v11   ;;  %v3538_v17 = vpack.c.bf16 %v2599_v51, %v2598_v60  ;;  %vm2439_vm8 = vcmp.ge.f32.partialorder %v2358_v14, 0.0  ;;  %v2520_v34 = vmul.f32 0.2, %v2358_v14  ;;  %v2359_v2 = vadd.f32 %v4697_v32, %v2271_v18 }
 0x2a7   : > { %v2600_v54 = vsel %vm2438_vm7, %v2357_v12, %v2519_v4  ;;  %v2360_v46 = vadd.f32 %v4697_v32, %v2272_v25  ;;  %v2273_v41 = vmul.f32 %v4683_v5, %v2185_v29  ;;  %v2274_v37 = vmul.f32 %v4683_v5, %v2186_v53 }
 0x2a8   : > { %3598 = vst [vmem:[%s4982_s5 + $0x110] sm:$0xff] %v3538_v17   ;;  %v2601_v47 = vsel %vm2439_vm8, %v2358_v14, %v2520_v34  ;;  %vm2440_vm9 = vcmp.ge.f32.partialorder %v2359_v2, 0.0  ;;  %v2521_v48 = vmul.f32 0.2, %v2359_v2  ;;  %v2275_v56 = vmul.f32 %v4683_v5, %v2187_v40 }
 0x2a9   : > { %v3543_v20 = vpack.c.bf16 %v2601_v47, %v2600_v54  ;;  %vm2441_vm10 = vcmp.ge.f32.partialorder %v2360_v46, 0.0  ;;  %v2522_v55 = vmul.f32 0.2, %v2360_v46  ;;  %v2361_v8 = vadd.f32 %v4697_v32, %v2273_v41 }
 0x2aa   : > { %v2602_v1 = vsel %vm2440_vm9, %v2359_v2, %v2521_v48  ;;  %v2362_v0 = vadd.f32 %v4697_v32, %v2274_v37  ;;  %v2276_v42 = vmul.f32 %v3802_v35, %v2188_v43  ;;  %v2363_v13 = vadd.f32 %v4697_v32, %v2275_v56 }
 0x2ab   : > { %3599 = vst [vmem:[%s4982_s5 + $0x118] sm:$0xff] %v3543_v20   ;;  %v2603_v58 = vsel %vm2441_vm10, %v2360_v46, %v2522_v55  ;;  %vm2442_vm11 = vcmp.ge.f32.partialorder %v2361_v8, 0.0  ;;  %v2523_v5 = vmul.f32 0.2, %v2361_v8  ;;  %v2277_v61 = vmul.f32 %v3802_v35, %v2189_v6 }
 0x2ac   : > { %v3548_v22 = vpack.c.bf16 %v2603_v58, %v2602_v1  ;;  %vm2443_vm12 = vcmp.ge.f32.partialorder %v2362_v0, 0.0  ;;  %v2524_v24 = vmul.f32 0.2, %v2362_v0  ;;  %v2364_v19 = vadd.f32 %v4697_v32, %v2276_v42 }
 0x2ad   : > { %v2604_v9 = vsel %vm2442_vm11, %v2361_v8, %v2523_v5  ;;  %vm2444_vm13 = vcmp.ge.f32.partialorder %v2363_v13, 0.0  ;;  %v2525_v21 = vmul.f32 0.2, %v2363_v13  ;;  %v2278_v28 = vmul.f32 %v3802_v35, %v2190_v10 }
 0x2ae   : > { %3600 = vst [vmem:[%s4982_s5 + $0x120] sm:$0xff] %v3548_v22   ;;  %v2605_v44 = vsel %vm2443_vm12, %v2362_v0, %v2524_v24  ;;  %vm2445_vm14 = vcmp.ge.f32.partialorder %v2364_v19, 0.0  ;;  %v2526_v31 = vmul.f32 0.2, %v2364_v19  ;;  %v2365_v57 = vadd.f32 %v3803_v39, %v2277_v61 }
 0x2af   : > { %v3553_v38 = vpack.c.bf16 %v2605_v44, %v2604_v9  ;;  %v2606_v3 = vsel %vm2444_vm13, %v2363_v13, %v2525_v21  ;;  %v2366_v7 = vadd.f32 %v3803_v39, %v2278_v28  ;;  %v2279_v45 = vmul.f32 %v3802_v35, %v2191_v33 }
 0x2b0   : > { %v2607_v49 = vsel %vm2445_vm14, %v2364_v19, %v2526_v31  ;;  %vm2446_vm15 = vcmp.ge.f32.partialorder %v2365_v57, 0.0  ;;  %v2527_v32 = vmul.f32 0.2, %v2365_v57 }
 0x2b1   : > { %3601 = vst [vmem:[%s4982_s5 + $0x128] sm:$0xff] %v3553_v38   ;;  %v3558_v23 = vpack.c.bf16 %v2607_v49, %v2606_v3  ;;  %vm2447_vm0 = vcmp.ge.f32.partialorder %v2366_v7, 0.0  ;;  %v2528_v62 = vmul.f32 0.2, %v2366_v7  ;;  %v2367_v30 = vadd.f32 %v3803_v39, %v2279_v45 }
 0x2b2   : > { %v2608_v50 = vsel %vm2446_vm15, %v2365_v57, %v2527_v32 }
 0x2b3   : > { %3602 = vst [vmem:[%s4982_s5 + $0x130] sm:$0xff] %v3558_v23   ;;  %v2609_v59 = vsel %vm2447_vm0, %v2366_v7, %v2528_v62  ;;  %vm2448_vm1 = vcmp.ge.f32.partialorder %v2367_v30, 0.0  ;;  %v2529_v63 = vmul.f32 0.2, %v2367_v30 }
 0x2b4   : > { %v3563_v15 = vpack.c.bf16 %v2609_v59, %v2608_v50 }
 0x2b5   : > { %v2610_v16 = vsel %vm2448_vm1, %v2367_v30, %v2529_v63 }
 0x2b6   : > { %3603 = vst [vmem:[%s4982_s5 + $0x138] sm:$0xff] %v3563_v15   ;;  %v3364_v52 = vpack.c.bf16 %v2610_v16, %v2610_v16 }
 0x2b8   : > { %3016 = vst [vmem:[%s4982_s5 + $0x140] sm:$0xf] %v3364_v52 }
 0x2b9 PF: > { %s15_s20 = sadd.s32 1, %s3826_s20   ;;  %s4987_s18 = smov %s3822_s19 }
 0x2ba   : > { %p12_p6 = scmp.ge.s32.totalorder %s15_s20, 4   ;;  %s4988_s19 = smov %s4990_s21 }
 0x2bc   :  { %14 = sbr.rel (!%p12_p6) target bundleno = 2 (0x2), region = 88 }

// kernel: up_block_forward.5
= control target key start
LH: loop header
LB: loop body
LE: loop exit
PB: predicated region body
PF: predicated region fallthrough
CT: control target
= control target key end

     0   :  { %s2979_s18 = smov 0   ;;  %s2981_s19 = smov 0   ;;  %s4145_s0 = inlined_call_operand.vmem [shape: bf16[648,128], index: 0, kind: input, shape index: {}]   ;;  %s4146_s1 = inlined_call_operand.vmem [shape: bf16[128,128], index: 1, kind: input, shape index: {}]   ;;  %s4147_s2 = inlined_call_operand.vmem [shape: f32[1,128], index: 2, kind: input, shape index: {}]   ;;  %s4148_s3 = inlined_call_operand.vmem [shape: f32[1,128], index: 3, kind: input, shape index: {}]   ;;  %s4149_s4 = inlined_call_operand.vmem [shape: f32[1,128], index: 4, kind: input, shape index: {}]   ;;  %s4150_s5 = inlined_call_operand.vmem [shape: f32[648,128], index: 5, kind: output, shape index: {}]  }
   0x1   :  { %s2983_s20 = smov 0  }
   0x2 LB: > { %s27_s21 = sadd.s32 1, %s2941_s19  ;;  %p2539_p0 = scmp.ge.s32.totalorder %s2945_s20, 1  ;;  %s2945_s20 = sphi %s2983_s20, %s15_s20   ;;  %s2941_s19 = sphi %s2981_s19, %s4158_s19   ;;  %s2937_s18 = sphi %s2979_s18, %s4157_s18  }
   0x3   : > { %p29_p1 = scmp.ge.s32.totalorder %s27_s21, 2  ;;  %p210_p2 = scmp.lt.s32.totalorder %s2945_s20, 3 }
   0x5   : > { %s4160_s21 = smov (%p29_p1, %s27_s21), 0  ;;  %p211_p3 = pnand %p2539_p0, %p210_p2 }
   0x6   : > { %p2540_p4 = scmp.ne.s32.totalorder (!%p211_p3), %s2937_s18, 0 }
   0x7   : > { %214 = sbr.rel (%p211_p3) target bundleno = 652 (0x28c), region = 40 }
   0xc   : > { %264 = sbr.rel (%p2540_p4) target bundleno = 506 (0x1fa), region = 44 }
  0x11   : > { %v2870_v0 = vld [vmem:[%s4146_s1 + $0x38] sm:$0xff]   ;;  %v4151_v1 = vmov 0.0   ;;  %v2871_v2 = vld [vmem:[%s4146_s1 + $0x30] sm:$0xff]   ;;  %vm2948_vm0 = vmmov 0   ;;  %v2872_v3 = vld [vmem:[%s4146_s1 + $0x28] sm:$0xff]  }
  0x12   : > { %2648 = vmatprep.subr.bf16.mxu0 %v4151_v1  ;;  %269 = vst [vmem:[#allocation3] sm:$0x1] %v4151_v1  ;;  %270 = vst [vmem:[#allocation4] sm:$0x1] %v4151_v1  ;;  %2828 = vmatprep.subr.bf16.mxu1 %v4151_v1  ;;  %v2873_v4 = vld [vmem:[%s4146_s1 + $0x20] sm:$0xff]   ;;  %v2874_v5 = vld [vmem:[%s4146_s1 + $0x18] sm:$0xff]  }
  0x13   : > { %2649 = vmatpush3.bf16.msra.mxu0 %v2870_v0  ;;  %2664 = vmatprep.mubr.msk.bf16.mxu0 %vm2948_vm0, %v4151_v1  ;;  %v2875_v6 = vld [vmem:[%s4146_s1 + $0x10] sm:$0xff]   ;;  %v2876_v7 = vld [vmem:[%s4146_s1 + $0x8] sm:$0xff]   ;;  %v2877_v8 = vld [vmem:[%s4146_s1] sm:$0xff]  }
  0x14   : > { %2650 = vmatprep.subr.bf16.mxu0 %v4151_v1  ;;  %2836 = vmatpush3.bf16.msra.mxu1 %v2870_v0  ;;  %v2878_v9 = vld [vmem:[%s4145_s0] sm:$0xff]   ;;  %v2889_v10 = vld [vmem:[%s4145_s0 + $0xa8] sm:$0xff]   ;;  %v2891_v12 = vld [vmem:[%s4145_s0 + $0xb0] sm:$0xff]  }
  0x15   : > { %2829 = vmatprep.subr.bf16.mxu1 %v4151_v1  ;;  %2748 = vmatprep.mubr.msk.bf16.mxu1 %vm2948_vm0, %v4151_v1  ;;  %v2879_v11 = vld [vmem:[%s4145_s0 + $0x8] sm:$0xff]   ;;  %v2880_v13 = vld [vmem:[%s4145_s0 + $0x10] sm:$0xff]   ;;  %v2893_v14 = vld [vmem:[%s4145_s0 + $0xb8] sm:$0xff]  }
  0x16   : > { %v2881_v15 = vld [vmem:[%s4145_s0 + $0x18] sm:$0xff]   ;;  %v2895_v16 = vld [vmem:[%s4145_s0 + $0xc0] sm:$0xff]   ;;  %v2897_v18 = vld [vmem:[%s4145_s0 + $0xc8] sm:$0xff]  }
  0x17   : > { %2651 = vmatpush3.bf16.msra.mxu0 %v2871_v2  ;;  %v2882_v17 = vld [vmem:[%s4145_s0 + $0x20] sm:$0xff]   ;;  %v2883_v19 = vld [vmem:[%s4145_s0 + $0x28] sm:$0xff]   ;;  %v2899_v20 = vld [vmem:[%s4145_s0 + $0xd0] sm:$0xff]  }
  0x18   : > { %2652 = vmatprep.subr.bf16.mxu0 %v4151_v1  ;;  %2837 = vmatpush3.bf16.msra.mxu1 %v2871_v2  ;;  %v2884_v21 = vld [vmem:[%s4145_s0 + $0x30] sm:$0xff]   ;;  %v2901_v22 = vld [vmem:[%s4145_s0 + $0xd8] sm:$0xff]   ;;  %v2903_v24 = vld [vmem:[%s4145_s0 + $0xe0] sm:$0xff]  }
  0x19   : > { %2830 = vmatprep.subr.bf16.mxu1 %v4151_v1  ;;  %v2885_v23 = vld [vmem:[%s4145_s0 + $0x38] sm:$0xff]   ;;  %v2886_v25 = vld [vmem:[%s4145_s0 + $0x40] sm:$0xff]   ;;  %v2905_v26 = vld [vmem:[%s4145_s0 + $0xe8] sm:$0xff]  }
  0x1a   : > { %v2887_v27 = vld [vmem:[%s4145_s0 + $0x48] sm:$0xff]   ;;  %v2907_v28 = vld [vmem:[%s4145_s0 + $0xf0] sm:$0xff]   ;;  %v2909_v30 = vld [vmem:[%s4145_s0 + $0xf8] sm:$0xff]  }
  0x1b   : > { %2653 = vmatpush3.bf16.msra.mxu0 %v2872_v3  ;;  %v2888_v29 = vld [vmem:[%s4145_s0 + $0x50] sm:$0xff]   ;;  %v2890_v31 = vld [vmem:[%s4145_s0 + $0x58] sm:$0xff]   ;;  %v2910_v32 = vld [vmem:[%s4145_s0 + $0x100] sm:$0xff]  }
  0x1c   : > { %2654 = vmatprep.subr.bf16.mxu0 %v4151_v1  ;;  %2838 = vmatpush3.bf16.msra.mxu1 %v2872_v3  ;;  %v2892_v33 = vld [vmem:[%s4145_s0 + $0x60] sm:$0xff]   ;;  %v2911_v34 = vld [vmem:[%s4145_s0 + $0x108] sm:$0xff]   ;;  %v2912_v36 = vld [vmem:[%s4145_s0 + $0x110] sm:$0xff]  }
  0x1d   : > { %2831 = vmatprep.subr.bf16.mxu1 %v4151_v1  ;;  %v2894_v35 = vld [vmem:[%s4145_s0 + $0x68] sm:$0xff]   ;;  %v2896_v37 = vld [vmem:[%s4145_s0 + $0x70] sm:$0xff]   ;;  %v2913_v38 = vld [vmem:[%s4145_s0 + $0x118] sm:$0xff]  }
  0x1e   : > { %v2898_v39 = vld [vmem:[%s4145_s0 + $0x78] sm:$0xff]   ;;  %v2914_v40 = vld [vmem:[%s4145_s0 + $0x120] sm:$0xff]   ;;  %v2915_v42 = vld [vmem:[%s4145_s0 + $0x128] sm:$0xff]  }
  0x1f   : > { %2655 = vmatpush3.bf16.msra.mxu0 %v2873_v4  ;;  %v2900_v41 = vld [vmem:[%s4145_s0 + $0x80] sm:$0xff]   ;;  %v2902_v43 = vld [vmem:[%s4145_s0 + $0x88] sm:$0xff]   ;;  %v2916_v44 = vld [vmem:[%s4145_s0 + $0x130] sm:$0xff]  }
  0x20   : > { %2656 = vmatprep.subr.bf16.mxu0 %v4151_v1  ;;  %2839 = vmatpush3.bf16.msra.mxu1 %v2873_v4  ;;  %v2904_v45 = vld [vmem:[%s4145_s0 + $0x90] sm:$0xff]   ;;  %v2917_v46 = vld [vmem:[%s4145_s0 + $0x138] sm:$0xff]   ;;  %v2918_v48 = vld [vmem:[%s4145_s0 + $0x140] ss:$0 sps:$4 sm:$0xff]  }
  0x21   : > { %2832 = vmatprep.subr.bf16.mxu1 %v4151_v1  ;;  %v2906_v47 = vld [vmem:[%s4145_s0 + $0x98] sm:$0xff]   ;;  %v2908_v49 = vld [vmem:[%s4145_s0 + $0xa0] sm:$0xff]  }
  0x22   : > { %v3250_v50 = vld [vmem:[%s4147_s2] ss:$0 sm:$0xff] }
  0x23   : > { %2657 = vmatpush3.bf16.msra.mxu0 %v2874_v5 }
  0x24   : > { %2658 = vmatprep.subr.bf16.mxu0 %v4151_v1  ;;  %2840 = vmatpush3.bf16.msra.mxu1 %v2874_v5 }
  0x25   : > { %2833 = vmatprep.subr.bf16.mxu1 %v4151_v1 }
  0x27   : > { %2659 = vmatpush3.bf16.msra.mxu0 %v2875_v6 }
  0x28   : > { %2660 = vmatprep.subr.bf16.mxu0 %v4151_v1  ;;  %2841 = vmatpush3.bf16.msra.mxu1 %v2875_v6 }
  0x29   : > { %2834 = vmatprep.subr.bf16.mxu1 %v4151_v1 }
  0x2b   : > { %2661 = vmatpush3.bf16.msra.mxu0 %v2876_v7 }
  0x2c   : > { %2662 = vmatprep.subr.bf16.mxu0 %v4151_v1  ;;  %2842 = vmatpush3.bf16.msra.mxu1 %v2876_v7 }
  0x2d   : > { %2835 = vmatprep.subr.bf16.mxu1 %v4151_v1 }
  0x2f   : > { %2663 = vmatpush3.bf16.msra.mxu0 %v2877_v8 }
  0x30   : > { %2843 = vmatpush3.bf16.msra.mxu1 %v2877_v8 }
  0x32   : > { %2665 = vmatmul.mubr.bf16.vlgmr.msra.gmra.mxu0 %v2878_v9 }
  0x33   : > { %2668 = vmatprep.mubr.msk.bf16.mxu0 %vm2948_vm0, %v4151_v1  ;;  %2749 = vmatmul.mubr.bf16.vlgmr.msra.gmra.mxu1 %v2889_v10 }
  0x34   : > { %2752 = vmatprep.mubr.msk.bf16.mxu1 %vm2948_vm0, %v4151_v1 }
  0x3a   : > { %2669 = vmatmul.mubr.bf16.gmra.mxu0 %v2879_v11 }
  0x3b   : > { %2672 = vmatprep.mubr.msk.bf16.mxu0 %vm2948_vm0, %v4151_v1  ;;  %2753 = vmatmul.mubr.bf16.gmra.mxu1 %v2891_v12 }
  0x3c   : > { %2756 = vmatprep.mubr.msk.bf16.mxu1 %vm2948_vm0, %v4151_v1 }
  0x42   : > { %2673 = vmatmul.mubr.bf16.gmra.mxu0 %v2880_v13 }
  0x43   : > { %2676 = vmatprep.mubr.msk.bf16.mxu0 %vm2948_vm0, %v4151_v1  ;;  %2757 = vmatmul.mubr.bf16.gmra.mxu1 %v2893_v14 }
  0x44   : > { %2760 = vmatprep.mubr.msk.bf16.mxu1 %vm2948_vm0, %v4151_v1 }
  0x4a   : > { %2677 = vmatmul.mubr.bf16.gmra.mxu0 %v2881_v15 }
  0x4b   : > { %2680 = vmatprep.mubr.msk.bf16.mxu0 %vm2948_vm0, %v4151_v1  ;;  %2761 = vmatmul.mubr.bf16.gmra.mxu1 %v2895_v16 }
  0x4c   : > { %2764 = vmatprep.mubr.msk.bf16.mxu1 %vm2948_vm0, %v4151_v1 }
  0x52   : > { %2681 = vmatmul.mubr.bf16.gmra.mxu0 %v2882_v17 }
  0x53   : > { %2684 = vmatprep.mubr.msk.bf16.mxu0 %vm2948_vm0, %v4151_v1  ;;  %2765 = vmatmul.mubr.bf16.gmra.mxu1 %v2897_v18 }
  0x54   : > { %2768 = vmatprep.mubr.msk.bf16.mxu1 %vm2948_vm0, %v4151_v1 }
  0x5a   : > { %2685 = vmatmul.mubr.bf16.gmra.mxu0 %v2883_v19 }
  0x5b   : > { %2688 = vmatprep.mubr.msk.bf16.mxu0 %vm2948_vm0, %v4151_v1  ;;  %2769 = vmatmul.mubr.bf16.gmra.mxu1 %v2899_v20 }
  0x5c   : > { %2772 = vmatprep.mubr.msk.bf16.mxu1 %vm2948_vm0, %v4151_v1 }
  0x62   : > { %2689 = vmatmul.mubr.bf16.gmra.mxu0 %v2884_v21 }
  0x63   : > { %2692 = vmatprep.mubr.msk.bf16.mxu0 %vm2948_vm0, %v4151_v1  ;;  %2773 = vmatmul.mubr.bf16.gmra.mxu1 %v2901_v22 }
  0x64   : > { %2776 = vmatprep.mubr.msk.bf16.mxu1 %vm2948_vm0, %v4151_v1 }
  0x6a   : > { %2693 = vmatmul.mubr.bf16.gmra.mxu0 %v2885_v23 }
  0x6b   : > { %2696 = vmatprep.mubr.msk.bf16.mxu0 %vm2948_vm0, %v4151_v1  ;;  %2777 = vmatmul.mubr.bf16.gmra.mxu1 %v2903_v24 }
  0x6c   : > { %2780 = vmatprep.mubr.msk.bf16.mxu1 %vm2948_vm0, %v4151_v1 }
  0x72   : > { %2697 = vmatmul.mubr.bf16.gmra.mxu0 %v2886_v25 }
  0x73   : > { %2700 = vmatprep.mubr.msk.bf16.mxu0 %vm2948_vm0, %v4151_v1  ;;  %2781 = vmatmul.mubr.bf16.gmra.mxu1 %v2905_v26 }
  0x74   : > { %2784 = vmatprep.mubr.msk.bf16.mxu1 %vm2948_vm0, %v4151_v1 }
  0x7a   : > { %2701 = vmatmul.mubr.bf16.gmra.mxu0 %v2887_v27 }
  0x7b   : > { %2704 = vmatprep.mubr.msk.bf16.mxu0 %vm2948_vm0, %v4151_v1  ;;  %2785 = vmatmul.mubr.bf16.gmra.mxu1 %v2907_v28 }
  0x7c   : > { %2788 = vmatprep.mubr.msk.bf16.mxu1 %vm2948_vm0, %v4151_v1 }
  0x82   : > { %2705 = vmatmul.mubr.bf16.gmra.mxu0 %v2888_v29 }
  0x83   : > { %2708 = vmatprep.mubr.msk.bf16.mxu0 %vm2948_vm0, %v4151_v1  ;;  %2789 = vmatmul.mubr.bf16.gmra.mxu1 %v2909_v30 }
  0x84   : > { %2792 = vmatprep.mubr.msk.bf16.mxu1 %vm2948_vm0, %v4151_v1 }
  0x8a   : > { %2709 = vmatmul.mubr.bf16.gmra.mxu0 %v2890_v31 }
  0x8b   : > { %2712 = vmatprep.mubr.msk.bf16.mxu0 %vm2948_vm0, %v4151_v1  ;;  %2793 = vmatmul.mubr.bf16.gmra.mxu1 %v2910_v32 }
  0x8c   : > { %2796 = vmatprep.mubr.msk.bf16.mxu1 %vm2948_vm0, %v4151_v1 }
  0x92   : > { %2713 = vmatmul.mubr.bf16.gmra.mxu0 %v2892_v33 }
  0x93   : > { %2716 = vmatprep.mubr.msk.bf16.mxu0 %vm2948_vm0, %v4151_v1  ;;  %2797 = vmatmul.mubr.bf16.gmra.mxu1 %v2911_v34 }
  0x94   : > { %2800 = vmatprep.mubr.msk.bf16.mxu1 %vm2948_vm0, %v4151_v1 }
  0x9a   : > { %2717 = vmatmul.mubr.bf16.gmra.mxu0 %v2894_v35 }
  0x9b   : > { %2720 = vmatprep.mubr.msk.bf16.mxu0 %vm2948_vm0, %v4151_v1  ;;  %2801 = vmatmul.mubr.bf16.gmra.mxu1 %v2912_v36 }
  0x9c   : > { %2804 = vmatprep.mubr.msk.bf16.mxu1 %vm2948_vm0, %v4151_v1 }
  0xa2   : > { %2721 = vmatmul.mubr.bf16.gmra.mxu0 %v2896_v37 }
  0xa3   : > { %2724 = vmatprep.mubr.msk.bf16.mxu0 %vm2948_vm0, %v4151_v1  ;;  %2805 = vmatmul.mubr.bf16.gmra.mxu1 %v2913_v38 }
  0xa4   : > { %2808 = vmatprep.mubr.msk.bf16.mxu1 %vm2948_vm0, %v4151_v1 }
  0xaa   : > { %2725 = vmatmul.mubr.bf16.gmra.mxu0 %v2898_v39 }
  0xab   : > { %2728 = vmatprep.mubr.msk.bf16.mxu0 %vm2948_vm0, %v4151_v1  ;;  %2809 = vmatmul.mubr.bf16.gmra.mxu1 %v2914_v40 }
  0xac   : > { %2812 = vmatprep.mubr.msk.bf16.mxu1 %vm2948_vm0, %v4151_v1 }
  0xb2   : > { %2729 = vmatmul.mubr.bf16.gmra.mxu0 %v2900_v41 }
  0xb3   : > { %2732 = vmatprep.mubr.msk.bf16.mxu0 %vm2948_vm0, %v4151_v1  ;;  %2813 = vmatmul.mubr.bf16.gmra.mxu1 %v2915_v42 }
  0xb4   : > { %2816 = vmatprep.mubr.msk.bf16.mxu1 %vm2948_vm0, %v4151_v1 }
  0xba   : > { %2733 = vmatmul.mubr.bf16.gmra.mxu0 %v2902_v43 }
  0xbb   : > { %2736 = vmatprep.mubr.msk.bf16.mxu0 %vm2948_vm0, %v4151_v1  ;;  %2817 = vmatmul.mubr.bf16.gmra.mxu1 %v2916_v44 }
  0xbc   : > { %2820 = vmatprep.mubr.msk.bf16.mxu1 %vm2948_vm0, %v4151_v1 }
  0xc2   : > { %2737 = vmatmul.mubr.bf16.gmra.mxu0 %v2904_v45 }
  0xc3   : > { %2740 = vmatprep.mubr.msk.bf16.mxu0 %vm2948_vm0, %v4151_v1  ;;  %2821 = vmatmul.mubr.bf16.gmra.mxu1 %v2917_v46 }
  0xc4   : > { %2824 = vmatprep.mubr.msk.bf16.mxu1 %vm2948_vm0, %v4151_v1 }
  0xca   : > { %2741 = vmatmul.mubr.bf16.gmra.mxu0 %v2906_v47 }
  0xcb   : > { %2744 = vmatprep.mubr.msk.bf16.mxu0 %vm2948_vm0, %v4151_v1  ;;  %2825 = vmatmul.mubr.bf16.gmra.mxu1 %v2918_v48 }
  0xd2   : > { %2745 = vmatmul.mubr.bf16.gmra.mxu0 %v2908_v49 }
  0xf2   : > { %v701_v51 = vpop.f32.mrf.mxu0 }
  0xf3   : > { %v702_v52 = vadd.f32 %v3250_v50, %v701_v51  ;;  %v869_v53 = vpop.f32.mrf.mxu1 }
  0xf4   : > { %v2666_v54 = vpop.f32.mrf.mxu0  ;;  %v3254_v55 = vadd.f32 %v3250_v50, %v869_v53 }
  0xf5   : > { %1028 = vst [vmem:[#allocation2 + $0xc8] sm:$0xff] %v702_v52  ;;  %v2750_v56 = vpop.f32.mrf.mxu1  ;;  %v1687_v62 = vmul.f32 %v702_v52, %v702_v52 }
  0xf6   : > { %v704_v57 = vpop.f32.mrf.mxu0  ;;  %1070 = vst [vmem:[#allocation2 + $0x90] sm:$0xff] %v3254_v55 }
  0xf7   : > { %v705_v58 = vadd.f32 %v3250_v50, %v704_v57  ;;  %v872_v59 = vpop.f32.mrf.mxu1 }
  0xf8   : > { %v2667_v60 = vpop.f32.mrf.mxu0  ;;  %v3259_v61 = vadd.f32 %v3250_v50, %v872_v59 }
  0xf9   : > { %1029 = vst [vmem:[#allocation2 + $0x8] sm:$0xff] %v705_v58  ;;  %v1598_v63 = vadd.f32 %v705_v58, %v702_v52  ;;  %v1688_v0 = vmul.f32 %v705_v58, %v705_v58  ;;  %v2751_v2 = vpop.f32.mrf.mxu1 }
  0xfa   : > { %v709_v3 = vpop.f32.mrf.mxu0  ;;  %1071 = vst [vmem:[#allocation2 + $0x270] sm:$0xff] %v3259_v61 }
  0xfb   : > { %v1768_v4 = vadd.f32 %v1688_v0, %v1687_v62  ;;  %v710_v5 = vadd.f32 %v3250_v50, %v709_v3  ;;  %v877_v6 = vpop.f32.mrf.mxu1 }
  0xfc   : > { %v2670_v7 = vpop.f32.mrf.mxu0  ;;  %v3264_v8 = vadd.f32 %v3250_v50, %v877_v6 }
  0xfd   : > { %1030 = vst [vmem:[#allocation2 + $0x40] sm:$0xff] %v710_v5  ;;  %v1599_v9 = vadd.f32 %v1598_v63, %v710_v5  ;;  %v1689_v10 = vmul.f32 %v710_v5, %v710_v5  ;;  %v2754_v11 = vpop.f32.mrf.mxu1 }
  0xfe   : > { %v712_v12 = vpop.f32.mrf.mxu0  ;;  %1072 = vst [vmem:[#allocation2 + $0x1e8] sm:$0xff] %v3264_v8 }
  0xff   : > { %v1769_v13 = vadd.f32 %v1768_v4, %v1689_v10  ;;  %v713_v14 = vadd.f32 %v3250_v50, %v712_v12  ;;  %v880_v15 = vpop.f32.mrf.mxu1 }
 0x100   : > { %v2671_v16 = vpop.f32.mrf.mxu0  ;;  %v3269_v17 = vadd.f32 %v3250_v50, %v880_v15 }
 0x101   : > { %1031 = vst [vmem:[#allocation2 + $0x28] sm:$0xff] %v713_v14  ;;  %v1600_v18 = vadd.f32 %v1599_v9, %v713_v14  ;;  %v1690_v19 = vmul.f32 %v713_v14, %v713_v14  ;;  %v2755_v20 = vpop.f32.mrf.mxu1 }
 0x102   : > { %v717_v21 = vpop.f32.mrf.mxu0  ;;  %1073 = vst [vmem:[#allocation2 + $0x38] sm:$0xff] %v3269_v17 }
 0x103   : > { %v1770_v22 = vadd.f32 %v1769_v13, %v1690_v19  ;;  %v718_v23 = vadd.f32 %v3250_v50, %v717_v21  ;;  %v885_v24 = vpop.f32.mrf.mxu1 }
 0x104   : > { %v2674_v25 = vpop.f32.mrf.mxu0  ;;  %v3274_v26 = vadd.f32 %v3250_v50, %v885_v24 }
 0x105   : > { %1032 = vst [vmem:[#allocation2 + $0xe8] sm:$0xff] %v718_v23  ;;  %v1601_v27 = vadd.f32 %v1600_v18, %v718_v23  ;;  %v1691_v28 = vmul.f32 %v718_v23, %v718_v23  ;;  %v2758_v29 = vpop.f32.mrf.mxu1 }
 0x106   : > { %v720_v30 = vpop.f32.mrf.mxu0  ;;  %1074 = vst [vmem:[#allocation2 + $0x1c8] sm:$0xff] %v3274_v26 }
 0x107   : > { %v1771_v31 = vadd.f32 %v1770_v22, %v1691_v28  ;;  %v721_v32 = vadd.f32 %v3250_v50, %v720_v30  ;;  %v888_v33 = vpop.f32.mrf.mxu1 }
 0x108   : > { %v2675_v34 = vpop.f32.mrf.mxu0  ;;  %v3279_v35 = vadd.f32 %v3250_v50, %v888_v33 }
 0x109   : > { %1033 = vst [vmem:[#allocation2 + $0xf0] sm:$0xff] %v721_v32  ;;  %v1602_v36 = vadd.f32 %v1601_v27, %v721_v32  ;;  %v1692_v37 = vmul.f32 %v721_v32, %v721_v32  ;;  %v2759_v38 = vpop.f32.mrf.mxu1 }
 0x10a   : > { %v725_v39 = vpop.f32.mrf.mxu0  ;;  %1075 = vst [vmem:[#allocation2 + $0x18] sm:$0xff] %v3279_v35 }
 0x10b   : > { %v1772_v40 = vadd.f32 %v1771_v31, %v1692_v37  ;;  %v726_v41 = vadd.f32 %v3250_v50, %v725_v39  ;;  %v893_v42 = vpop.f32.mrf.mxu1 }
 0x10c   : > { %v2678_v43 = vpop.f32.mrf.mxu0  ;;  %v3284_v44 = vadd.f32 %v3250_v50, %v893_v42 }
 0x10d   : > { %1034 = vst [vmem:[#allocation2 + $0x70] sm:$0xff] %v726_v41  ;;  %v1603_v45 = vadd.f32 %v1602_v36, %v726_v41  ;;  %v1693_v46 = vmul.f32 %v726_v41, %v726_v41  ;;  %v2762_v47 = vpop.f32.mrf.mxu1 }
 0x10e   : > { %v728_v48 = vpop.f32.mrf.mxu0  ;;  %1076 = vst [vmem:[#allocation2 + $0x58] sm:$0xff] %v3284_v44 }
 0x10f   : > { %v1773_v49 = vadd.f32 %v1772_v40, %v1693_v46  ;;  %v729_v51 = vadd.f32 %v3250_v50, %v728_v48  ;;  %v896_v52 = vpop.f32.mrf.mxu1 }
 0x110   : > { %v2679_v53 = vpop.f32.mrf.mxu0  ;;  %v3289_v54 = vadd.f32 %v3250_v50, %v896_v52 }
 0x111   : > { %1035 = vst [vmem:[#allocation2 + $0x120] sm:$0xff] %v729_v51  ;;  %v1604_v56 = vadd.f32 %v1603_v45, %v729_v51  ;;  %v1694_v57 = vmul.f32 %v729_v51, %v729_v51  ;;  %v2763_v58 = vpop.f32.mrf.mxu1 }
 0x112   : > { %v733_v59 = vpop.f32.mrf.mxu0  ;;  %1077 = vst [vmem:[#allocation2 + $0x168] sm:$0xff] %v3289_v54 }
 0x113   : > { %v1774_v60 = vadd.f32 %v1773_v49, %v1694_v57  ;;  %v734_v62 = vadd.f32 %v3250_v50, %v733_v59  ;;  %v901_v63 = vpop.f32.mrf.mxu1 }
 0x114   : > { %v2682_v0 = vpop.f32.mrf.mxu0  ;;  %v3294_v2 = vadd.f32 %v3250_v50, %v901_v63 }
 0x115   : > { %1036 = vst [vmem:[#allocation2 + $0xd8] sm:$0xff] %v734_v62  ;;  %v1605_v3 = vadd.f32 %v1604_v56, %v734_v62  ;;  %v1695_v4 = vmul.f32 %v734_v62, %v734_v62  ;;  %v2766_v5 = vpop.f32.mrf.mxu1 }
 0x116   : > { %v736_v6 = vpop.f32.mrf.mxu0  ;;  %1078 = vst [vmem:[#allocation2 + $0x280] sm:$0xff] %v3294_v2 }
 0x117   : > { %v1775_v7 = vadd.f32 %v1774_v60, %v1695_v4  ;;  %v737_v9 = vadd.f32 %v3250_v50, %v736_v6  ;;  %v904_v10 = vpop.f32.mrf.mxu1 }
 0x118   : > { %v2683_v11 = vpop.f32.mrf.mxu0  ;;  %v3299_v12 = vadd.f32 %v3250_v50, %v904_v10 }
 0x119   : > { %1037 = vst [vmem:[#allocation2 + $0x148] sm:$0xff] %v737_v9  ;;  %v3301_v13 = vadd.f32 %v1605_v3, %v737_v9  ;;  %v1696_v14 = vmul.f32 %v737_v9, %v737_v9  ;;  %v2767_v15 = vpop.f32.mrf.mxu1 }
 0x11a   : > { %v741_v16 = vpop.f32.mrf.mxu0  ;;  %1079 = vst [vmem:[#allocation2 + $0x1f8] sm:$0xff] %v3299_v12 }
 0x11b   : > { %v3304_v18 = vadd.f32 %v1775_v7, %v1696_v14  ;;  %v3307_v19 = vadd.f32 %v3250_v50, %v741_v16  ;;  %v909_v20 = vpop.f32.mrf.mxu1 }
 0x11c   : > { %v2686_v21 = vpop.f32.mrf.mxu0  ;;  %v3310_v22 = vadd.f32 %v3250_v50, %v909_v20 }
 0x11d   : > { %1038 = vst [vmem:[#allocation2 + $0x158] sm:$0xff] %v3307_v19  ;;  %v2770_v23 = vpop.f32.mrf.mxu1 }
 0x11e   : > { %v744_v24 = vpop.f32.mrf.mxu0  ;;  %1080 = vst [vmem:[#allocation2 + $0x180] sm:$0xff] %v3310_v22 }
 0x11f   : > { %v3315_v25 = vadd.f32 %v3250_v50, %v744_v24  ;;  %v912_v27 = vpop.f32.mrf.mxu1 }
 0x120   : > { %v2687_v28 = vpop.f32.mrf.mxu0  ;;  %v3318_v29 = vadd.f32 %v3250_v50, %v912_v27 }
 0x121   : > { %1039 = vst [vmem:[#allocation2 + $0x108] sm:$0xff] %v3315_v25  ;;  %v2771_v30 = vpop.f32.mrf.mxu1 }
 0x122   : > { %v749_v31 = vpop.f32.mrf.mxu0  ;;  %1081 = vst [vmem:[#allocation2 + $0x258] sm:$0xff] %v3318_v29 }
 0x123   : > { %v3323_v32 = vadd.f32 %v3250_v50, %v749_v31  ;;  %v917_v33 = vpop.f32.mrf.mxu1 }
 0x124   : > { %v2690_v34 = vpop.f32.mrf.mxu0  ;;  %v3326_v36 = vadd.f32 %v3250_v50, %v917_v33 }
 0x125   : > { %1040 = vst [vmem:[#allocation2 + $0x220] sm:$0xff] %v3323_v32  ;;  %v2774_v37 = vpop.f32.mrf.mxu1 }
 0x126   : > { %v752_v38 = vpop.f32.mrf.mxu0  ;;  %1082 = vst [vmem:[#allocation2 + $0x260] sm:$0xff] %v3326_v36 }
 0x127   : > { %v3331_v39 = vadd.f32 %v3250_v50, %v752_v38  ;;  %v920_v40 = vpop.f32.mrf.mxu1 }
 0x128   : > { %v2691_v41 = vpop.f32.mrf.mxu0  ;;  %v3334_v42 = vadd.f32 %v3250_v50, %v920_v40 }
 0x129   : > { %1041 = vst [vmem:[#allocation2 + $0xc0] sm:$0xff] %v3331_v39  ;;  %v2775_v43 = vpop.f32.mrf.mxu1 }
 0x12a   : > { %v757_v45 = vpop.f32.mrf.mxu0  ;;  %1083 = vst [vmem:[#allocation2 + $0x100] sm:$0xff] %v3334_v42 }
 0x12b   : > { %v3339_v46 = vadd.f32 %v3250_v50, %v757_v45  ;;  %v925_v47 = vpop.f32.mrf.mxu1 }
 0x12c   : > { %v2694_v48 = vpop.f32.mrf.mxu0  ;;  %v3342_v49 = vadd.f32 %v3250_v50, %v925_v47 }
 0x12d   : > { %1042 = vst [vmem:[#allocation2 + $0x140] sm:$0xff] %v3339_v46  ;;  %v2778_v51 = vpop.f32.mrf.mxu1 }
 0x12e   : > { %v760_v52 = vpop.f32.mrf.mxu0  ;;  %1084 = vst [vmem:[#allocation2 + $0x1b8] sm:$0xff] %v3342_v49 }
 0x12f   : > { %v3347_v53 = vadd.f32 %v3250_v50, %v760_v52  ;;  %v928_v56 = vpop.f32.mrf.mxu1 }
 0x130   : > { %v2695_v57 = vpop.f32.mrf.mxu0  ;;  %v3350_v58 = vadd.f32 %v3250_v50, %v928_v56 }
 0x131   : > { %1043 = vst [vmem:[#allocation2 + $0x200] sm:$0xff] %v3347_v53  ;;  %v2779_v59 = vpop.f32.mrf.mxu1 }
 0x132   : > { %v765_v60 = vpop.f32.mrf.mxu0  ;;  %1085 = vst [vmem:[#allocation2 + $0x110] sm:$0xff] %v3350_v58 }
 0x133   : > { %v3355_v62 = vadd.f32 %v3250_v50, %v765_v60  ;;  %v933_v63 = vpop.f32.mrf.mxu1 }
 0x134   : > { %v2698_v0 = vpop.f32.mrf.mxu0  ;;  %v3358_v3 = vadd.f32 %v3250_v50, %v933_v63 }
 0x135   : > { %1044 = vst [vmem:[#allocation2 + $0x80] sm:$0xff] %v3355_v62  ;;  %v2782_v4 = vpop.f32.mrf.mxu1 }
 0x136   : > { %v768_v5 = vpop.f32.mrf.mxu0  ;;  %1086 = vst [vmem:[#allocation2 + $0xa0] sm:$0xff] %v3358_v3 }
 0x137   : > { %v3363_v6 = vadd.f32 %v3250_v50, %v768_v5  ;;  %v936_v7 = vpop.f32.mrf.mxu1 }
 0x138   : > { %v2699_v9 = vpop.f32.mrf.mxu0  ;;  %v3366_v10 = vadd.f32 %v3250_v50, %v936_v7 }
 0x139   : > { %1045 = vst [vmem:[#allocation2 + $0x30] sm:$0xff] %v3363_v6  ;;  %v2783_v11 = vpop.f32.mrf.mxu1 }
 0x13a   : > { %v773_v14 = vpop.f32.mrf.mxu0  ;;  %1087 = vst [vmem:[#allocation2 + $0x278] sm:$0xff] %v3366_v10 }
 0x13b   : > { %v3371_v15 = vadd.f32 %v3250_v50, %v773_v14  ;;  %v941_v16 = vpop.f32.mrf.mxu1 }
 0x13c   : > { %v2702_v20 = vpop.f32.mrf.mxu0  ;;  %v3374_v21 = vadd.f32 %v3250_v50, %v941_v16 }
 0x13d   : > { %1046 = vst [vmem:[#allocation2 + $0x10] sm:$0xff] %v3371_v15  ;;  %v2786_v23 = vpop.f32.mrf.mxu1 }
 0x13e   : > { %v776_v24 = vpop.f32.mrf.mxu0  ;;  %1088 = vst [vmem:[#allocation2 + $0x210] sm:$0xff] %v3374_v21 }
 0x13f   : > { %v3379_v27 = vadd.f32 %v3250_v50, %v776_v24  ;;  %v944_v28 = vpop.f32.mrf.mxu1 }
 0x140   : > { %v2703_v30 = vpop.f32.mrf.mxu0  ;;  %v3382_v31 = vadd.f32 %v3250_v50, %v944_v28 }
 0x141   : > { %1047 = vst [vmem:[#allocation2 + $0x160] sm:$0xff] %v3379_v27  ;;  %v2787_v33 = vpop.f32.mrf.mxu1 }
 0x142   : > { %v781_v34 = vpop.f32.mrf.mxu0  ;;  %1089 = vst [vmem:[#allocation2 + $0x78] sm:$0xff] %v3382_v31 }
 0x143   : > { %v3387_v37 = vadd.f32 %v3250_v50, %v781_v34  ;;  %v949_v38 = vpop.f32.mrf.mxu1 }
 0x144   : > { %v2706_v40 = vpop.f32.mrf.mxu0  ;;  %v3390_v41 = vadd.f32 %v3250_v50, %v949_v38 }
 0x145   : > { %1048 = vst [vmem:[#allocation2 + $0x1d8] sm:$0xff] %v3387_v37  ;;  %v2790_v43 = vpop.f32.mrf.mxu1 }
 0x146   : > { %v784_v45 = vpop.f32.mrf.mxu0  ;;  %1090 = vst [vmem:[#allocation2 + $0x130] sm:$0xff] %v3390_v41 }
 0x147   : > { %v3395_v47 = vadd.f32 %v3250_v50, %v784_v45  ;;  %v952_v48 = vpop.f32.mrf.mxu1 }
 0x148   : > { %v2707_v51 = vpop.f32.mrf.mxu0  ;;  %v3398_v52 = vadd.f32 %v3250_v50, %v952_v48  ;;  %v1697_v48 = vmul.f32 %v3307_v19, %v3307_v19 }
 0x149   : > { %1049 = vst [vmem:[#allocation2 + $0x1a0] sm:$0xff] %v3395_v47  ;;  %v2791_v56 = vpop.f32.mrf.mxu1 }
 0x14a   : > { %v789_v57 = vpop.f32.mrf.mxu0  ;;  %1091 = vst [vmem:[#allocation2 + $0x1f0] sm:$0xff] %v3398_v52 }
 0x14b   : > { %v3403_v59 = vadd.f32 %v3250_v50, %v789_v57  ;;  %v957_v60 = vpop.f32.mrf.mxu1  ;;  %v1607_v57 = vadd.f32 %v3301_v13, %v3307_v19 }
 0x14c   : > { %v2710_v63 = vpop.f32.mrf.mxu0  ;;  %v3406_v0 = vadd.f32 %v3250_v50, %v957_v60  ;;  %v1698_v60 = vmul.f32 %v3315_v25, %v3315_v25 }
 0x14d   : > { %1050 = vst [vmem:[#allocation2 + $0x248] sm:$0xff] %v3403_v59  ;;  %v2794_v4 = vpop.f32.mrf.mxu1 }
 0x14e   : > { %v792_v5 = vpop.f32.mrf.mxu0  ;;  %1092 = vst [vmem:[#allocation2 + $0xa8] sm:$0xff] %v3406_v0 }
 0x14f   : > { %v3411_v7 = vadd.f32 %v3250_v50, %v792_v5  ;;  %v960_v9 = vpop.f32.mrf.mxu1 }
 0x150   : > { %v2711_v11 = vpop.f32.mrf.mxu0  ;;  %v3414_v14 = vadd.f32 %v3250_v50, %v960_v9 }
 0x151   : > { %1051 = vst [vmem:[#allocation2 + $0x218] sm:$0xff] %v3411_v7  ;;  %v2795_v16 = vpop.f32.mrf.mxu1  ;;  %v1777_v11 = vadd.f32 %v3304_v18, %v1697_v48 }
 0x152   : > { %v797_v20 = vpop.f32.mrf.mxu0  ;;  %1093 = vst [vmem:[#allocation2 + $0x60] sm:$0xff] %v3414_v14  ;;  %v1608_v16 = vadd.f32 %v1607_v57, %v3315_v25 }
 0x153   : > { %v3419_v23 = vadd.f32 %v3250_v50, %v797_v20  ;;  %v965_v24 = vpop.f32.mrf.mxu1  ;;  %v1699_v20 = vmul.f32 %v3323_v32, %v3323_v32 }
 0x154   : > { %v2714_v28 = vpop.f32.mrf.mxu0  ;;  %v3422_v30 = vadd.f32 %v3250_v50, %v965_v24  ;;  %v1778_v24 = vadd.f32 %v1777_v11, %v1698_v60 }
 0x155   : > { %1052 = vst [vmem:[#allocation2 + $0x190] sm:$0xff] %v3419_v23  ;;  %v2798_v33 = vpop.f32.mrf.mxu1  ;;  %v1609_v28 = vadd.f32 %v1608_v16, %v3323_v32 }
 0x156   : > { %v800_v34 = vpop.f32.mrf.mxu0  ;;  %1094 = vst [vmem:[#allocation2 + $0x138] sm:$0xff] %v3422_v30  ;;  %v1700_v33 = vmul.f32 %v3331_v39, %v3331_v39 }
 0x157   : > { %v3427_v38 = vadd.f32 %v3250_v50, %v800_v34  ;;  %v968_v40 = vpop.f32.mrf.mxu1  ;;  %v1610_v48 = vadd.f32 %v1609_v28, %v3331_v39 }
 0x158   : > { %v2715_v43 = vpop.f32.mrf.mxu0  ;;  %v3430_v45 = vadd.f32 %v3250_v50, %v968_v40 }
 0x159   : > { %1053 = vst [vmem:[#allocation2 + $0x48] sm:$0xff] %v3427_v38  ;;  %v2799_v51 = vpop.f32.mrf.mxu1  ;;  %v1779_v43 = vadd.f32 %v1778_v24, %v1699_v20  ;;  %v1611_v60 = vadd.f32 %v1610_v48, %v3339_v46 }
 0x15a   : > { %v805_v56 = vpop.f32.mrf.mxu0  ;;  %1095 = vst [vmem:[#allocation2 + $0xd0] sm:$0xff] %v3430_v45  ;;  %v1701_v51 = vmul.f32 %v3339_v46, %v3339_v46 }
 0x15b   : > { %v3441_v63 = vadd.f32 %v3250_v50, %v805_v56  ;;  %v973_v4 = vpop.f32.mrf.mxu1  ;;  %v1780_v57 = vadd.f32 %v1779_v43, %v1700_v33 }
 0x15c   : > { %v2718_v5 = vpop.f32.mrf.mxu0  ;;  %v3444_v9 = vadd.f32 %v3250_v50, %v973_v4  ;;  %v1702_v4 = vmul.f32 %v3347_v53, %v3347_v53 }
 0x15d   : > { %1054 = vst [vmem:[#allocation2 + $0x68] sm:$0xff] %v3441_v63  ;;  %v2802_v13 = vpop.f32.mrf.mxu1  ;;  %v1781_v20 = vadd.f32 %v1780_v57, %v1701_v51 }
 0x15e   : > { %v808_v19 = vpop.f32.mrf.mxu0  ;;  %1096 = vst [vmem:[#allocation2 + $0x128] sm:$0xff] %v3444_v9  ;;  %v1612_v13 = vadd.f32 %v1611_v60, %v3347_v53 }
 0x15f   : > { %v3456_v34 = vadd.f32 %v3250_v50, %v808_v19  ;;  %v976_v18 = vpop.f32.mrf.mxu1  ;;  %v1703_v19 = vmul.f32 %v3355_v62, %v3355_v62  ;;  %v1782_v28 = vadd.f32 %v1781_v20, %v1702_v4 }
 0x160   : > { %v2719_v25 = vpop.f32.mrf.mxu0  ;;  %v3459_v40 = vadd.f32 %v3250_v50, %v976_v18  ;;  %v1613_v33 = vadd.f32 %v1612_v13, %v3355_v62  ;;  %v1704_v18 = vmul.f32 %v3363_v6, %v3363_v6 }
 0x161   : > { %1055 = vst [vmem:[#allocation2 + $0x238] sm:$0xff] %v3456_v34  ;;  %v2803_v32 = vpop.f32.mrf.mxu1  ;;  %v1783_v51 = vadd.f32 %v1782_v28, %v1703_v19 }
 0x162   : > { %v813_v56 = vpop.f32.mrf.mxu0  ;;  %1097 = vst [vmem:[#allocation2 + $0xb0] sm:$0xff] %v3459_v40  ;;  %v1614_v32 = vadd.f32 %v1613_v33, %v3363_v6 }
 0x163   : > { %v3470_v5 = vadd.f32 %v3250_v50, %v813_v56  ;;  %v981_v11 = vpop.f32.mrf.mxu1  ;;  %v1705_v56 = vmul.f32 %v3371_v15, %v3371_v15  ;;  %v1784_v60 = vadd.f32 %v1783_v51, %v1704_v18 }
 0x164   : > { %v2722_v39 = vpop.f32.mrf.mxu0  ;;  %v3473_v16 = vadd.f32 %v3250_v50, %v981_v11  ;;  %v1615_v4 = vadd.f32 %v1614_v32, %v3371_v15  ;;  %v1706_v11 = vmul.f32 %v3379_v27, %v3379_v27 }
 0x165   : > { %1056 = vst [vmem:[#allocation2 + $0x188] sm:$0xff] %v3470_v5  ;;  %v2806_v46 = vpop.f32.mrf.mxu1  ;;  %v1785_v19 = vadd.f32 %v1784_v60, %v1705_v56 }
 0x166   : > { %v816_v24 = vpop.f32.mrf.mxu0  ;;  %1098 = vst [vmem:[#allocation2 + $0x1c0] sm:$0xff] %v3473_v16  ;;  %v1616_v46 = vadd.f32 %v1615_v4, %v3379_v27 }
 0x167   : > { %v3484_v25 = vadd.f32 %v3250_v50, %v816_v24  ;;  %v984_v43 = vpop.f32.mrf.mxu1  ;;  %v1707_v24 = vmul.f32 %v3387_v37, %v3387_v37  ;;  %v1786_v33 = vadd.f32 %v1785_v19, %v1706_v11 }
 0x168   : > { %v2723_v53 = vpop.f32.mrf.mxu0  ;;  %v3487_v48 = vadd.f32 %v3250_v50, %v984_v43  ;;  %v1617_v18 = vadd.f32 %v1616_v46, %v3387_v37  ;;  %v1708_v43 = vmul.f32 %v3395_v47, %v3395_v47 }
 0x169   : > { %1057 = vst [vmem:[#allocation2 + $0x250] sm:$0xff] %v3484_v25  ;;  %v2807_v62 = vpop.f32.mrf.mxu1  ;;  %v1787_v56 = vadd.f32 %v1786_v33, %v1707_v24 }
 0x16a   : > { %v821_v57 = vpop.f32.mrf.mxu0  ;;  %1099 = vst [vmem:[#allocation2 + $0x88] sm:$0xff] %v3487_v48  ;;  %v1618_v62 = vadd.f32 %v1617_v18, %v3395_v47 }
 0x16b   : > { %v3498_v39 = vadd.f32 %v3250_v50, %v821_v57  ;;  %v989_v20 = vpop.f32.mrf.mxu1  ;;  %v1709_v57 = vmul.f32 %v3403_v59, %v3403_v59  ;;  %v1788_v4 = vadd.f32 %v1787_v56, %v1708_v43 }
 0x16c   : > { %v2726_v6 = vpop.f32.mrf.mxu0  ;;  %v3501_v13 = vadd.f32 %v3250_v50, %v989_v20  ;;  %v1619_v11 = vadd.f32 %v1618_v62, %v3403_v59  ;;  %v1710_v20 = vmul.f32 %v3411_v7, %v3411_v7 }
 0x16d   : > { %1058 = vst [vmem:[#allocation2 + $0xb8] sm:$0xff] %v3498_v39  ;;  %v2810_v15 = vpop.f32.mrf.mxu1  ;;  %v1789_v24 = vadd.f32 %v1788_v4, %v1709_v57 }
 0x16e   : > { %v824_v28 = vpop.f32.mrf.mxu0  ;;  %1100 = vst [vmem:[#allocation2 + $0x230] sm:$0xff] %v3501_v13  ;;  %v1620_v15 = vadd.f32 %v1619_v11, %v3411_v7 }
 0x16f   : > { %v3512_v53 = vadd.f32 %v3250_v50, %v824_v28  ;;  %v992_v51 = vpop.f32.mrf.mxu1  ;;  %v1711_v28 = vmul.f32 %v3419_v23, %v3419_v23  ;;  %v1790_v18 = vadd.f32 %v1789_v24, %v1710_v20 }
 0x170   : > { %v2727_v27 = vpop.f32.mrf.mxu0  ;;  %v3515_v32 = vadd.f32 %v3250_v50, %v992_v51  ;;  %v1621_v43 = vadd.f32 %v1620_v15, %v3419_v23  ;;  %v1712_v51 = vmul.f32 %v3427_v38, %v3427_v38 }
 0x171   : > { %1059 = vst [vmem:[#allocation2 + $0x268] sm:$0xff] %v3512_v53  ;;  %v2811_v37 = vpop.f32.mrf.mxu1  ;;  %v1791_v57 = vadd.f32 %v1790_v18, %v1711_v28 }
 0x172   : > { %v829_v60 = vpop.f32.mrf.mxu0  ;;  %1101 = vst [vmem:[#allocation2 + $0x50] sm:$0xff] %v3515_v32  ;;  %v1622_v37 = vadd.f32 %v1621_v43, %v3427_v38 }
 0x173   : > { %v3526_v6 = vadd.f32 %v3250_v50, %v829_v60  ;;  %v997_v19 = vpop.f32.mrf.mxu1  ;;  %v1713_v60 = vmul.f32 %v3441_v63, %v3441_v63  ;;  %v1792_v23 = vadd.f32 %v1791_v57, %v1712_v51 }
 0x174   : > { %v2730_v47 = vpop.f32.mrf.mxu0  ;;  %v3529_v46 = vadd.f32 %v3250_v50, %v997_v19  ;;  %v1623_v20 = vadd.f32 %v1622_v37, %v3441_v63  ;;  %v1714_v19 = vmul.f32 %v3456_v34, %v3456_v34 }
 0x175   : > { %1060 = vst [vmem:[#allocation2 + $0xf8] sm:$0xff] %v3526_v6  ;;  %v2814_v59 = vpop.f32.mrf.mxu1  ;;  %v1793_v28 = vadd.f32 %v1792_v23, %v1713_v60 }
 0x176   : > { %v832_v33 = vpop.f32.mrf.mxu0  ;;  %1102 = vst [vmem:[#allocation2 + $0x150] sm:$0xff] %v3529_v46  ;;  %v1624_v59 = vadd.f32 %v1623_v20, %v3456_v34 }
 0x177   : > { %v833_v27 = vadd.f32 %v3250_v50, %v832_v33  ;;  %v1000_v56 = vpop.f32.mrf.mxu1  ;;  %v1715_v33 = vmul.f32 %v3470_v5, %v3470_v5  ;;  %v1794_v63 = vadd.f32 %v1793_v28, %v1714_v19 }
 0x178   : > { %v2731_v62 = vpop.f32.mrf.mxu0  ;;  %v3541_v7 = vadd.f32 %v3250_v50, %v1000_v56  ;;  %v1625_v51 = vadd.f32 %v1624_v59, %v3470_v5  ;;  %v1716_v56 = vmul.f32 %v3484_v25, %v3484_v25 }
 0x179   : > { %1061 = vst [vmem:[#allocation2 + $0x98] sm:$0xff] %v833_v27  ;;  %v2815_v4 = vpop.f32.mrf.mxu1  ;;  %v1795_v60 = vadd.f32 %v1794_v63, %v1715_v33 }
 0x17a   : > { %v837_v11 = vpop.f32.mrf.mxu0  ;;  %1103 = vst [vmem:[#allocation2 + $0x178] sm:$0xff] %v3541_v7  ;;  %v1626_v4 = vadd.f32 %v1625_v51, %v3484_v25 }
 0x17b   : > { %v838_v47 = vadd.f32 %v3250_v50, %v837_v11  ;;  %v1005_v24 = vpop.f32.mrf.mxu1  ;;  %v1717_v11 = vmul.f32 %v3498_v39, %v3498_v39  ;;  %v1796_v5 = vadd.f32 %v1795_v60, %v1716_v56 }
 0x17c   : > { %v2734_v15 = vpop.f32.mrf.mxu0  ;;  %v3552_v38 = vadd.f32 %v3250_v50, %v1005_v24  ;;  %v1627_v19 = vadd.f32 %v1626_v4, %v3498_v39  ;;  %v1718_v24 = vmul.f32 %v3512_v53, %v3512_v53 }
 0x17d   : > { %1062 = vst [vmem:[#allocation2 + $0xe0] sm:$0xff] %v838_v47  ;;  %v2818_v18 = vpop.f32.mrf.mxu1  ;;  %v1797_v33 = vadd.f32 %v1796_v5, %v1717_v11 }
 0x17e   : > { %v840_v43 = vpop.f32.mrf.mxu0  ;;  %1104 = vst [vmem:[#allocation2 + $0x240] sm:$0xff] %v3552_v38  ;;  %v1628_v18 = vadd.f32 %v1627_v19, %v3512_v53 }
 0x17f   : > { %v841_v62 = vadd.f32 %v3250_v50, %v840_v43  ;;  %v1008_v57 = vpop.f32.mrf.mxu1  ;;  %v1719_v43 = vmul.f32 %v3526_v6, %v3526_v6  ;;  %v1798_v39 = vadd.f32 %v1797_v33, %v1718_v24 }
 0x180   : > { %v2735_v37 = vpop.f32.mrf.mxu0  ;;  %v3563_v34 = vadd.f32 %v3250_v50, %v1008_v57  ;;  %v1629_v56 = vadd.f32 %v1628_v18, %v3526_v6  ;;  %v1720_v57 = vmul.f32 %v833_v27, %v833_v27 }
 0x181   : > { %1063 = vst [vmem:[#allocation2 + $0x198] sm:$0xff] %v841_v62  ;;  %v2819_v23 = vpop.f32.mrf.mxu1  ;;  %v1799_v53 = vadd.f32 %v1798_v39, %v1719_v43 }
 0x182   : > { %v845_v20 = vpop.f32.mrf.mxu0  ;;  %1105 = vst [vmem:[#allocation2 + $0x118] sm:$0xff] %v3563_v34  ;;  %v1630_v23 = vadd.f32 %v1629_v56, %v833_v27 }
 0x183   : > { %v846_v15 = vadd.f32 %v3250_v50, %v845_v20  ;;  %v1013_v28 = vpop.f32.mrf.mxu1  ;;  %v1721_v20 = vmul.f32 %v838_v47, %v838_v47 }
 0x184   : > { %v2738_v59 = vpop.f32.mrf.mxu0  ;;  %v3574_v25 = vadd.f32 %v3250_v50, %v1013_v28  ;;  %v1800_v28 = vadd.f32 %v1799_v53, %v1720_v57  ;;  %v1631_v24 = vadd.f32 %v1630_v23, %v838_v47 }
 0x185   : > { %1064 = vst [vmem:[#allocation2 + $0x1d0] sm:$0xff] %v846_v15  ;;  %v2822_v63 = vpop.f32.mrf.mxu1  ;;  %v1722_v59 = vmul.f32 %v841_v62, %v841_v62  ;;  %v1723_v43 = vmul.f32 %v846_v15, %v846_v15 }
 0x186   : > { %v848_v51 = vpop.f32.mrf.mxu0  ;;  %1106 = vst [vmem:[#allocation2 + $0x208] sm:$0xff] %v3574_v25 }
 0x187   : > { %v849_v37 = vadd.f32 %v3250_v50, %v848_v51  ;;  %v1016_v60 = vpop.f32.mrf.mxu1  ;;  %v1801_v51 = vadd.f32 %v1800_v28, %v1721_v20 }
 0x188   : > { %v2739_v4 = vpop.f32.mrf.mxu0  ;;  %v3583_v11 = vadd.f32 %v3250_v50, %v1016_v60  ;;  %v1632_v60 = vadd.f32 %v1631_v24, %v841_v62 }
 0x189   : > { %1065 = vst [vmem:[#allocation2 + $0x1e0] sm:$0xff] %v849_v37  ;;  %v2823_v5 = vpop.f32.mrf.mxu1  ;;  %v1802_v56 = vadd.f32 %v1801_v51, %v1722_v59  ;;  %v1724_v57 = vmul.f32 %v849_v37, %v849_v37 }
 0x18a   : > { %4154 = vst [vmem:[#allocation7_spill] sm:$0xff] %v3583_v11  ;;  %v853_v19 = vpop.f32.mrf.mxu0  ;;  %1107 = vst [vmem:[#allocation2 + $0x170] sm:$0xff] %v3583_v11  ;;  %v1633_v4 = vadd.f32 %v1632_v60, %v846_v15 }
 0x18b   : > { %v854_v6 = vadd.f32 %v3250_v50, %v853_v19  ;;  %v1021_v33 = vpop.f32.mrf.mxu1  ;;  %v1803_v5 = vadd.f32 %v1802_v56, %v1723_v43 }
 0x18c   : > { %v2742_v18 = vpop.f32.mrf.mxu0  ;;  %v3588_v63 = vadd.f32 %v3250_v50, %v1021_v33  ;;  %v1634_v19 = vadd.f32 %v1633_v4, %v849_v37 }
 0x18d   : > { %1066 = vst [vmem:[#allocation2 + $0x1a8] sm:$0xff] %v854_v6  ;;  %v2826_v27 = vpop.f32.mrf.mxu1  ;;  %v1725_v18 = vmul.f32 %v854_v6, %v854_v6  ;;  %v1804_v62 = vadd.f32 %v1803_v5, %v1724_v57 }
 0x18e   : > { %v856_v39 = vpop.f32.mrf.mxu0  ;;  %1108 = vst [vmem:[#allocation2 + $0x20] sm:$0xff] %v3588_v63  ;;  %v1635_v28 = vadd.f32 %v1634_v19, %v854_v6  ;;  %v1729_v6 = vmul.f32 %v3254_v55, %v3254_v55 }
 0x18f   : > { %v857_v47 = vadd.f32 %v3250_v50, %v856_v39  ;;  %v1024_v53 = vpop.f32.mrf.mxu1  ;;  %v1805_v11 = vadd.f32 %v1804_v62, %v1725_v18  ;;  %v1732_v18 = vmul.f32 %v3269_v17, %v3269_v17 }
 0x190   : > { %v2743_v23 = vpop.f32.mrf.mxu0 }
 0x191   : > { %1067 = vst [vmem:[#allocation2 + $0x228] sm:$0xff] %v857_v47  ;;  %v2827_v33 = vpop.f32.mrf.mxu1  ;;  %v1726_v24 = vmul.f32 %v857_v47, %v857_v47  ;;  %v1636_v59 = vadd.f32 %v1635_v28, %v857_v47  ;;  %v1730_v47 = vmul.f32 %v3259_v61, %v3259_v61 }
 0x192   : > { %v861_v20 = vpop.f32.mrf.mxu0 }
 0x193   : > { %v862_v27 = vadd.f32 %v3250_v50, %v861_v20  ;;  %v1806_v60 = vadd.f32 %v1805_v11, %v1726_v24 }
 0x194   : > { %v2746_v1 = vpop.f32.mrf.mxu0 }
 0x195   : > { %1068 = vst [vmem:[#allocation2] sm:$0xff] %v862_v27  ;;  %v1727_v15 = vmul.f32 %v862_v27, %v862_v27  ;;  %v1637_v39 = vadd.f32 %v1636_v59, %v862_v27 }
 0x196   : > { %v864_v51 = vpop.f32.mrf.mxu0 }
 0x197   : > { %v865_v43 = vadd.f32 %v3250_v50, %v864_v51  ;;  %v1807_v56 = vadd.f32 %v1806_v60, %v1727_v15  ;;  %v1731_v50 = vmul.f32 %v3264_v8, %v3264_v8 }
 0x198   : > { %v2747_v37 = vpop.f32.mrf.mxu0 }
 0x199   : > { %1069 = vst [vmem:[#allocation2 + $0x1b0] sm:$0xff] %v865_v43  ;;  %v1638_v4 = vadd.f32 %v1637_v39, %v865_v43  ;;  %v1728_v53 = vmul.f32 %v865_v43, %v865_v43 }
 0x19b   : > { %v1639_v57 = vadd.f32 %v1638_v4, %v3254_v55  ;;  %v1808_v1 = vadd.f32 %v1807_v56, %v1728_v53  ;;  %v1733_v55 = vmul.f32 %v3274_v26, %v3274_v26 }
 0x19d   : > { %v1640_v23 = vadd.f32 %v1639_v57, %v3259_v61  ;;  %v1809_v11 = vadd.f32 %v1808_v1, %v1729_v6  ;;  %v1734_v61 = vmul.f32 %v3279_v35, %v3279_v35 }
 0x19f   : > { %v1641_v5 = vadd.f32 %v1640_v23, %v3264_v8  ;;  %v1810_v19 = vadd.f32 %v1809_v11, %v1730_v47  ;;  %v1735_v8 = vmul.f32 %v3284_v44, %v3284_v44 }
 0x1a1   : > { %v1642_v33 = vadd.f32 %v1641_v5, %v3269_v17  ;;  %v1811_v20 = vadd.f32 %v1810_v19, %v1731_v50  ;;  %v1736_v17 = vmul.f32 %v3289_v54, %v3289_v54 }
 0x1a3   : > { %v1643_v62 = vadd.f32 %v1642_v33, %v3274_v26  ;;  %v1812_v28 = vadd.f32 %v1811_v20, %v1732_v18  ;;  %v1737_v26 = vmul.f32 %v3294_v2, %v3294_v2 }
 0x1a5   : > { %v1644_v24 = vadd.f32 %v1643_v62, %v3279_v35  ;;  %v1813_v27 = vadd.f32 %v1812_v28, %v1733_v55  ;;  %v1738_v35 = vmul.f32 %v3299_v12, %v3299_v12 }
 0x1a7   : > { %v1645_v59 = vadd.f32 %v1644_v24, %v3284_v44  ;;  %v1814_v15 = vadd.f32 %v1813_v27, %v1734_v61  ;;  %v1739_v44 = vmul.f32 %v3310_v22, %v3310_v22 }
 0x1a9   : > { %v1646_v51 = vadd.f32 %v1645_v59, %v3289_v54  ;;  %v1815_v60 = vadd.f32 %v1814_v15, %v1735_v8  ;;  %v1740_v54 = vmul.f32 %v3318_v29, %v3318_v29  ;;  %v1750_v15 = vmul.f32 %v3398_v52, %v3398_v52 }
 0x1ab   : > { %v1647_v39 = vadd.f32 %v1646_v51, %v3294_v2  ;;  %v1816_v43 = vadd.f32 %v1815_v60, %v1736_v17  ;;  %v1741_v2 = vmul.f32 %v3326_v36, %v3326_v36  ;;  %v1751_v60 = vmul.f32 %v3406_v0, %v3406_v0 }
 0x1ad   : > { %v1648_v37 = vadd.f32 %v1647_v39, %v3299_v12  ;;  %v1817_v56 = vadd.f32 %v1816_v43, %v1737_v26  ;;  %v1742_v12 = vmul.f32 %v3334_v42, %v3334_v42  ;;  %v1752_v39 = vmul.f32 %v3414_v14, %v3414_v14 }
 0x1af   : > { %v1818_v4 = vadd.f32 %v1817_v56, %v1738_v35  ;;  %v1649_v53 = vadd.f32 %v1648_v37, %v3310_v22  ;;  %v1743_v22 = vmul.f32 %v3342_v49, %v3342_v49  ;;  %v1753_v35 = vmul.f32 %v3422_v30, %v3422_v30 }
 0x1b0   : > { %v1754_v56 = vmul.f32 %v3430_v45, %v3430_v45 }
 0x1b1   : > { %v1650_v6 = vadd.f32 %v1649_v53, %v3318_v29  ;;  %v1819_v57 = vadd.f32 %v1818_v4, %v1739_v44  ;;  %v1744_v29 = vmul.f32 %v3350_v58, %v3350_v58  ;;  %v1755_v4 = vmul.f32 %v3444_v9, %v3444_v9 }
 0x1b2   : > { %v1109_v53 = vlaneseq }
 0x1b3   : > { %v1651_v1 = vadd.f32 %v1650_v6, %v3326_v36  ;;  %v1820_v47 = vadd.f32 %v1819_v57, %v1740_v54  ;;  %v1745_v36 = vmul.f32 %v3358_v3, %v3358_v3  ;;  %v1756_v6 = vmul.f32 %v3459_v40, %v3459_v40 }
 0x1b5   : > { %v1652_v23 = vadd.f32 %v1651_v1, %v3334_v42  ;;  %v1821_v11 = vadd.f32 %v1820_v47, %v1741_v2  ;;  %v1746_v42 = vmul.f32 %v3366_v10, %v3366_v10  ;;  %v1757_v2 = vmul.f32 %v3473_v16, %v3473_v16 }
 0x1b7   : > { %v1653_v50 = vadd.f32 %v1652_v23, %v3342_v49  ;;  %v1822_v5 = vadd.f32 %v1821_v11, %v1742_v12  ;;  %v1747_v49 = vmul.f32 %v3374_v21, %v3374_v21  ;;  %v1759_v11 = vmul.f32 %v3501_v13, %v3501_v13 }
 0x1b9   : > { %v1654_v19 = vadd.f32 %v1653_v50, %v3350_v58  ;;  %v1823_v18 = vadd.f32 %v1822_v5, %v1743_v22  ;;  %v1748_v58 = vmul.f32 %v3382_v31, %v3382_v31 }
 0x1bb   : > { %v1655_v33 = vadd.f32 %v1654_v19, %v3358_v3  ;;  %v1824_v20 = vadd.f32 %v1823_v18, %v1744_v29  ;;  %v1749_v3 = vmul.f32 %v3390_v41, %v3390_v41  ;;  %v1761_v19 = vmul.f32 %v3529_v46, %v3529_v46 }
 0x1bd   : > { %v1656_v55 = vadd.f32 %v1655_v33, %v3366_v10  ;;  %v1825_v62 = vadd.f32 %v1824_v20, %v1745_v36  ;;  %v4155_v36 = vmov 0.0  }
 0x1bf   : > { %v1657_v28 = vadd.f32 %v1656_v55, %v3374_v21  ;;  %v1826_v61 = vadd.f32 %v1825_v62, %v1746_v42 }
 0x1c1   : > { %v1658_v24 = vadd.f32 %v1657_v28, %v3382_v31  ;;  %v1827_v27 = vadd.f32 %v1826_v61, %v1747_v49 }
 0x1c3   : > { %v1659_v8 = vadd.f32 %v1658_v24, %v3390_v41  ;;  %v1828_v59 = vadd.f32 %v1827_v27, %v1748_v58  ;;  %v4156_v24 = vld [vmem:[#allocation7_spill] sm:$0xff] }
 0x1c5   : > { %v1660_v10 = vadd.f32 %v1659_v8, %v3398_v52  ;;  %v1829_v17 = vadd.f32 %v1828_v59, %v1749_v3 }
 0x1c7   : > { %v1830_v21 = vadd.f32 %v1829_v17, %v1750_v15  ;;  %v1661_v51 = vadd.f32 %v1660_v10, %v3406_v0 }
 0x1c9   : > { %v1831_v31 = vadd.f32 %v1830_v21, %v1751_v60  ;;  %v1662_v26 = vadd.f32 %v1661_v51, %v3414_v14 }
 0x1cb   : > { %v1832_v41 = vadd.f32 %v1831_v31, %v1752_v39  ;;  %v1663_v43 = vadd.f32 %v1662_v26, %v3422_v30 }
 0x1cd   : > { %v1833_v52 = vadd.f32 %v1832_v41, %v1753_v35  ;;  %v1664_v37 = vadd.f32 %v1663_v43, %v3430_v45  ;;  %v1110_v45 = vshrl.u32 %v1109_v53, 7  ;;  %v1686_v43 = vld [vmem:[#allocation4] sm:$0x1] }
 0x1cf   : > { %v1834_v44 = vadd.f32 %v1833_v52, %v1754_v56  ;;  %v1665_v0 = vadd.f32 %v1664_v37, %v3444_v9  ;;  %v1758_v9 = vmul.f32 %v3487_v48, %v3487_v48 }
 0x1d1   : > { %v1835_v14 = vadd.f32 %v1834_v44, %v1755_v4  ;;  %v1666_v54 = vadd.f32 %v1665_v0, %v3459_v40  ;;  %v1190_v40 = vadd.s32 640, %v1110_v45 }
 0x1d3   : > { %v1836_v30 = vadd.f32 %v1835_v14, %v1756_v6  ;;  %v1667_v57 = vadd.f32 %v1666_v54, %v3473_v16  ;;  %v1760_v16 = vmul.f32 %v3515_v32, %v3515_v32  ;;  %vm1353_vm1 = vcmp.lt.s32.totalorder %v1190_v40, 642 }
 0x1d4   : > { %v2591_v33 = vsel %vm1353_vm1, 1.0, %v4155_v36 }
 0x1d5   : > { %v1837_v1 = vadd.f32 %v1836_v30, %v1757_v2  ;;  %v1668_v47 = vadd.f32 %v1667_v57, %v3487_v48  ;;  %v1596_v49 = vmul.f32 %v2591_v33, %v3588_v63 }
 0x1d7   : > { %v1838_v12 = vadd.f32 %v1837_v1, %v1758_v9  ;;  %v1669_v23 = vadd.f32 %v1668_v47, %v3501_v13  ;;  %v1762_v13 = vmul.f32 %v3541_v7, %v3541_v7  ;;  %v1767_v3 = vmul.f32 %v1596_v49, %v1596_v49 }
 0x1d9   : > { %v1839_v22 = vadd.f32 %v1838_v12, %v1759_v11  ;;  %v1670_v50 = vadd.f32 %v1669_v23, %v3515_v32  ;;  %v1763_v32 = vmul.f32 %v3552_v38, %v3552_v38 }
 0x1db   : > { %v1840_v5 = vadd.f32 %v1839_v22, %v1760_v16  ;;  %v1671_v29 = vadd.f32 %v1670_v50, %v3529_v46  ;;  %v1764_v46 = vmul.f32 %v3563_v34, %v3563_v34 }
 0x1dd   : > { %v1841_v48 = vadd.f32 %v1840_v5, %v1761_v19  ;;  %v1672_v18 = vadd.f32 %v1671_v29, %v3541_v7  ;;  %v1765_v7 = vmul.f32 %v3574_v25, %v3574_v25 }
 0x1df   : > { %v1842_v20 = vadd.f32 %v1841_v48, %v1762_v13  ;;  %v1673_v42 = vadd.f32 %v1672_v18, %v3552_v38  ;;  %v1766_v38 = vmul.f32 %v4156_v24, %v4156_v24 }
 0x1e1   : > { %v1843_v55 = vadd.f32 %v1842_v20, %v1763_v32  ;;  %v1674_v62 = vadd.f32 %v1673_v42, %v3563_v34 }
 0x1e3   : > { %v1844_v28 = vadd.f32 %v1843_v55, %v1764_v46  ;;  %v1675_v61 = vadd.f32 %v1674_v62, %v3574_v25  ;;  %v1597_v25 = vld [vmem:[#allocation3] sm:$0x1] }
 0x1e5   : > { %v1845_v58 = vadd.f32 %v1844_v28, %v1765_v7  ;;  %v1676_v27 = vadd.f32 %v1675_v61, %v4156_v24 }
 0x1e7   : > { %v1846_v8 = vadd.f32 %v1845_v58, %v1766_v38  ;;  %v1677_v59 = vadd.f32 %v1676_v27, %v1596_v49 }
 0x1e9   : > { %v1678_v10 = vrot.slane %v1677_v59, 4  ;;  %v1847_v15 = vadd.f32 %v1846_v8, %v1767_v3 }
 0x1eb   : > { %v1679_v34 = vadd.f32 %v1678_v10, %v1677_v59  ;;  %v1848_v17 = vrot.slane %v1847_v15, 4 }
 0x1ed   : > { %v1680_v63 = vrot.slane %v1679_v34, 2  ;;  %v1849_v21 = vadd.f32 %v1848_v17, %v1847_v15 }
 0x1ef   : > { %v1681_v51 = vadd.f32 %v1680_v63, %v1679_v34  ;;  %v1850_v60 = vrot.slane %v1849_v21, 2 }
 0x1f1   : > { %v1682_v31 = vrot.slane %v1681_v51, 1  ;;  %v1851_v26 = vadd.f32 %v1850_v60, %v1849_v21 }
 0x1f3   : > { %v1683_v39 = vadd.f32 %v1682_v31, %v1681_v51  ;;  %v1852_v41 = vrot.slane %v1851_v26, 1 }
 0x1f5   : > { %v1684_v35 = vadd.f32 %v1683_v39, %v1597_v25  ;;  %v1853_v52 = vadd.f32 %v1852_v41, %v1851_v26 }
 0x1f7   : > { %1685 = vst [vmem:[#allocation3] sm:$0x1] %v1684_v35  ;;  %v1854_v37 = vadd.f32 %v1853_v52, %v1686_v43 }
 0x1f9   : > { %1855 = vst [vmem:[#allocation4] sm:$0x1] %v1854_v37 }
 0x1fa PF: > { %p2592_p5 = scmp.ne.s32.totalorder %s2937_s18, 1 }
 0x1fc   : > { %1859 = sbr.rel (%p2592_p5) target bundleno = 652 (0x28c), region = 52 }
 0x201   : > { %v1864_v56 = vld [vmem:[#allocation3] sm:$0x1]  ;;  %v1866_v44 = vld [vmem:[#allocation4] sm:$0x1]  ;;  %v1871_v30 = vld [vmem:[%s4148_s3] sm:$0x1] }
 0x202   : > { %v1865_v0 = vmul.f32 0.0015576323, %v1864_v56  ;;  %v1867_v4 = vmul.f32 0.0015576323, %v1866_v44  ;;  %v1876_v45 = vld [vmem:[%s4149_s4] sm:$0x1] }
 0x203   : > { %v1881_v9 = vld [vmem:[#allocation2 + $0xc8] sm:$0xff]  ;;  %v1883_v23 = vld [vmem:[#allocation2 + $0x40] sm:$0xff]  ;;  %v1886_v22 = vld [vmem:[#allocation2 + $0xf0] sm:$0xff] }
 0x204   : > { %v1868_v53 = vmul.f32 %v1865_v0, %v1865_v0  ;;  %v1882_v12 = vld [vmem:[#allocation2 + $0x8] sm:$0xff]  ;;  %v1887_v50 = vld [vmem:[#allocation2 + $0x70] sm:$0xff]  ;;  %v1888_v16 = vld [vmem:[#allocation2 + $0x120] sm:$0xff] }
 0x205   : > { %v1884_v11 = vld [vmem:[#allocation2 + $0x28] sm:$0xff]  ;;  %v1889_v5 = vld [vmem:[#allocation2 + $0xd8] sm:$0xff]  ;;  %v1893_v13 = vld [vmem:[#allocation2 + $0x220] sm:$0xff] }
 0x206   : > { %v1869_v14 = vsub.f32 %v1867_v4, %v1868_v53  ;;  %v1885_v40 = vld [vmem:[#allocation2 + $0xe8] sm:$0xff]  ;;  %v1891_v19 = vld [vmem:[#allocation2 + $0x158] sm:$0xff]  ;;  %v1894_v32 = vld [vmem:[#allocation2 + $0xc0] sm:$0xff] }
 0x207   : > { %v1890_v29 = vld [vmem:[#allocation2 + $0x148] sm:$0xff]  ;;  %v1895_v55 = vld [vmem:[#allocation2 + $0x140] sm:$0xff] }
 0x208   : > { %v1870_v54 = vmax.f32 %v1869_v14, 0.0  ;;  %v1892_v18 = vld [vmem:[#allocation2 + $0x108] sm:$0xff]  ;;  %v1896_v62 = vld [vmem:[#allocation2 + $0x200] sm:$0xff] }
 0x20a   : > { %v1872_v6 = vadd.f32 1e-05, %v1870_v54 }
 0x20c   : > { %2919 = vrsqrt.f32 %v1872_v6 }
 0x219   : > { %v2920_v57 = vpop.eup %2919 }
 0x21a   : > { %v1874_v2 = vmul.f32 %v2920_v57, %v1871_v30 }
 0x21c   : > { %1875 = vst [vmem:[#allocation5] sm:$0x1] %v1874_v2  ;;  %v1877_v1 = vmul.f32 %v1874_v2, %v1865_v0 }
 0x21e   : > { %v1878_v47 = vsub.f32 %v1876_v45, %v1877_v1 }
 0x220   : > { %1879 = vst [vmem:[#allocation6] sm:$0x1] %v1878_v47 }
 0x223   : > { %v3717_v48 = vld [vmem:[#allocation5] ss:$0 sm:$0xff] }
 0x224   : > { %v1969_v36 = vmul.f32 %v3717_v48, %v1881_v9  ;;  %v1970_v33 = vmul.f32 %v3717_v48, %v1882_v12  ;;  %v1971_v20 = vmul.f32 %v3717_v48, %v1883_v23  ;;  %v1972_v42 = vmul.f32 %v3717_v48, %v1884_v11  ;;  %v1897_v9 = vld [vmem:[#allocation2 + $0x80] sm:$0xff] }
 0x225   : > { %v1973_v46 = vmul.f32 %v3717_v48, %v1885_v40  ;;  %v1974_v49 = vmul.f32 %v3717_v48, %v1886_v22  ;;  %v1975_v28 = vmul.f32 %v3717_v48, %v1887_v50  ;;  %v1976_v61 = vmul.f32 %v3717_v48, %v1888_v16 }
 0x226   : > { %v1977_v7 = vmul.f32 %v3717_v48, %v1889_v5  ;;  %v1978_v58 = vmul.f32 %v3717_v48, %v1890_v29  ;;  %v1979_v24 = vmul.f32 %v3717_v48, %v1891_v19  ;;  %v1980_v27 = vmul.f32 %v3717_v48, %v1892_v18  ;;  %v1898_v19 = vld [vmem:[#allocation2 + $0x30] sm:$0xff] }
 0x227   : > { %v3731_v38 = vld [vmem:[#allocation6] ss:$0 sm:$0xff]  ;;  %v1981_v3 = vmul.f32 %v3717_v48, %v1893_v13  ;;  %v3735_v8 = vmul.f32 %v3717_v48, %v1894_v32  ;;  %v3738_v59 = vmul.f32 %v3717_v48, %v1895_v55  ;;  %v3741_v10 = vmul.f32 %v3717_v48, %v1896_v62 }
 0x228   : > { %v2057_v15 = vadd.f32 %v3731_v38, %v1969_v36  ;;  %v2058_v34 = vadd.f32 %v3731_v38, %v1970_v33  ;;  %v2059_v17 = vadd.f32 %v3731_v38, %v1971_v20  ;;  %v2060_v63 = vadd.f32 %v3731_v38, %v1972_v42  ;;  %v1899_v20 = vld [vmem:[#allocation2 + $0x10] sm:$0xff]  ;;  %v1900_v42 = vld [vmem:[#allocation2 + $0x160] sm:$0xff] }
 0x229   : > { %v2061_v21 = vadd.f32 %v3731_v38, %v1973_v46  ;;  %v2062_v51 = vadd.f32 %v3731_v38, %v1974_v49  ;;  %v2063_v60 = vadd.f32 %v3731_v38, %v1975_v28  ;;  %v2064_v31 = vadd.f32 %v3731_v38, %v1976_v61  ;;  %v1901_v28 = vld [vmem:[#allocation2 + $0x1d8] sm:$0xff]  ;;  %v1902_v61 = vld [vmem:[#allocation2 + $0x1a0] sm:$0xff] }
 0x22a   : > { %vm2138_vm2 = vcmp.ge.f32.partialorder %v2057_v15, 0.0  ;;  %v2219_v26 = vmul.f32 0.2, %v2057_v15  ;;  %vm2139_vm3 = vcmp.ge.f32.partialorder %v2058_v34, 0.0  ;;  %v2220_v25 = vmul.f32 0.2, %v2058_v34 }
 0x22b   : > { %vm2140_vm4 = vcmp.ge.f32.partialorder %v2059_v17, 0.0  ;;  %v2221_v39 = vmul.f32 0.2, %v2059_v17  ;;  %vm2141_vm5 = vcmp.ge.f32.partialorder %v2060_v63, 0.0  ;;  %v2222_v41 = vmul.f32 0.2, %v2060_v63 }
 0x22c   : > { %v2300_v43 = vsel %vm2138_vm2, %v2057_v15, %v2219_v26  ;;  %v2301_v35 = vsel %vm2139_vm3, %v2058_v34, %v2220_v25  ;;  %vm2142_vm6 = vcmp.ge.f32.partialorder %v2061_v21, 0.0  ;;  %v2223_v52 = vmul.f32 0.2, %v2061_v21  ;;  %v1905_v26 = vld [vmem:[#allocation2 + $0x190] sm:$0xff] }
 0x22d   : > { %2381 = vst [vmem:[%s4150_s5] sm:$0xff] %v2300_v43  ;;  %2382 = vst [vmem:[%s4150_s5 + $0x8] sm:$0xff] %v2301_v35  ;;  %v2302_v37 = vsel %vm2140_vm4, %v2059_v17, %v2221_v39  ;;  %v2303_v56 = vsel %vm2141_vm5, %v2060_v63, %v2222_v41  ;;  %vm2143_vm7 = vcmp.ge.f32.partialorder %v2062_v51, 0.0  ;;  %v2224_v44 = vmul.f32 0.2, %v2062_v51 }
 0x22e   : > { %2383 = vst [vmem:[%s4150_s5 + $0x10] sm:$0xff] %v2302_v37  ;;  %2384 = vst [vmem:[%s4150_s5 + $0x18] sm:$0xff] %v2303_v56  ;;  %v2304_v0 = vsel %vm2142_vm6, %v2061_v21, %v2223_v52  ;;  %vm2144_vm8 = vcmp.ge.f32.partialorder %v2063_v60, 0.0  ;;  %v2225_v4 = vmul.f32 0.2, %v2063_v60  ;;  %vm2145_vm9 = vcmp.ge.f32.partialorder %v2064_v31, 0.0 }
 0x22f   : > { %2385 = vst [vmem:[%s4150_s5 + $0x20] sm:$0xff] %v2304_v0  ;;  %v2305_v53 = vsel %vm2143_vm7, %v2062_v51, %v2224_v44  ;;  %v2226_v14 = vmul.f32 0.2, %v2064_v31  ;;  %v2065_v54 = vadd.f32 %v3731_v38, %v1977_v7  ;;  %v2066_v6 = vadd.f32 %v3731_v38, %v1978_v58 }
 0x230   : > { %2386 = vst [vmem:[%s4150_s5 + $0x28] sm:$0xff] %v2305_v53  ;;  %v2306_v30 = vsel %vm2144_vm8, %v2063_v60, %v2225_v4  ;;  %v2067_v57 = vadd.f32 %v3731_v38, %v1979_v24  ;;  %v2068_v2 = vadd.f32 %v3731_v38, %v1980_v27  ;;  %v2069_v45 = vadd.f32 %v3731_v38, %v1981_v3  ;;  %v1903_v3 = vld [vmem:[#allocation2 + $0x248] sm:$0xff] }
 0x231   : > { %2387 = vst [vmem:[%s4150_s5 + $0x30] sm:$0xff] %v2306_v30  ;;  %v2307_v1 = vsel %vm2145_vm9, %v2064_v31, %v2226_v14  ;;  %vm2146_vm10 = vcmp.ge.f32.partialorder %v2065_v54, 0.0  ;;  %v2227_v47 = vmul.f32 0.2, %v2065_v54  ;;  %vm2147_vm11 = vcmp.ge.f32.partialorder %v2066_v6, 0.0  ;;  %v1904_v31 = vld [vmem:[#allocation2 + $0x218] sm:$0xff] }
 0x232   : > { %2388 = vst [vmem:[%s4150_s5 + $0x38] sm:$0xff] %v2307_v1  ;;  %v2228_v12 = vmul.f32 0.2, %v2066_v6  ;;  %vm2148_vm12 = vcmp.ge.f32.partialorder %v2067_v57, 0.0  ;;  %v2229_v23 = vmul.f32 0.2, %v2067_v57  ;;  %v2070_v5 = vadd.f32 %v3731_v38, %v3735_v8 }
 0x233   : > { %vm2149_vm13 = vcmp.ge.f32.partialorder %v2068_v2, 0.0  ;;  %v2308_v11 = vsel %vm2146_vm10, %v2065_v54, %v2227_v47  ;;  %v2230_v40 = vmul.f32 0.2, %v2068_v2  ;;  %vm2150_vm14 = vcmp.ge.f32.partialorder %v2069_v45, 0.0  ;;  %v1906_v4 = vld [vmem:[#allocation2 + $0x48] sm:$0xff] }
 0x234   : > { %v2231_v22 = vmul.f32 0.2, %v2069_v45  ;;  %2389 = vst [vmem:[%s4150_s5 + $0x40] sm:$0xff] %v2308_v11  ;;  %v2309_v50 = vsel %vm2147_vm11, %v2066_v6, %v2228_v12  ;;  %v2310_v16 = vsel %vm2148_vm12, %v2067_v57, %v2229_v23  ;;  %v2071_v29 = vadd.f32 %v3731_v38, %v3738_v59  ;;  %v1907_v53 = vld [vmem:[#allocation2 + $0x68] sm:$0xff]  ;;  %v1910_v23 = vld [vmem:[#allocation2 + $0x250] sm:$0xff]  ;;  %v1911_v11 = vld [vmem:[#allocation2 + $0xb8] sm:$0xff] }
 0x235   : > { %2390 = vst [vmem:[%s4150_s5 + $0x48] sm:$0xff] %v2309_v50  ;;  %2391 = vst [vmem:[%s4150_s5 + $0x50] sm:$0xff] %v2310_v16  ;;  %v2311_v18 = vsel %vm2149_vm13, %v2068_v2, %v2230_v40  ;;  %v2072_v36 = vadd.f32 %v3731_v38, %v3741_v10  ;;  %v1985_v33 = vmul.f32 %v3717_v48, %v1897_v9  ;;  %vm2151_vm15 = vcmp.ge.f32.partialorder %v2070_v5, 0.0  ;;  %v1908_v2 = vld [vmem:[#allocation2 + $0x238] sm:$0xff]  ;;  %v1909_v12 = vld [vmem:[#allocation2 + $0x188] sm:$0xff] }
 0x236   : > { %v2312_v13 = vsel %vm2150_vm14, %v2069_v45, %v2231_v22  ;;  %2392 = vst [vmem:[%s4150_s5 + $0x58] sm:$0xff] %v2311_v18  ;;  %v2232_v32 = vmul.f32 0.2, %v2070_v5  ;;  %vm2152_vm0 = vcmp.ge.f32.partialorder %v2071_v29, 0.0  ;;  %v2233_v55 = vmul.f32 0.2, %v2071_v29 }
 0x237   : > { %2393 = vst [vmem:[%s4150_s5 + $0x60] sm:$0xff] %v2312_v13  ;;  %vm2153_vm1 = vcmp.ge.f32.partialorder %v2072_v36, 0.0  ;;  %v2234_v62 = vmul.f32 0.2, %v2072_v36  ;;  %v2073_v46 = vadd.f32 %v3731_v38, %v1985_v33  ;;  %v1986_v49 = vmul.f32 %v3717_v48, %v1898_v19  ;;  %v1912_v33 = vld [vmem:[#allocation2 + $0x268] sm:$0xff] }
 0x238   : > { %v2313_v7 = vsel %vm2151_vm15, %v2070_v5, %v2232_v32  ;;  %v2314_v58 = vsel %vm2152_vm0, %v2071_v29, %v2233_v55  ;;  %v1987_v24 = vmul.f32 %v3717_v48, %v1899_v20  ;;  %v1988_v27 = vmul.f32 %v3717_v48, %v1900_v42  ;;  %v1913_v20 = vld [vmem:[#allocation2 + $0xf8] sm:$0xff] }
 0x239   : > { %2394 = vst [vmem:[%s4150_s5 + $0x68] sm:$0xff] %v2313_v7  ;;  %2395 = vst [vmem:[%s4150_s5 + $0x70] sm:$0xff] %v2314_v58  ;;  %v2315_v8 = vsel %vm2153_vm1, %v2072_v36, %v2234_v62  ;;  %vm2154_vm2 = vcmp.ge.f32.partialorder %v2073_v46, 0.0  ;;  %v2235_v59 = vmul.f32 0.2, %v2073_v46  ;;  %v2074_v10 = vadd.f32 %v3731_v38, %v1986_v49 }
 0x23a   : > { %2396 = vst [vmem:[%s4150_s5 + $0x78] sm:$0xff] %v2315_v8  ;;  %v2075_v15 = vadd.f32 %v3731_v38, %v1987_v24  ;;  %v2076_v34 = vadd.f32 %v3731_v38, %v1988_v27  ;;  %v1989_v17 = vmul.f32 %v3717_v48, %v1901_v28  ;;  %v1990_v63 = vmul.f32 %v3717_v48, %v1902_v61  ;;  %v1915_v8 = vld [vmem:[#allocation2 + $0xe0] sm:$0xff] }
 0x23b   : > { %v2316_v21 = vsel %vm2154_vm2, %v2073_v46, %v2235_v59  ;;  %vm2155_vm3 = vcmp.ge.f32.partialorder %v2074_v10, 0.0  ;;  %v2236_v51 = vmul.f32 0.2, %v2074_v10  ;;  %v1991_v60 = vmul.f32 %v3717_v48, %v1903_v3  ;;  %v1914_v3 = vld [vmem:[#allocation2 + $0x98] sm:$0xff] }
 0x23c   : > { %2397 = vst [vmem:[%s4150_s5 + $0x80] sm:$0xff] %v2316_v21  ;;  %vm2156_vm4 = vcmp.ge.f32.partialorder %v2075_v15, 0.0  ;;  %v2237_v25 = vmul.f32 0.2, %v2075_v15  ;;  %vm2157_vm5 = vcmp.ge.f32.partialorder %v2076_v34, 0.0  ;;  %v2077_v43 = vadd.f32 %v3731_v38, %v1989_v17  ;;  %v1916_v21 = vld [vmem:[#allocation2 + $0x198] sm:$0xff] }
 0x23d   : > { %v2238_v39 = vmul.f32 0.2, %v2076_v34  ;;  %v2317_v41 = vsel %vm2155_vm3, %v2074_v10, %v2236_v51  ;;  %v2078_v35 = vadd.f32 %v3731_v38, %v1990_v63  ;;  %v2079_v52 = vadd.f32 %v3731_v38, %v1991_v60 }
 0x23e   : > { %2398 = vst [vmem:[%s4150_s5 + $0x88] sm:$0xff] %v2317_v41  ;;  %v2318_v37 = vsel %vm2156_vm4, %v2075_v15, %v2237_v25  ;;  %v1992_v44 = vmul.f32 %v3717_v48, %v1904_v31  ;;  %v1993_v0 = vmul.f32 %v3717_v48, %v1905_v26  ;;  %vm2158_vm6 = vcmp.ge.f32.partialorder %v2077_v43, 0.0  ;;  %v1917_v25 = vld [vmem:[#allocation2 + $0x1d0] sm:$0xff]  ;;  %v1919_v41 = vld [vmem:[#allocation2 + $0x1a8] sm:$0xff] }
 0x23f   : > { %v2319_v56 = vsel %vm2157_vm5, %v2076_v34, %v2238_v39  ;;  %2399 = vst [vmem:[%s4150_s5 + $0x90] sm:$0xff] %v2318_v37  ;;  %v2239_v14 = vmul.f32 0.2, %v2077_v43  ;;  %vm2159_vm7 = vcmp.ge.f32.partialorder %v2078_v35, 0.0  ;;  %v2240_v54 = vmul.f32 0.2, %v2078_v35 }
 0x240   : > { %2400 = vst [vmem:[%s4150_s5 + $0x98] sm:$0xff] %v2319_v56  ;;  %vm2160_vm8 = vcmp.ge.f32.partialorder %v2079_v52, 0.0  ;;  %v2241_v6 = vmul.f32 0.2, %v2079_v52  ;;  %v2080_v30 = vadd.f32 %v3731_v38, %v1992_v44  ;;  %v2081_v57 = vadd.f32 %v3731_v38, %v1993_v0  ;;  %v1918_v39 = vld [vmem:[#allocation2 + $0x1e0] sm:$0xff] }
 0x241   : > { %v2320_v45 = vsel %vm2158_vm6, %v2077_v43, %v2239_v14  ;;  %v2321_v1 = vsel %vm2159_vm7, %v2078_v35, %v2240_v54  ;;  %v1994_v47 = vmul.f32 %v3717_v48, %v1906_v4  ;;  %v1995_v9 = vmul.f32 %v3717_v48, %v1907_v53  ;;  %v1920_v54 = vld [vmem:[#allocation2 + $0x228] sm:$0xff] }
 0x242   : > { %2401 = vst [vmem:[%s4150_s5 + $0xa0] sm:$0xff] %v2320_v45  ;;  %2402 = vst [vmem:[%s4150_s5 + $0xa8] sm:$0xff] %v2321_v1  ;;  %v2322_v40 = vsel %vm2160_vm8, %v2079_v52, %v2241_v6  ;;  %vm2161_vm9 = vcmp.ge.f32.partialorder %v2080_v30, 0.0  ;;  %v2242_v22 = vmul.f32 0.2, %v2080_v30  ;;  %vm2162_vm10 = vcmp.ge.f32.partialorder %v2081_v57, 0.0 }
 0x243   : > { %2403 = vst [vmem:[%s4150_s5 + $0xb0] sm:$0xff] %v2322_v40  ;;  %v2243_v50 = vmul.f32 0.2, %v2081_v57  ;;  %v2082_v16 = vadd.f32 %v3731_v38, %v1994_v47  ;;  %v2083_v5 = vadd.f32 %v3731_v38, %v1995_v9  ;;  %v1996_v29 = vmul.f32 %v3717_v48, %v1908_v2  ;;  %v1921_v6 = vld [vmem:[#allocation2] sm:$0xff] }
 0x244   : > { %v2323_v19 = vsel %vm2161_vm9, %v2080_v30, %v2242_v22  ;;  %v1997_v18 = vmul.f32 %v3717_v48, %v1909_v12  ;;  %v1998_v13 = vmul.f32 %v3717_v48, %v1910_v23  ;;  %v1999_v36 = vmul.f32 %v3717_v48, %v1911_v11 }
 0x245   : > { %2404 = vst [vmem:[%s4150_s5 + $0xb8] sm:$0xff] %v2323_v19  ;;  %v2324_v42 = vsel %vm2162_vm10, %v2081_v57, %v2243_v50  ;;  %vm2163_vm11 = vcmp.ge.f32.partialorder %v2082_v16, 0.0  ;;  %v2244_v32 = vmul.f32 0.2, %v2082_v16  ;;  %vm2164_vm12 = vcmp.ge.f32.partialorder %v2083_v5, 0.0  ;;  %v1922_v50 = vld [vmem:[#allocation2 + $0x1b0] sm:$0xff] }
 0x246   : > { %2405 = vst [vmem:[%s4150_s5 + $0xc0] sm:$0xff] %v2324_v42  ;;  %v2245_v55 = vmul.f32 0.2, %v2083_v5  ;;  %v2084_v62 = vadd.f32 %v3731_v38, %v1996_v29  ;;  %v2085_v46 = vadd.f32 %v3731_v38, %v1997_v18  ;;  %v2086_v49 = vadd.f32 %v3731_v38, %v1998_v13 }
 0x247   : > { %v2325_v28 = vsel %vm2163_vm11, %v2082_v16, %v2244_v32  ;;  %v2087_v61 = vadd.f32 %v3731_v38, %v1999_v36  ;;  %v2000_v7 = vmul.f32 %v3717_v48, %v1912_v33  ;;  %v2001_v58 = vmul.f32 %v3717_v48, %v1913_v20  ;;  %v1923_v16 = vld [vmem:[#allocation2 + $0x90] sm:$0xff] }
 0x248   : > { %2406 = vst [vmem:[%s4150_s5 + $0xc8] sm:$0xff] %v2325_v28  ;;  %v2326_v24 = vsel %vm2164_vm12, %v2083_v5, %v2245_v55  ;;  %vm2165_vm13 = vcmp.ge.f32.partialorder %v2084_v62, 0.0  ;;  %v2246_v27 = vmul.f32 0.2, %v2084_v62  ;;  %vm2166_vm14 = vcmp.ge.f32.partialorder %v2085_v46, 0.0  ;;  %v1924_v33 = vld [vmem:[#allocation2 + $0x270] sm:$0xff] }
 0x249   : > { %2407 = vst [vmem:[%s4150_s5 + $0xd0] sm:$0xff] %v2326_v24  ;;  %v2247_v59 = vmul.f32 0.2, %v2085_v46  ;;  %vm2167_vm15 = vcmp.ge.f32.partialorder %v2086_v49, 0.0  ;;  %v2248_v10 = vmul.f32 0.2, %v2086_v49  ;;  %v2088_v17 = vadd.f32 %v3731_v38, %v2000_v7 }
 0x24a   : > { %vm2168_vm0 = vcmp.ge.f32.partialorder %v2087_v61, 0.0  ;;  %v2327_v15 = vsel %vm2165_vm13, %v2084_v62, %v2246_v27  ;;  %v2249_v34 = vmul.f32 0.2, %v2087_v61  ;;  %v2089_v63 = vadd.f32 %v3731_v38, %v2001_v58  ;;  %v1925_v62 = vld [vmem:[#allocation2 + $0x1e8] sm:$0xff] }
 0x24b   : > { %2408 = vst [vmem:[%s4150_s5 + $0xd8] sm:$0xff] %v2327_v15  ;;  %v2328_v51 = vsel %vm2166_vm14, %v2085_v46, %v2247_v59  ;;  %v2329_v60 = vsel %vm2167_vm15, %v2086_v49, %v2248_v10  ;;  %v2002_v31 = vmul.f32 %v3717_v48, %v1914_v3  ;;  %v2003_v26 = vmul.f32 %v3717_v48, %v1915_v8  ;;  %v1926_v46 = vld [vmem:[#allocation2 + $0x38] sm:$0xff]  ;;  %v1927_v49 = vld [vmem:[#allocation2 + $0x1c8] sm:$0xff] }
 0x24c   : > { %2409 = vst [vmem:[%s4150_s5 + $0xe0] sm:$0xff] %v2328_v51  ;;  %2410 = vst [vmem:[%s4150_s5 + $0xe8] sm:$0xff] %v2329_v60  ;;  %v2330_v43 = vsel %vm2168_vm0, %v2087_v61, %v2249_v34  ;;  %vm2169_vm1 = vcmp.ge.f32.partialorder %v2088_v17, 0.0  ;;  %v2250_v35 = vmul.f32 0.2, %v2088_v17  ;;  %vm2170_vm2 = vcmp.ge.f32.partialorder %v2089_v63, 0.0 }
 0x24d   : > { %2411 = vst [vmem:[%s4150_s5 + $0xf0] sm:$0xff] %v2330_v43  ;;  %v2251_v52 = vmul.f32 0.2, %v2089_v63  ;;  %v2090_v37 = vadd.f32 %v3731_v38, %v2002_v31  ;;  %v2091_v56 = vadd.f32 %v3731_v38, %v2003_v26  ;;  %v2004_v44 = vmul.f32 %v3717_v48, %v1916_v21  ;;  %v1928_v15 = vld [vmem:[#allocation2 + $0x18] sm:$0xff] }
 0x24e   : > { %v2331_v0 = vsel %vm2169_vm1, %v2088_v17, %v2250_v35  ;;  %v2005_v4 = vmul.f32 %v3717_v48, %v1917_v25  ;;  %v2006_v53 = vmul.f32 %v3717_v48, %v1918_v39  ;;  %v2007_v14 = vmul.f32 %v3717_v48, %v1919_v41  ;;  %v1929_v34 = vld [vmem:[#allocation2 + $0x58] sm:$0xff] }
 0x24f   : > { %2412 = vst [vmem:[%s4150_s5 + $0xf8] sm:$0xff] %v2331_v0  ;;  %v2332_v30 = vsel %vm2170_vm2, %v2089_v63, %v2251_v52  ;;  %vm2171_vm3 = vcmp.ge.f32.partialorder %v2090_v37, 0.0  ;;  %v2252_v57 = vmul.f32 0.2, %v2090_v37  ;;  %vm2172_vm4 = vcmp.ge.f32.partialorder %v2091_v56, 0.0  ;;  %v1930_v52 = vld [vmem:[#allocation2 + $0x168] sm:$0xff] }
 0x250   : > { %2413 = vst [vmem:[%s4150_s5 + $0x100] sm:$0xff] %v2332_v30  ;;  %v2253_v2 = vmul.f32 0.2, %v2091_v56  ;;  %v2092_v45 = vadd.f32 %v3731_v38, %v2004_v44  ;;  %v2093_v1 = vadd.f32 %v3731_v38, %v2005_v4  ;;  %v2094_v47 = vadd.f32 %v3731_v38, %v2006_v53 }
 0x251   : > { %v2333_v9 = vsel %vm2171_vm3, %v2090_v37, %v2252_v57  ;;  %v2095_v12 = vadd.f32 %v3731_v38, %v2007_v14  ;;  %v2008_v23 = vmul.f32 %v3717_v48, %v1920_v54  ;;  %v2009_v11 = vmul.f32 %v3717_v48, %v1921_v6  ;;  %v1931_v37 = vld [vmem:[#allocation2 + $0x280] sm:$0xff]  ;;  %v1932_v54 = vld [vmem:[#allocation2 + $0x1f8] sm:$0xff] }
 0x252   : > { %2414 = vst [vmem:[%s4150_s5 + $0x108] sm:$0xff] %v2333_v9  ;;  %v2334_v40 = vsel %vm2172_vm4, %v2091_v56, %v2253_v2  ;;  %vm2173_vm5 = vcmp.ge.f32.partialorder %v2092_v45, 0.0  ;;  %v2254_v22 = vmul.f32 0.2, %v2092_v45  ;;  %vm2174_vm6 = vcmp.ge.f32.partialorder %v2093_v1, 0.0 }
 0x253   : > { %2415 = vst [vmem:[%s4150_s5 + $0x110] sm:$0xff] %v2334_v40  ;;  %v2255_v5 = vmul.f32 0.2, %v2093_v1  ;;  %vm2175_vm7 = vcmp.ge.f32.partialorder %v2094_v47, 0.0  ;;  %v2256_v29 = vmul.f32 0.2, %v2094_v47  ;;  %v2096_v13 = vadd.f32 %v3731_v38, %v2008_v23 }
 0x254   : > { %vm2176_vm8 = vcmp.ge.f32.partialorder %v2095_v12, 0.0  ;;  %v2335_v19 = vsel %vm2173_vm5, %v2092_v45, %v2254_v22  ;;  %v2257_v18 = vmul.f32 0.2, %v2095_v12  ;;  %v2097_v36 = vadd.f32 %v3731_v38, %v2009_v11  ;;  %v1933_v45 = vld [vmem:[#allocation2 + $0x180] sm:$0xff] }
 0x255   : > { %2416 = vst [vmem:[%s4150_s5 + $0x118] sm:$0xff] %v2335_v19  ;;  %v2336_v20 = vsel %vm2174_vm6, %v2093_v1, %v2255_v5  ;;  %v2337_v42 = vsel %vm2175_vm7, %v2094_v47, %v2256_v29  ;;  %v2010_v32 = vmul.f32 %v3717_v48, %v1922_v50  ;;  %v2011_v55 = vmul.f32 %v3717_v48, %v1923_v16  ;;  %v1934_v1 = vld [vmem:[#allocation2 + $0x258] sm:$0xff]  ;;  %v1935_v47 = vld [vmem:[#allocation2 + $0x260] sm:$0xff] }
 0x256   : > { %2417 = vst [vmem:[%s4150_s5 + $0x120] sm:$0xff] %v2336_v20  ;;  %2418 = vst [vmem:[%s4150_s5 + $0x128] sm:$0xff] %v2337_v42  ;;  %v2338_v28 = vsel %vm2176_vm8, %v2095_v12, %v2257_v18  ;;  %vm2177_vm9 = vcmp.ge.f32.partialorder %v2096_v13, 0.0  ;;  %v2258_v61 = vmul.f32 0.2, %v2096_v13  ;;  %vm2178_vm10 = vcmp.ge.f32.partialorder %v2097_v36, 0.0 }
 0x257   : > { %2419 = vst [vmem:[%s4150_s5 + $0x130] sm:$0xff] %v2338_v28  ;;  %v2259_v7 = vmul.f32 0.2, %v2097_v36  ;;  %v2098_v58 = vadd.f32 %v3731_v38, %v2010_v32  ;;  %v2099_v24 = vadd.f32 %v3731_v38, %v2011_v55  ;;  %v2012_v27 = vmul.f32 %v3717_v48, %v1924_v33  ;;  %v1936_v19 = vld [vmem:[#allocation2 + $0x100] sm:$0xff]  ;;  %v1937_v18 = vld [vmem:[#allocation2 + $0x1b8] sm:$0xff] }
 0x258   : > { %v2339_v3 = vsel %vm2177_vm9, %v2096_v13, %v2258_v61  ;;  %v2013_v8 = vmul.f32 %v3717_v48, %v1925_v62  ;;  %v2014_v59 = vmul.f32 %v3717_v48, %v1926_v46  ;;  %v2015_v10 = vmul.f32 %v3717_v48, %v1927_v49 }
 0x259   : > { %2420 = vst [vmem:[%s4150_s5 + $0x138] sm:$0xff] %v2339_v3  ;;  %v2340_v17 = vsel %vm2178_vm10, %v2097_v36, %v2259_v7  ;;  %vm2179_vm11 = vcmp.ge.f32.partialorder %v2098_v58, 0.0  ;;  %v2260_v63 = vmul.f32 0.2, %v2098_v58  ;;  %vm2180_vm12 = vcmp.ge.f32.partialorder %v2099_v24, 0.0  ;;  %v1938_v7 = vld [vmem:[#allocation2 + $0x110] sm:$0xff] }
 0x25a   : > { %2421 = vst [vmem:[%s4150_s5 + $0x140] sm:$0xff] %v2340_v17  ;;  %v2261_v21 = vmul.f32 0.2, %v2099_v24  ;;  %v2100_v51 = vadd.f32 %v3731_v38, %v2012_v27  ;;  %v2101_v60 = vadd.f32 %v3731_v38, %v2013_v8  ;;  %v2102_v31 = vadd.f32 %v3731_v38, %v2014_v59 }
 0x25b   : > { %v2341_v26 = vsel %vm2179_vm11, %v2098_v58, %v2260_v63  ;;  %v2103_v25 = vadd.f32 %v3731_v38, %v2015_v10  ;;  %v2016_v39 = vmul.f32 %v3717_v48, %v1928_v15  ;;  %v2017_v41 = vmul.f32 %v3717_v48, %v1929_v34  ;;  %v1939_v58 = vld [vmem:[#allocation2 + $0xa0] sm:$0xff]  ;;  %v1940_v15 = vld [vmem:[#allocation2 + $0x278] sm:$0xff] }
 0x25c   : > { %2422 = vst [vmem:[%s4150_s5 + $0x148] sm:$0xff] %v2341_v26  ;;  %v2342_v43 = vsel %vm2180_vm12, %v2099_v24, %v2261_v21  ;;  %vm2181_vm13 = vcmp.ge.f32.partialorder %v2100_v51, 0.0  ;;  %v2262_v35 = vmul.f32 0.2, %v2100_v51  ;;  %vm2182_vm14 = vcmp.ge.f32.partialorder %v2101_v60, 0.0 }
 0x25d   : > { %2423 = vst [vmem:[%s4150_s5 + $0x150] sm:$0xff] %v2342_v43  ;;  %v2263_v56 = vmul.f32 0.2, %v2101_v60  ;;  %vm2183_vm15 = vcmp.ge.f32.partialorder %v2102_v31, 0.0  ;;  %v2264_v44 = vmul.f32 0.2, %v2102_v31  ;;  %v2104_v53 = vadd.f32 %v3731_v38, %v2016_v39 }
 0x25e   : > { %vm2184_vm0 = vcmp.ge.f32.partialorder %v2103_v25, 0.0  ;;  %v2343_v0 = vsel %vm2181_vm13, %v2100_v51, %v2262_v35  ;;  %v2265_v4 = vmul.f32 0.2, %v2103_v25  ;;  %v2105_v14 = vadd.f32 %v3731_v38, %v2017_v41  ;;  %v1941_v51 = vld [vmem:[#allocation2 + $0x210] sm:$0xff] }
 0x25f   : > { %2424 = vst [vmem:[%s4150_s5 + $0x158] sm:$0xff] %v2343_v0  ;;  %v2344_v6 = vsel %vm2182_vm14, %v2101_v60, %v2263_v56  ;;  %v2345_v30 = vsel %vm2183_vm15, %v2102_v31, %v2264_v44  ;;  %v2018_v57 = vmul.f32 %v3717_v48, %v1930_v52  ;;  %v2019_v2 = vmul.f32 %v3717_v48, %v1931_v37  ;;  %v1942_v60 = vld [vmem:[#allocation2 + $0x78] sm:$0xff]  ;;  %v1943_v31 = vld [vmem:[#allocation2 + $0x130] sm:$0xff] }
 0x260   : > { %2425 = vst [vmem:[%s4150_s5 + $0x160] sm:$0xff] %v2344_v6  ;;  %2426 = vst [vmem:[%s4150_s5 + $0x168] sm:$0xff] %v2345_v30  ;;  %v2346_v9 = vsel %vm2184_vm0, %v2103_v25, %v2265_v4  ;;  %vm2185_vm1 = vcmp.ge.f32.partialorder %v2104_v53, 0.0  ;;  %v2266_v12 = vmul.f32 0.2, %v2104_v53  ;;  %vm2186_vm2 = vcmp.ge.f32.partialorder %v2105_v14, 0.0 }
 0x261   : > { %2427 = vst [vmem:[%s4150_s5 + $0x170] sm:$0xff] %v2346_v9  ;;  %v2267_v23 = vmul.f32 0.2, %v2105_v14  ;;  %v2106_v11 = vadd.f32 %v3731_v38, %v2018_v57  ;;  %v2107_v40 = vadd.f32 %v3731_v38, %v2019_v2  ;;  %v2020_v22 = vmul.f32 %v3717_v48, %v1932_v54  ;;  %v1944_v0 = vld [vmem:[#allocation2 + $0x1f0] sm:$0xff]  ;;  %v1945_v4 = vld [vmem:[#allocation2 + $0xa8] sm:$0xff] }
 0x262   : > { %v2347_v50 = vsel %vm2185_vm1, %v2104_v53, %v2266_v12  ;;  %v2021_v16 = vmul.f32 %v3717_v48, %v1933_v45  ;;  %v2022_v5 = vmul.f32 %v3717_v48, %v1934_v1  ;;  %v2023_v29 = vmul.f32 %v3717_v48, %v1935_v47 }
 0x263   : > { %2428 = vst [vmem:[%s4150_s5 + $0x178] sm:$0xff] %v2347_v50  ;;  %v2348_v13 = vsel %vm2186_vm2, %v2105_v14, %v2267_v23  ;;  %vm2187_vm3 = vcmp.ge.f32.partialorder %v2106_v11, 0.0  ;;  %v2268_v36 = vmul.f32 0.2, %v2106_v11  ;;  %vm2188_vm4 = vcmp.ge.f32.partialorder %v2107_v40, 0.0  ;;  %v1946_v23 = vld [vmem:[#allocation2 + $0x60] sm:$0xff] }
 0x264   : > { %2429 = vst [vmem:[%s4150_s5 + $0x180] sm:$0xff] %v2348_v13  ;;  %v2269_v33 = vmul.f32 0.2, %v2107_v40  ;;  %v2108_v20 = vadd.f32 %v3731_v38, %v2020_v22  ;;  %v2109_v42 = vadd.f32 %v3731_v38, %v2021_v16  ;;  %v2110_v32 = vadd.f32 %v3731_v38, %v2022_v5 }
 0x265   : > { %v2349_v55 = vsel %vm2187_vm3, %v2106_v11, %v2268_v36  ;;  %v2111_v62 = vadd.f32 %v3731_v38, %v2023_v29  ;;  %v2024_v46 = vmul.f32 %v3717_v48, %v1936_v19  ;;  %v2025_v49 = vmul.f32 %v3717_v48, %v1937_v18  ;;  %v1947_v11 = vld [vmem:[#allocation2 + $0x138] sm:$0xff]  ;;  %v1948_v19 = vld [vmem:[#allocation2 + $0xd0] sm:$0xff] }
 0x266   : > { %2430 = vst [vmem:[%s4150_s5 + $0x188] sm:$0xff] %v2349_v55  ;;  %v2350_v28 = vsel %vm2188_vm4, %v2107_v40, %v2269_v33  ;;  %vm2189_vm5 = vcmp.ge.f32.partialorder %v2108_v20, 0.0  ;;  %v2270_v61 = vmul.f32 0.2, %v2108_v20  ;;  %vm2190_vm6 = vcmp.ge.f32.partialorder %v2109_v42, 0.0 }
 0x267   : > { %2431 = vst [vmem:[%s4150_s5 + $0x190] sm:$0xff] %v2350_v28  ;;  %v2271_v24 = vmul.f32 0.2, %v2109_v42  ;;  %vm2191_vm7 = vcmp.ge.f32.partialorder %v2110_v32, 0.0  ;;  %v2272_v27 = vmul.f32 0.2, %v2110_v32  ;;  %v2112_v59 = vadd.f32 %v3731_v38, %v2024_v46 }
 0x268   : > { %vm2192_vm8 = vcmp.ge.f32.partialorder %v2111_v62, 0.0  ;;  %v2351_v3 = vsel %vm2189_vm5, %v2108_v20, %v2270_v61  ;;  %v2273_v8 = vmul.f32 0.2, %v2111_v62  ;;  %v2113_v10 = vadd.f32 %v3731_v38, %v2025_v49  ;;  %v1949_v20 = vld [vmem:[#allocation2 + $0x128] sm:$0xff] }
 0x269   : > { %2432 = vst [vmem:[%s4150_s5 + $0x198] sm:$0xff] %v2351_v3  ;;  %v2352_v34 = vsel %vm2190_vm6, %v2109_v42, %v2271_v24  ;;  %v2353_v17 = vsel %vm2191_vm7, %v2110_v32, %v2272_v27  ;;  %v2026_v63 = vmul.f32 %v3717_v48, %v1938_v7  ;;  %v2027_v21 = vmul.f32 %v3717_v48, %v1939_v58  ;;  %v1950_v42 = vld [vmem:[#allocation2 + $0xb0] sm:$0xff]  ;;  %v1951_v32 = vld [vmem:[#allocation2 + $0x1c0] sm:$0xff]  ;;  %v1952_v3 = vld [vmem:[#allocation2 + $0x88] sm:$0xff] }
 0x26a   : > { %2433 = vst [vmem:[%s4150_s5 + $0x1a0] sm:$0xff] %v2352_v34  ;;  %2434 = vst [vmem:[%s4150_s5 + $0x1a8] sm:$0xff] %v2353_v17  ;;  %v2354_v26 = vsel %vm2192_vm8, %v2111_v62, %v2273_v8  ;;  %vm2193_vm9 = vcmp.ge.f32.partialorder %v2112_v59, 0.0  ;;  %v2274_v25 = vmul.f32 0.2, %v2112_v59  ;;  %vm2194_vm10 = vcmp.ge.f32.partialorder %v2113_v10, 0.0 }
 0x26b   : > { %2435 = vst [vmem:[%s4150_s5 + $0x1b0] sm:$0xff] %v2354_v26  ;;  %v2275_v39 = vmul.f32 0.2, %v2113_v10  ;;  %v2114_v41 = vadd.f32 %v3731_v38, %v2026_v63  ;;  %v2115_v43 = vadd.f32 %v3731_v38, %v2027_v21  ;;  %v2028_v35 = vmul.f32 %v3717_v48, %v1940_v15  ;;  %v1953_v8 = vld [vmem:[#allocation2 + $0x230] sm:$0xff] }
 0x26c   : > { %v2355_v52 = vsel %vm2193_vm9, %v2112_v59, %v2274_v25  ;;  %v2029_v37 = vmul.f32 %v3717_v48, %v1941_v51  ;;  %v2030_v56 = vmul.f32 %v3717_v48, %v1942_v60  ;;  %v2031_v44 = vmul.f32 %v3717_v48, %v1943_v31 }
 0x26d   : > { %2436 = vst [vmem:[%s4150_s5 + $0x1b8] sm:$0xff] %v2355_v52  ;;  %v2356_v53 = vsel %vm2194_vm10, %v2113_v10, %v2275_v39  ;;  %vm2195_vm11 = vcmp.ge.f32.partialorder %v2114_v41, 0.0  ;;  %v2276_v14 = vmul.f32 0.2, %v2114_v41  ;;  %vm2196_vm12 = vcmp.ge.f32.partialorder %v2115_v43, 0.0  ;;  %v1954_v39 = vld [vmem:[#allocation2 + $0x50] sm:$0xff] }
 0x26e   : > { %2437 = vst [vmem:[%s4150_s5 + $0x1c0] sm:$0xff] %v2356_v53  ;;  %v2277_v54 = vmul.f32 0.2, %v2115_v43  ;;  %v2116_v6 = vadd.f32 %v3731_v38, %v2028_v35  ;;  %v2117_v30 = vadd.f32 %v3731_v38, %v2029_v37  ;;  %v2118_v57 = vadd.f32 %v3731_v38, %v2030_v56 }
 0x26f   : > { %v2357_v2 = vsel %vm2195_vm11, %v2114_v41, %v2276_v14  ;;  %v2119_v45 = vadd.f32 %v3731_v38, %v2031_v44  ;;  %v2032_v1 = vmul.f32 %v3717_v48, %v1944_v0  ;;  %v2033_v47 = vmul.f32 %v3717_v48, %v1945_v4  ;;  %v1955_v41 = vld [vmem:[#allocation2 + $0x150] sm:$0xff]  ;;  %v1956_v0 = vld [vmem:[#allocation2 + $0x178] sm:$0xff] }
 0x270   : > { %2438 = vst [vmem:[%s4150_s5 + $0x1c8] sm:$0xff] %v2357_v2  ;;  %v2358_v9 = vsel %vm2196_vm12, %v2115_v43, %v2277_v54  ;;  %vm2197_vm13 = vcmp.ge.f32.partialorder %v2116_v6, 0.0  ;;  %v2278_v12 = vmul.f32 0.2, %v2116_v6  ;;  %vm2198_vm14 = vcmp.ge.f32.partialorder %v2117_v30, 0.0 }
 0x271   : > { %2439 = vst [vmem:[%s4150_s5 + $0x1d0] sm:$0xff] %v2358_v9  ;;  %v2279_v40 = vmul.f32 0.2, %v2117_v30  ;;  %vm2199_vm15 = vcmp.ge.f32.partialorder %v2118_v57, 0.0  ;;  %v2280_v22 = vmul.f32 0.2, %v2118_v57  ;;  %v2120_v5 = vadd.f32 %v3731_v38, %v2032_v1 }
 0x272   : > { %vm2200_vm0 = vcmp.ge.f32.partialorder %v2119_v45, 0.0  ;;  %v2359_v50 = vsel %vm2197_vm13, %v2116_v6, %v2278_v12  ;;  %v2281_v16 = vmul.f32 0.2, %v2119_v45  ;;  %v2121_v29 = vadd.f32 %v3731_v38, %v2033_v47  ;;  %v1957_v6 = vld [vmem:[#allocation2 + $0x240] sm:$0xff] }
 0x273   : > { %2440 = vst [vmem:[%s4150_s5 + $0x1d8] sm:$0xff] %v2359_v50  ;;  %v2360_v18 = vsel %vm2198_vm14, %v2117_v30, %v2279_v40  ;;  %v2361_v13 = vsel %vm2199_vm15, %v2118_v57, %v2280_v22  ;;  %v2034_v36 = vmul.f32 %v3717_v48, %v1946_v23  ;;  %v2035_v33 = vmul.f32 %v3717_v48, %v1947_v11  ;;  %v1958_v30 = vld [vmem:[#allocation2 + $0x118] sm:$0xff]  ;;  %v1959_v57 = vld [vmem:[#allocation2 + $0x208] sm:$0xff] }
 0x274   : > { %2441 = vst [vmem:[%s4150_s5 + $0x1e0] sm:$0xff] %v2360_v18  ;;  %2442 = vst [vmem:[%s4150_s5 + $0x1e8] sm:$0xff] %v2361_v13  ;;  %v2362_v55 = vsel %vm2200_vm0, %v2119_v45, %v2281_v16  ;;  %vm2201_vm1 = vcmp.ge.f32.partialorder %v2120_v5, 0.0  ;;  %v2282_v62 = vmul.f32 0.2, %v2120_v5  ;;  %vm2202_vm2 = vcmp.ge.f32.partialorder %v2121_v29, 0.0 }
 0x275   : > { %2443 = vst [vmem:[%s4150_s5 + $0x1f0] sm:$0xff] %v2362_v55  ;;  %v2283_v46 = vmul.f32 0.2, %v2121_v29  ;;  %v2122_v49 = vadd.f32 %v3731_v38, %v2034_v36  ;;  %v2123_v28 = vadd.f32 %v3731_v38, %v2035_v33  ;;  %v2036_v61 = vmul.f32 %v3717_v48, %v1948_v19  ;;  %v2921_v22 = vld [vmem:[#allocation5] ss:$0 sm:$0xff]  ;;  %v1960_v16 = vld [vmem:[#allocation2 + $0x170] sm:$0xff] }
 0x276   : > { %v2363_v7 = vsel %vm2201_vm1, %v2120_v5, %v2282_v62  ;;  %v2037_v58 = vmul.f32 %v3717_v48, %v1949_v20  ;;  %v2038_v24 = vmul.f32 %v3717_v48, %v1950_v42  ;;  %v2039_v27 = vmul.f32 %v3717_v48, %v1951_v32  ;;  %v1961_v5 = vld [vmem:[#allocation2 + $0x20] sm:$0xff] }
 0x277   : > { %2444 = vst [vmem:[%s4150_s5 + $0x1f8] sm:$0xff] %v2363_v7  ;;  %v2364_v59 = vsel %vm2202_vm2, %v2121_v29, %v2283_v46  ;;  %vm2203_vm3 = vcmp.ge.f32.partialorder %v2122_v49, 0.0  ;;  %v2284_v10 = vmul.f32 0.2, %v2122_v49  ;;  %vm2204_vm4 = vcmp.ge.f32.partialorder %v2123_v28, 0.0 }
 0x278   : > { %2445 = vst [vmem:[%s4150_s5 + $0x200] sm:$0xff] %v2364_v59  ;;  %v2285_v15 = vmul.f32 0.2, %v2123_v28  ;;  %v2124_v34 = vadd.f32 %v3731_v38, %v2036_v61  ;;  %v2125_v17 = vadd.f32 %v3731_v38, %v2037_v58  ;;  %v2126_v63 = vadd.f32 %v3731_v38, %v2038_v24  ;;  %v2922_v61 = vld [vmem:[#allocation6] ss:$0 sm:$0xff] }
 0x279   : > { %v2365_v21 = vsel %vm2203_vm3, %v2122_v49, %v2284_v10  ;;  %v2127_v51 = vadd.f32 %v3731_v38, %v2039_v27  ;;  %v2040_v60 = vmul.f32 %v3717_v48, %v1952_v3  ;;  %v2041_v31 = vmul.f32 %v3717_v48, %v1953_v8 }
 0x27a   : > { %2446 = vst [vmem:[%s4150_s5 + $0x208] sm:$0xff] %v2365_v21  ;;  %v2366_v26 = vsel %vm2204_vm4, %v2123_v28, %v2285_v15  ;;  %vm2205_vm5 = vcmp.ge.f32.partialorder %v2124_v34, 0.0  ;;  %v2286_v25 = vmul.f32 0.2, %v2124_v34  ;;  %vm2206_vm6 = vcmp.ge.f32.partialorder %v2125_v17, 0.0 }
 0x27b   : > { %2447 = vst [vmem:[%s4150_s5 + $0x210] sm:$0xff] %v2366_v26  ;;  %v2287_v43 = vmul.f32 0.2, %v2125_v17  ;;  %vm2207_vm7 = vcmp.ge.f32.partialorder %v2126_v63, 0.0  ;;  %v2288_v35 = vmul.f32 0.2, %v2126_v63  ;;  %v2128_v56 = vadd.f32 %v3731_v38, %v2040_v60 }
 0x27c   : > { %vm2208_vm8 = vcmp.ge.f32.partialorder %v2127_v51, 0.0  ;;  %v2367_v52 = vsel %vm2205_vm5, %v2124_v34, %v2286_v25  ;;  %v2289_v37 = vmul.f32 0.2, %v2127_v51  ;;  %v2129_v44 = vadd.f32 %v3731_v38, %v2041_v31 }
 0x27d   : > { %2448 = vst [vmem:[%s4150_s5 + $0x218] sm:$0xff] %v2367_v52  ;;  %v2368_v4 = vsel %vm2206_vm6, %v2125_v17, %v2287_v43  ;;  %v2369_v53 = vsel %vm2207_vm7, %v2126_v63, %v2288_v35  ;;  %v2042_v14 = vmul.f32 %v3717_v48, %v1954_v39  ;;  %v2043_v54 = vmul.f32 %v3717_v48, %v1955_v41 }
 0x27e   : > { %2449 = vst [vmem:[%s4150_s5 + $0x220] sm:$0xff] %v2368_v4  ;;  %2450 = vst [vmem:[%s4150_s5 + $0x228] sm:$0xff] %v2369_v53  ;;  %v2370_v2 = vsel %vm2208_vm8, %v2127_v51, %v2289_v37  ;;  %vm2209_vm9 = vcmp.ge.f32.partialorder %v2128_v56, 0.0  ;;  %v2290_v45 = vmul.f32 0.2, %v2128_v56  ;;  %vm2210_vm10 = vcmp.ge.f32.partialorder %v2129_v44, 0.0 }
 0x27f   : > { %2451 = vst [vmem:[%s4150_s5 + $0x230] sm:$0xff] %v2370_v2  ;;  %v2291_v1 = vmul.f32 0.2, %v2129_v44  ;;  %v2130_v47 = vadd.f32 %v3731_v38, %v2042_v14  ;;  %v2131_v9 = vadd.f32 %v3731_v38, %v2043_v54  ;;  %v2044_v12 = vmul.f32 %v3717_v48, %v1956_v0 }
 0x280   : > { %v2371_v23 = vsel %vm2209_vm9, %v2128_v56, %v2290_v45  ;;  %v2045_v11 = vmul.f32 %v3717_v48, %v1957_v6  ;;  %v2046_v40 = vmul.f32 %v3717_v48, %v1958_v30  ;;  %v2047_v50 = vmul.f32 %v2921_v22, %v1959_v57 }
 0x281   : > { %2452 = vst [vmem:[%s4150_s5 + $0x238] sm:$0xff] %v2371_v23  ;;  %v2372_v29 = vsel %vm2210_vm10, %v2129_v44, %v2291_v1  ;;  %vm2211_vm11 = vcmp.ge.f32.partialorder %v2130_v47, 0.0  ;;  %v2292_v19 = vmul.f32 0.2, %v2130_v47  ;;  %vm2212_vm12 = vcmp.ge.f32.partialorder %v2131_v9, 0.0 }
 0x282   : > { %2453 = vst [vmem:[%s4150_s5 + $0x240] sm:$0xff] %v2372_v29  ;;  %v2293_v18 = vmul.f32 0.2, %v2131_v9  ;;  %v2132_v13 = vadd.f32 %v3731_v38, %v2044_v12  ;;  %v2133_v48 = vadd.f32 %v3731_v38, %v2045_v11  ;;  %v2134_v36 = vadd.f32 %v3731_v38, %v2046_v40 }
 0x283   : > { %v2373_v33 = vsel %vm2211_vm11, %v2130_v47, %v2292_v19  ;;  %v2135_v20 = vadd.f32 %v3731_v38, %v2047_v50  ;;  %v2048_v42 = vmul.f32 %v2921_v22, %v1960_v16  ;;  %v2049_v32 = vmul.f32 %v2921_v22, %v1961_v5 }
 0x284   : > { %2454 = vst [vmem:[%s4150_s5 + $0x248] sm:$0xff] %v2373_v33  ;;  %v2374_v55 = vsel %vm2212_vm12, %v2131_v9, %v2293_v18  ;;  %vm2213_vm13 = vcmp.ge.f32.partialorder %v2132_v13, 0.0  ;;  %v2294_v62 = vmul.f32 0.2, %v2132_v13  ;;  %vm2214_vm14 = vcmp.ge.f32.partialorder %v2133_v48, 0.0 }
 0x285   : > { %2455 = vst [vmem:[%s4150_s5 + $0x250] sm:$0xff] %v2374_v55  ;;  %v2295_v46 = vmul.f32 0.2, %v2133_v48  ;;  %vm2215_vm15 = vcmp.ge.f32.partialorder %v2134_v36, 0.0  ;;  %v2296_v49 = vmul.f32 0.2, %v2134_v36  ;;  %v2136_v7 = vadd.f32 %v2922_v61, %v2048_v42 }
 0x286   : > { %vm2216_vm0 = vcmp.ge.f32.partialorder %v2135_v20, 0.0  ;;  %v2375_v28 = vsel %vm2213_vm13, %v2132_v13, %v2294_v62  ;;  %v2297_v38 = vmul.f32 0.2, %v2135_v20  ;;  %v2137_v58 = vadd.f32 %v2922_v61, %v2049_v32 }
 0x287   : > { %2456 = vst [vmem:[%s4150_s5 + $0x258] sm:$0xff] %v2375_v28  ;;  %v2376_v24 = vsel %vm2214_vm14, %v2133_v48, %v2295_v46  ;;  %v2377_v27 = vsel %vm2215_vm15, %v2134_v36, %v2296_v49  ;;  %vm2217_vm1 = vcmp.ge.f32.partialorder %v2136_v7, 0.0  ;;  %v2298_v8 = vmul.f32 0.2, %v2136_v7 }
 0x288   : > { %2457 = vst [vmem:[%s4150_s5 + $0x260] sm:$0xff] %v2376_v24  ;;  %2458 = vst [vmem:[%s4150_s5 + $0x268] sm:$0xff] %v2377_v27  ;;  %v2378_v3 = vsel %vm2216_vm0, %v2135_v20, %v2297_v38  ;;  %vm2218_vm2 = vcmp.ge.f32.partialorder %v2137_v58, 0.0  ;;  %v2299_v59 = vmul.f32 0.2, %v2137_v58 }
 0x289   : > { %2459 = vst [vmem:[%s4150_s5 + $0x270] sm:$0xff] %v2378_v3  ;;  %v2379_v10 = vsel %vm2217_vm1, %v2136_v7, %v2298_v8 }
 0x28a   : > { %2460 = vst [vmem:[%s4150_s5 + $0x278] sm:$0xff] %v2379_v10  ;;  %v2380_v15 = vsel %vm2218_vm2, %v2137_v58, %v2299_v59 }
 0x28b   : > { %2461 = vst [vmem:[%s4150_s5 + $0x280] sm:$0xff] %v2380_v15 }
 0x28c PF: > { %s15_s20 = sadd.s32 1, %s2945_s20   ;;  %s4157_s18 = smov %s2941_s19 }
 0x28d   : > { %p12_p6 = scmp.ge.s32.totalorder %s15_s20, 4   ;;  %s4158_s19 = smov %s4160_s21 }
 0x28f   :  { %14 = sbr.rel (!%p12_p6) target bundleno = 2 (0x2), region = 88 }

</bundles_post_ra>
